<compile_context>
chip_gen: v7x
topology: tpu7x:2x2x1
jax: 0.10.0
libtpu: 0.0.40
codegen_flags: <defaults>
</compile_context>

<pallas_src>
import numpy as np
import jax
import jax.numpy as jnp
from jax.experimental import pallas as pl
from jax.experimental.pallas import tpu as pltpu


# ----------------------------------------------------------------- utilities

def _round_up(x, m):
    return (x + m - 1) // m * m


def _tile_dim(dp, cap=512):
    """Largest tile <= cap dividing dp (dp is a multiple of 128)."""
    if dp <= cap:
        return dp
    t = cap
    while dp % t != 0:
        t -= 128
    return t


def _pad2d(a, rows, cols):
    r, c = a.shape
    if (r, c) == (rows, cols):
        return a
    return jnp.pad(a, ((0, rows - r), (0, cols - c)))


def _erf_approx(x):
    # Abramowitz & Stegun 7.1.26 (max abs err ~1.5e-7): matches the exact
    # erf-based torch.nn.GELU() to f32 precision using only exp/mul/add/where,
    # which all lower cleanly inside a Mosaic kernel.
    a1, a2, a3, a4, a5 = (0.254829592, -0.284496736, 1.421413741,
                          -1.453152027, 1.061405429)
    p = 0.3275911
    ax = jnp.abs(x)
    t = 1.0 / (1.0 + p * ax)
    poly = ((((a5 * t + a4) * t + a3) * t + a2) * t + a1) * t
    y = 1.0 - poly * jnp.exp(-ax * ax)
    return jnp.where(x < 0.0, -y, y)


def _gelu_exact(x):
    return 0.5 * x * (1.0 + _erf_approx(x * 0.7071067811865476))


# ------------------------------------------------------------------- kernels

def _make_matmul_kernel(activation, has_residual):
    """Tiled matmul with f32 accumulator; optional fused GELU / residual add."""

    def kernel(*refs):
        if has_residual:
            x_ref, w_ref, b_ref, r_ref, o_ref, acc_ref = refs
        else:
            x_ref, w_ref, b_ref, o_ref, acc_ref = refs
            r_ref = None

        @pl.when(pl.program_id(2) == 0)
        def _():
            acc_ref[...] = jnp.zeros_like(acc_ref)

        acc_ref[...] += jnp.dot(x_ref[...], w_ref[...],
                                preferred_element_type=jnp.float32)

        @pl.when(pl.program_id(2) == pl.num_programs(2) - 1)
        def _():
            y = acc_ref[...] + b_ref[...]
            if activation == "gelu":
                y = _gelu_exact(y)
            if has_residual:
                y = y + r_ref[...]
            o_ref[...] = y.astype(o_ref.dtype)

    return kernel


def _layernorm_kernel(x_ref, g_ref, b_ref, o_ref):
    # x: (tm, C) f32, g/b: (1, C)
    x = x_ref[...]
    mu = jnp.mean(x, axis=-1, keepdims=True)
    xc = x - mu
    var = jnp.mean(xc * xc, axis=-1, keepdims=True)
    o_ref[...] = xc * jax.lax.rsqrt(var + 1e-5) * g_ref[...] + b_ref[...]


def _make_win_attn_kernel(num_heads, head_dim, scale):
    """Window attention for a block of Wb windows, all heads at once.

    q/k/v/o blocks: (Wb, N, C) with C = num_heads*head_dim (lane-dense store);
    bm block:       (Wb, nH, N, N)  = relative-position bias (+ shift mask).
    """

    def kernel(q_ref, k_ref, v_ref, bm_ref, o_ref):
        q_all = q_ref[...]                       # (Wb, N, C) bf16
        k_all = k_ref[...]
        v_all = v_ref[...]
        bm = bm_ref[...]                         # (Wb, nH, N, N) f32
        outs = []
        for h in range(num_heads):               # static unroll over heads
            lo = h * head_dim
            q = q_all[:, :, lo:lo + head_dim]    # (Wb, N, Dh)
            k = k_all[:, :, lo:lo + head_dim]
            v = v_all[:, :, lo:lo + head_dim]
            s = jnp.einsum("wqd,wkd->wqk", q, k,
                           preferred_element_type=jnp.float32)
            s = s * scale + bm[:, h]
            s = s - jnp.max(s, axis=-1, keepdims=True)
            p = jnp.exp(s)
            p = p * pl.reciprocal(jnp.sum(p, axis=-1, keepdims=True),
                                  approx=True)
            outs.append(jnp.einsum("wqk,wkd->wqd", p.astype(v.dtype), v,
                                   preferred_element_type=jnp.float32))
        # single lane-dense store of all heads
        o_ref[...] = jnp.concatenate(outs, axis=-1).astype(o_ref.dtype)

    return kernel


# ------------------------------------------------------------ kernel wrappers

def linear(x, w, b=None, activation=None, residual=None):
    """y = act(x @ w + b) (+ residual); tiled/pipelined Pallas matmul.

    MXU inputs are bf16, accumulation and epilogue in f32.  K and N are zero
    padded to multiples of 128 (lane-dense blocks); M is padded to the row
    tile.  Padding is mathematically a no-op and sliced off afterwards.
    """
    orig_shape = x.shape
    K = orig_shape[-1]
    N = w.shape[-1]
    x2 = x.reshape(-1, K)
    M = x2.shape[0]

    tm = 256 if M >= 256 else _round_up(M, 8)
    Mp = _round_up(M, tm)
    Kp = _round_up(K, 128)
    Np = _round_up(N, 128)
    tk = _tile_dim(Kp)
    tn = _tile_dim(Np)

    xp = _pad2d(x2.astype(jnp.bfloat16), Mp, Kp)
    wp = _pad2d(w.astype(jnp.bfloat16), Kp, Np)
    if b is None:
        bp = jnp.zeros((1, Np), jnp.float32)
    else:
        bp = _pad2d(b.reshape(1, N).astype(jnp.float32), 1, Np)

    inputs = [xp, wp, bp]
    in_specs = [
        pl.BlockSpec((tm, tk), lambda i, j, k: (i, k)),
        pl.BlockSpec((tk, tn), lambda i, j, k: (k, j)),
        pl.BlockSpec((1, tn), lambda i, j, k: (0, j)),
    ]
    has_res = residual is not None
    if has_res:
        rp = _pad2d(residual.reshape(-1, N).astype(jnp.float32), Mp, Np)
        inputs.append(rp)
        in_specs.append(pl.BlockSpec((tm, tn), lambda i, j, k: (i, j)))

    out = pl.pallas_call(
        _make_matmul_kernel(activation, has_res),
        out_shape=jax.ShapeDtypeStruct((Mp, Np), jnp.float32),
        grid=(Mp // tm, Np // tn, Kp // tk),
        in_specs=in_specs,
        out_specs=pl.BlockSpec((tm, tn), lambda i, j, k: (i, j)),
        scratch_shapes=[pltpu.VMEM((tm, tn), jnp.float32)],
        compiler_params=pltpu.CompilerParams(
            dimension_semantics=("parallel", "parallel", "arbitrary"),
            vmem_limit_bytes=32 * 1024 * 1024),
    )(*inputs)
    out = out[:M, :N]
    return out.reshape(orig_shape[:-1] + (N,))


def layer_norm(x, gamma, beta):
    orig_shape = x.shape
    C = orig_shape[-1]
    x2 = x.reshape(-1, C).astype(jnp.float32)
    M = x2.shape[0]
    tm = 256 if M >= 256 else _round_up(M, 8)
    Mp = _round_up(M, tm)
    if Mp != M:
        x2 = jnp.pad(x2, ((0, Mp - M), (0, 0)))
    out = pl.pallas_call(
        _layernorm_kernel,
        out_shape=jax.ShapeDtypeStruct((Mp, C), jnp.float32),
        grid=(Mp // tm,),
        in_specs=[
            pl.BlockSpec((tm, C), lambda i: (i, 0)),
            pl.BlockSpec((1, C), lambda i: (0, 0)),
            pl.BlockSpec((1, C), lambda i: (0, 0)),
        ],
        out_specs=pl.BlockSpec((tm, C), lambda i: (i, 0)),
        compiler_params=pltpu.CompilerParams(
            dimension_semantics=("parallel",)),
    )(x2, gamma.reshape(1, C).astype(jnp.float32),
      beta.reshape(1, C).astype(jnp.float32))
    return out[:M].reshape(orig_shape)


def window_attention_core(q, k, v, bias_mask, num_heads, scale, wb):
    """q,k,v: (B_, N, C) bf16; bias_mask: (nW or Wb, nH, N, N) f32."""
    B_, N, C = q.shape
    nblocks_bm = bias_mask.shape[0] // wb
    if nblocks_bm == 1:
        bm_map = lambda w: (0, 0, 0, 0)
    else:
        bm_map = lambda w: (w % nblocks_bm, 0, 0, 0)
    return pl.pallas_call(
        _make_win_attn_kernel(num_heads, C // num_heads, scale),
        out_shape=jax.ShapeDtypeStruct((B_, N, C), jnp.bfloat16),
        grid=(B_ // wb,),
        in_specs=[
            pl.BlockSpec((wb, N, C), lambda w: (w, 0, 0)),
            pl.BlockSpec((wb, N, C), lambda w: (w, 0, 0)),
            pl.BlockSpec((wb, N, C), lambda w: (w, 0, 0)),
            pl.BlockSpec((wb, num_heads, N, N), bm_map),
        ],
        out_specs=pl.BlockSpec((wb, N, C), lambda w: (w, 0, 0)),
        compiler_params=pltpu.CompilerParams(
            dimension_semantics=("parallel",)),
    )(q, k, v, bias_mask)


# ------------------------------------------------------------------- helpers

def window_partition(x, ws):
    B, H, W, C = x.shape
    x = x.reshape(B, H // ws, ws, W // ws, ws, C)
    x = x.transpose(0, 1, 3, 2, 4, 5)
    return x.reshape(-1, ws, ws, C)


def window_reverse(windows, ws, H, W):
    B = windows.shape[0] // (H * W // ws // ws)
    x = windows.reshape(B, H // ws, W // ws, ws, ws, -1)
    x = x.transpose(0, 1, 3, 2, 4, 5)
    return x.reshape(B, H, W, -1)


def compute_relative_position_index(ws):
    coords = np.stack(np.meshgrid(np.arange(ws), np.arange(ws), indexing="ij"))
    flat = coords.reshape(2, -1)
    rel = flat[:, :, None] - flat[:, None, :]
    rel = rel.transpose(1, 2, 0).astype(np.int64)
    rel[:, :, 0] += ws - 1
    rel[:, :, 1] += ws - 1
    rel[:, :, 0] *= 2 * ws - 1
    return rel.sum(-1)


def create_mask_np(H, W, window_size, shift_size):
    Hp = int(np.ceil(H / window_size)) * window_size
    Wp = int(np.ceil(W / window_size)) * window_size
    img_mask = np.zeros((1, Hp, Wp, 1), np.float32)
    slices = (slice(0, -window_size),
              slice(-window_size, -shift_size),
              slice(-shift_size, None))
    cnt = 0
    for h in slices:
        for w in slices:
            img_mask[:, h, w, :] = cnt
            cnt += 1
    mw = img_mask.reshape(1, Hp // window_size, window_size,
                          Wp // window_size, window_size, 1)
    mw = mw.transpose(0, 1, 3, 2, 4, 5).reshape(-1, window_size * window_size)
    attn_mask = mw[:, None, :] - mw[:, :, None]
    attn_mask = np.where(attn_mask != 0, -100.0, 0.0).astype(np.float32)
    return jnp.asarray(attn_mask)


def _pick_window_block(nW, cap=64):
    wb = min(nW, cap)
    while nW % wb:
        wb -= 1
    return wb


# -------------------------------------------------------------- model blocks

def window_attention(xw, p, num_heads, bias_mask, wb):
    # xw: (B_, N, C) f32; bias_mask: (nW or Wb, nH, N, N) f32
    B_, N, C = xw.shape
    scale = (C // num_heads) ** -0.5
    qkv = linear(xw, p["qkv_w"], p["qkv_b"])                  # (B_, N, 3C) f32
    q = qkv[..., :C].astype(jnp.bfloat16)
    k = qkv[..., C:2 * C].astype(jnp.bfloat16)
    v = qkv[..., 2 * C:].astype(jnp.bfloat16)
    out = window_attention_core(q, k, v, bias_mask, num_heads, scale, wb)
    out = linear(out, p["proj_w"], p["proj_b"])               # (B_, N, C) f32
    return out


def swin_block(x, H, W, p, num_heads, window_size, shift_size, attn_mask):
    B, L, C = x.shape
    N = window_size * window_size
    shortcut = x
    x = layer_norm(x, p["norm1_g"], p["norm1_b"])
    x = x.reshape(B, H, W, C)

    pad_r = (window_size - W % window_size) % window_size
    pad_b = (window_size - H % window_size) % window_size
    if pad_r > 0 or pad_b > 0:
        x = jnp.pad(x, ((0, 0), (0, pad_b), (0, pad_r), (0, 0)))
    Hp, Wp = H + pad_b, W + pad_r
    nW = (Hp // window_size) * (Wp // window_size)
    wb = _pick_window_block(nW)

    if shift_size > 0:
        shifted = jnp.roll(x, (-shift_size, -shift_size), axis=(1, 2))
    else:
        shifted = x

    # relative position bias (+ shift mask) pre-added into one tensor so the
    # attention kernel needs a single extra operand whose block is constant
    # (or periodic with period nW) along the window grid.
    bias = p["attn"]["rpb_table"][p["attn"]["rp_index"].reshape(-1)]
    bias = bias.reshape(N, N, num_heads).transpose(2, 0, 1)        # (nH, N, N)
    if shift_size > 0:
        bm = bias[None, :, :, :] + attn_mask[:, None, :, :]        # (nW,nH,N,N)
    else:
        bm = jnp.broadcast_to(bias[None, :, :, :],
                              (wb, num_heads, N, N))               # one block
    bm = bm.astype(jnp.float32)

    xw = window_partition(shifted, window_size).reshape(-1, N, C)
    aw = window_attention(xw, p["attn"], num_heads, bm, wb)
    aw = aw.reshape(-1, window_size, window_size, C)
    shifted = window_reverse(aw, window_size, Hp, Wp)

    if shift_size > 0:
        x = jnp.roll(shifted, (shift_size, shift_size), axis=(1, 2))
    else:
        x = shifted
    if pad_r > 0 or pad_b > 0:
        x = x[:, :H, :W, :]
    x = x.reshape(B, H * W, C)

    x = shortcut + x  # drop_path is identity in eval mode

    # MLP: GELU fused into fc1 epilogue, residual add fused into fc2 epilogue.
    y = layer_norm(x, p["norm2_g"], p["norm2_b"])
    y = linear(y, p["fc1_w"], p["fc1_b"], activation="gelu")
    x = linear(y, p["fc2_w"], p["fc2_b"], residual=x)
    return x


def patch_merging(x, H, W, p):
    B, L, C = x.shape
    x = x.reshape(B, H, W, C)
    # Faithful to the PyTorch code: pad_input = (H % 2 == 0 or W % 2 == 0),
    # with pad amounts (H % 2, W % 2) -> a zero no-op pad for even H/W.
    if (H % 2 == 0) or (W % 2 == 0):
        x = jnp.pad(x, ((0, 0), (0, H % 2), (0, W % 2), (0, 0)))
    x0 = x[:, 0::2, 0::2, :]
    x1 = x[:, 1::2, 0::2, :]
    x2 = x[:, 0::2, 1::2, :]
    x3 = x[:, 1::2, 1::2, :]
    x = jnp.concatenate([x0, x1, x2, x3], -1)
    x = x.reshape(B, -1, 4 * C)
    x = layer_norm(x, p["norm_g"], p["norm_b"])
    x = linear(x, p["red_w"], None)          # no bias
    return x


def patch_embed(x, p, patch_size, embed_dim):
    # x: (B, Cin, H, W) NCHW
    B, Cin, H, W = x.shape
    if (H % patch_size != 0) or (W % patch_size != 0):
        x = jnp.pad(x, ((0, 0), (0, 0),
                        (0, (patch_size - H % patch_size) % patch_size),
                        (0, (patch_size - W % patch_size) % patch_size)))
        H, W = x.shape[2], x.shape[3]
    Ho, Wo = H // patch_size, W // patch_size
    # conv(k=stride=patch) == per-patch matmul
    patches = x.reshape(B, Cin, Ho, patch_size, Wo, patch_size)
    patches = patches.transpose(0, 2, 4, 1, 3, 5)
    patches = patches.reshape(B * Ho * Wo, Cin * patch_size * patch_size)
    out = linear(patches, p["proj_w"], p["proj_b"])
    out = out.reshape(B, Ho * Wo, embed_dim)
    out = layer_norm(out, p["norm_g"], p["norm_b"])
    return out, Ho, Wo


def swin_forward(params, x, cfg):
    x, H, W = patch_embed(x, params["patch_embed"],
                          cfg["patch_size"], cfg["embed_dim"])
    # pos_drop: identity (eval mode)
    ws = cfg["window_size"]
    ss = ws // 2
    for i, layer_p in enumerate(params["layers"]):
        attn_mask = create_mask_np(H, W, ws, ss) if cfg["depths"][i] > 1 else None
        for bi in range(cfg["depths"][i]):
            shift = 0 if bi % 2 == 0 else ss
            x = swin_block(x, H, W, layer_p["blocks"][bi],
                           cfg["num_heads"][i], ws, shift, attn_mask)
        if layer_p["downsample"] is not None:
            x = patch_merging(x, H, W, layer_p["downsample"])
            H, W = (H + 1) // 2, (W + 1) // 2
    x = layer_norm(x, params["norm_g"], params["norm_b"])
    x = jnp.mean(x, axis=1)                  # AdaptiveAvgPool1d(1) over tokens
    x = linear(x, params["head_w"], params["head_b"])
    return x


# --------------------------------------------------------------- param init

def init_swin_params(key, cfg):
    keys = iter(jax.random.split(key, 256))

    def tn(shape, std=0.02):
        return (std * jax.random.truncated_normal(
            next(keys), -2.0, 2.0, shape)).astype(jnp.float32)

    ps, cin, ed = cfg["patch_size"], cfg["in_channel"], cfg["embed_dim"]
    ws = cfg["window_size"]
    num_layers = len(cfg["depths"])

    params = {
        "patch_embed": {
            "proj_w": tn((cin * ps * ps, ed)),
            "proj_b": jnp.zeros((ed,), jnp.float32),
            "norm_g": jnp.ones((ed,), jnp.float32),
            "norm_b": jnp.zeros((ed,), jnp.float32),
        }
    }
    rp_index = jnp.asarray(compute_relative_position_index(ws), jnp.int32)

    layers = []
    for i in range(num_layers):
        dim = ed * (2 ** i)
        nh = cfg["num_heads"][i]
        hidden = int(dim * cfg["mlp_ratio"])
        blocks = []
        for _ in range(cfg["depths"][i]):
            blocks.append({
                "norm1_g": jnp.ones((dim,), jnp.float32),
                "norm1_b": jnp.zeros((dim,), jnp.float32),
                "norm2_g": jnp.ones((dim,), jnp.float32),
                "norm2_b": jnp.zeros((dim,), jnp.float32),
                "attn": {
                    "qkv_w": tn((dim, 3 * dim)),
                    "qkv_b": jnp.zeros((3 * dim,), jnp.float32),
                    "proj_w": tn((dim, dim)),
                    "proj_b": jnp.zeros((dim,), jnp.float32),
                    "rpb_table": tn(((2 * ws - 1) * (2 * ws - 1), nh)),
                    "rp_index": rp_index,
                },
                "fc1_w": tn((dim, hidden)),
                "fc1_b": jnp.zeros((hidden,), jnp.float32),
                "fc2_w": tn((hidden, dim)),
                "fc2_b": jnp.zeros((dim,), jnp.float32),
            })
        layer = {"blocks": blocks}
        if i < num_layers - 1:
            layer["downsample"] = {
                "norm_g": jnp.ones((4 * dim,), jnp.float32),
                "norm_b": jnp.zeros((4 * dim,), jnp.float32),
                "red_w": tn((4 * dim, 2 * dim)),
            }
        else:
            layer["downsample"] = None
        layers.append(layer)
    params["layers"] = layers

    nf = ed * (2 ** (num_layers - 1))
    params["norm_g"] = jnp.ones((nf,), jnp.float32)
    params["norm_b"] = jnp.zeros((nf,), jnp.float32)
    params["head_w"] = tn((nf, cfg["num_classes"]))
    params["head_b"] = jnp.zeros((cfg["num_classes"],), jnp.float32)
    return params


# --------------------------------------------------------------------- main

if __name__ == "__main__":
    # Small Swin config: 2 stages, embed_dim 32, window 4, input 2x3x32x32.
    cfg = dict(patch_size=4, in_channel=3, num_classes=10, embed_dim=32,
               depths=(2, 2), num_heads=(2, 4), window_size=4, mlp_ratio=4.0)

    key = jax.random.PRNGKey(0)
    pkey, xkey = jax.random.split(key)
    params = init_swin_params(pkey, cfg)
    x = jax.random.normal(xkey, (2, 3, 32, 32), jnp.float32)   # NCHW input

    fwd = jax.jit(lambda p, inp: swin_forward(p, inp, cfg))
    out = fwd(params, x)
    jax.block_until_ready(out)

    assert out.shape == (2, cfg["num_classes"])
    assert bool(jnp.all(jnp.isfinite(out)))
    # TODO(synk): dropout / drop_path / attn_drop are eval-mode identities;
    # training-mode stochastic paths are not implemented.
    print("KERNEL_OK")
</pallas_src>

<mosaic_0001>
module attributes {stable_mosaic.version = 11 : i64} {
  func.func @kernel(%arg0: i32, %arg1: i32, %arg2: i32, %arg3: memref<128x128xbf16, #tpu.memory_space<vmem>>, %arg4: memref<128x128xbf16, #tpu.memory_space<vmem>>, %arg5: memref<1x128xf32, #tpu.memory_space<vmem>>, %arg6: memref<128x128xf32, #tpu.memory_space<vmem>>, %arg7: memref<128x128xf32, #tpu.memory_space<vmem>>) attributes {dimension_semantics = [#tpu.dimension_semantics<parallel>, #tpu.dimension_semantics<parallel>, #tpu.dimension_semantics<arbitrary>], iteration_bounds = array<i64: 1, 1, 1>, scalar_prefetch = 0 : i64, scratch_operands = 1 : i64, tpu.core_type = #tpu.core_type<tc>, window_params = [{transform_indices = @transform_0, window_bounds = array<i64: 128, 128>}, {transform_indices = @transform_1, window_bounds = array<i64: 128, 128>}, {transform_indices = @transform_2, window_bounds = array<i64: 1, 128>}, {transform_indices = @transform_3, window_bounds = array<i64: 128, 128>}]} {
    %c0_i32 = arith.constant 0 : i32
    %0 = arith.cmpi eq, %arg2, %c0_i32 : i32
    %1 = arith.extui %0 : i1 to i32
    %c0_i32_0 = arith.constant 0 : i32
    %2 = arith.cmpi ne, %1, %c0_i32_0 : i32
    scf.if %2 {
      %cst_10 = arith.constant 0.000000e+00 : f32
      %12 = vector.broadcast %cst_10 : f32 to vector<128x128xf32>
      %c0_11 = arith.constant 0 : index
      %c0_12 = arith.constant 0 : index
      %13 = vector.load %arg7[%c0_11, %c0_12] : memref<128x128xf32, #tpu.memory_space<vmem>>, vector<128x128xf32>
      tpu.vector_store %arg7[%c0_11, %c0_12], %12 {strides = array<i32>} : memref<128x128xf32, #tpu.memory_space<vmem>>, vector<128x128xf32>,
    } else {
    }
    %c0 = arith.constant 0 : index
    %c0_1 = arith.constant 0 : index
    %3 = vector.load %arg7[%c0, %c0_1] : memref<128x128xf32, #tpu.memory_space<vmem>>, vector<128x128xf32>
    %c0_2 = arith.constant 0 : index
    %c0_3 = arith.constant 0 : index
    %4 = vector.load %arg3[%c0_2, %c0_3] : memref<128x128xbf16, #tpu.memory_space<vmem>>, vector<128x128xbf16>
    %c0_4 = arith.constant 0 : index
    %c0_5 = arith.constant 0 : index
    %5 = vector.load %arg4[%c0_4, %c0_5] : memref<128x128xbf16, #tpu.memory_space<vmem>>, vector<128x128xbf16>
    %cst = arith.constant dense<0.000000e+00> : vector<128x128xf32>
    %6 = tpu.matmul %4, %5, %cst {dimension_numbers = #tpu.dot_dimension_numbers<[1], [0], [0], [1], [0, 0, 1, 1], [], []>} : vector<128x128xbf16>, vector<128x128xbf16>, vector<128x128xf32> -> vector<128x128xf32>
    %7 = arith.addf %3, %6 : vector<128x128xf32>
    %c0_6 = arith.constant 0 : index
    %c0_7 = arith.constant 0 : index
    %8 = vector.load %arg7[%c0_6, %c0_7] : memref<128x128xf32, #tpu.memory_space<vmem>>, vector<128x128xf32>
    tpu.vector_store %arg7[%c0_6, %c0_7], %7 {strides = array<i32>} : memref<128x128xf32, #tpu.memory_space<vmem>>, vector<128x128xf32>,
    %c0_i32_8 = arith.constant 0 : i32
    %9 = arith.cmpi eq, %arg2, %c0_i32_8 : i32
    %10 = arith.extui %9 : i1 to i32
    %c0_i32_9 = arith.constant 0 : i32
    %11 = arith.cmpi ne, %10, %c0_i32_9 : i32
    scf.if %11 {
      %c0_10 = arith.constant 0 : index
      %c0_11 = arith.constant 0 : index
      %12 = vector.load %arg7[%c0_10, %c0_11] : memref<128x128xf32, #tpu.memory_space<vmem>>, vector<128x128xf32>
      %c0_12 = arith.constant 0 : index
      %c0_13 = arith.constant 0 : index
      %13 = vector.load %arg5[%c0_12, %c0_13] : memref<1x128xf32, #tpu.memory_space<vmem>>, vector<1x128xf32>
      %14 = vector.broadcast %13 : vector<1x128xf32> to vector<128x128xf32>
      %15 = arith.addf %12, %14 : vector<128x128xf32>
      %c0_14 = arith.constant 0 : index
      %c0_15 = arith.constant 0 : index
      %16 = vector.load %arg6[%c0_14, %c0_15] : memref<128x128xf32, #tpu.memory_space<vmem>>, vector<128x128xf32>
      tpu.vector_store %arg6[%c0_14, %c0_15], %15 {strides = array<i32>} : memref<128x128xf32, #tpu.memory_space<vmem>>, vector<128x128xf32>,
    } else {
    }
    return
  }
  func.func @transform_0(%arg0: i32, %arg1: i32, %arg2: i32) -> (i32, i32) {
    %c0_i32 = arith.constant 0 : i32
    return %arg0, %arg2 : i32, i32
  }
  func.func @transform_1(%arg0: i32, %arg1: i32, %arg2: i32) -> (i32, i32) {
    %c0_i32 = arith.constant 0 : i32
    return %arg2, %arg1 : i32, i32
  }
  func.func @transform_2(%arg0: i32, %arg1: i32, %arg2: i32) -> (i32, i32) {
    %c0_i32 = arith.constant 0 : i32
    %c0_i32_0 = arith.constant 0 : i32
    return %c0_i32, %arg1 : i32, i32
  }
  func.func @transform_3(%arg0: i32, %arg1: i32, %arg2: i32) -> (i32, i32) {
    %c0_i32 = arith.constant 0 : i32
    return %arg0, %arg1 : i32, i32
  }
}

module attributes {stable_mosaic.version = 11 : i64} {
  func.func @_layernorm_kernel(%arg0: i32, %arg1: memref<128x32xf32, #tpu.memory_space<vmem>>, %arg2: memref<1x32xf32, #tpu.memory_space<vmem>>, %arg3: memref<1x32xf32, #tpu.memory_space<vmem>>, %arg4: memref<128x32xf32, #tpu.memory_space<vmem>>) attributes {dimension_semantics = [#tpu.dimension_semantics<parallel>], iteration_bounds = array<i64: 1>, scalar_prefetch = 0 : i64, scratch_operands = 0 : i64, tpu.core_type = #tpu.core_type<tc>, window_params = [{transform_indices = @transform_0, window_bounds = array<i64: 128, 32>}, {pipeline_mode = #tpu.pipeline_mode<synchronous>, transform_indices = @transform_1, window_bounds = array<i64: 1, 32>}, {pipeline_mode = #tpu.pipeline_mode<synchronous>, transform_indices = @transform_2, window_bounds = array<i64: 1, 32>}, {transform_indices = @transform_3, window_bounds = array<i64: 128, 32>}]} {
    %c0 = arith.constant 0 : index
    %c0_0 = arith.constant 0 : index
    %0 = vector.load %arg1[%c0, %c0_0] : memref<128x32xf32, #tpu.memory_space<vmem>>, vector<128x32xf32>
    %cst = arith.constant dense<0.000000e+00> : vector<128xf32>
    %1 = vector.multi_reduction <add>, %0, %cst [1] : vector<128x32xf32> to vector<128xf32>
    %2 = vector.shape_cast %1 : vector<128xf32> to vector<128x1xf32>
    %cst_1 = arith.constant 3.200000e+01 : f32
    %3 = vector.broadcast %cst_1 : f32 to vector<128x1xf32>
    %4 = arith.divf %2, %3 : vector<128x1xf32>
    %5 = vector.broadcast %4 : vector<128x1xf32> to vector<128x32xf32>
    %6 = arith.subf %0, %5 : vector<128x32xf32>
    %7 = arith.mulf %6, %6 : vector<128x32xf32>
    %cst_2 = arith.constant dense<0.000000e+00> : vector<128xf32>
    %8 = vector.multi_reduction <add>, %7, %cst_2 [1] : vector<128x32xf32> to vector<128xf32>
    %9 = vector.shape_cast %8 : vector<128xf32> to vector<128x1xf32>
    %cst_3 = arith.constant 3.200000e+01 : f32
    %10 = vector.broadcast %cst_3 : f32 to vector<128x1xf32>
    %11 = arith.divf %9, %10 : vector<128x1xf32>
    %cst_4 = arith.constant 9.99999974E-6 : f32
    %12 = vector.broadcast %cst_4 : f32 to vector<128x1xf32>
    %13 = arith.addf %11, %12 : vector<128x1xf32>
    %14 = math.rsqrt %13 : vector<128x1xf32>
    %15 = vector.broadcast %14 : vector<128x1xf32> to vector<128x32xf32>
    %16 = arith.mulf %6, %15 : vector<128x32xf32>
    %c0_5 = arith.constant 0 : index
    %c0_6 = arith.constant 0 : index
    %17 = vector.load %arg2[%c0_5, %c0_6] : memref<1x32xf32, #tpu.memory_space<vmem>>, vector<1x32xf32>
    %18 = vector.broadcast %17 : vector<1x32xf32> to vector<128x32xf32>
    %19 = arith.mulf %16, %18 : vector<128x32xf32>
    %c0_7 = arith.constant 0 : index
    %c0_8 = arith.constant 0 : index
    %20 = vector.load %arg3[%c0_7, %c0_8] : memref<1x32xf32, #tpu.memory_space<vmem>>, vector<1x32xf32>
    %21 = vector.broadcast %20 : vector<1x32xf32> to vector<128x32xf32>
    %22 = arith.addf %19, %21 : vector<128x32xf32>
    %c0_9 = arith.constant 0 : index
    %c0_10 = arith.constant 0 : index
    %23 = vector.load %arg4[%c0_9, %c0_10] : memref<128x32xf32, #tpu.memory_space<vmem>>, vector<128x32xf32>
    tpu.vector_store %arg4[%c0_9, %c0_10], %22 {strides = array<i32>} : memref<128x32xf32, #tpu.memory_space<vmem>>, vector<128x32xf32>,
    return
  }
  func.func @transform_0(%arg0: i32) -> (i32, i32) {
    %c0_i32 = arith.constant 0 : i32
    %c0_i32_0 = arith.constant 0 : i32
    return %arg0, %c0_i32 : i32, i32
  }
  func.func @transform_1(%arg0: i32) -> (i32, i32) {
    %c0_i32 = arith.constant 0 : i32
    %c0_i32_0 = arith.constant 0 : i32
    %c0_i32_1 = arith.constant 0 : i32
    return %c0_i32, %c0_i32_0 : i32, i32
  }
  func.func @transform_2(%arg0: i32) -> (i32, i32) {
    %c0_i32 = arith.constant 0 : i32
    %c0_i32_0 = arith.constant 0 : i32
    %c0_i32_1 = arith.constant 0 : i32
    return %c0_i32, %c0_i32_0 : i32, i32
  }
  func.func @transform_3(%arg0: i32) -> (i32, i32) {
    %c0_i32 = arith.constant 0 : i32
    %c0_i32_0 = arith.constant 0 : i32
    return %arg0, %c0_i32 : i32, i32
  }
}

module attributes {stable_mosaic.version = 11 : i64} {
  func.func @kernel(%arg0: i32, %arg1: memref<4x16x32xbf16, #tpu.memory_space<vmem>>, %arg2: memref<4x16x32xbf16, #tpu.memory_space<vmem>>, %arg3: memref<4x16x32xbf16, #tpu.memory_space<vmem>>, %arg4: memref<4x2x16x16xf32, #tpu.memory_space<vmem>>, %arg5: memref<4x16x32xbf16, #tpu.memory_space<vmem>>) attributes {dimension_semantics = [#tpu.dimension_semantics<parallel>], iteration_bounds = array<i64: 2>, scalar_prefetch = 0 : i64, scratch_operands = 0 : i64, tpu.core_type = #tpu.core_type<tc>, window_params = [{transform_indices = @transform_0, window_bounds = array<i64: 4, 16, 32>}, {transform_indices = @transform_1, window_bounds = array<i64: 4, 16, 32>}, {transform_indices = @transform_2, window_bounds = array<i64: 4, 16, 32>}, {pipeline_mode = #tpu.pipeline_mode<synchronous>, transform_indices = @transform_3, window_bounds = array<i64: 4, 2, 16, 16>}, {transform_indices = @transform_4, window_bounds = array<i64: 4, 16, 32>}]} {
    %c0 = arith.constant 0 : index
    %c0_0 = arith.constant 0 : index
    %c0_1 = arith.constant 0 : index
    %0 = vector.load %arg1[%c0, %c0_0, %c0_1] : memref<4x16x32xbf16, #tpu.memory_space<vmem>>, vector<4x16x32xbf16>
    %c0_2 = arith.constant 0 : index
    %c0_3 = arith.constant 0 : index
    %c0_4 = arith.constant 0 : index
    %1 = vector.load %arg2[%c0_2, %c0_3, %c0_4] : memref<4x16x32xbf16, #tpu.memory_space<vmem>>, vector<4x16x32xbf16>
    %c0_5 = arith.constant 0 : index
    %c0_6 = arith.constant 0 : index
    %c0_7 = arith.constant 0 : index
    %2 = vector.load %arg3[%c0_5, %c0_6, %c0_7] : memref<4x16x32xbf16, #tpu.memory_space<vmem>>, vector<4x16x32xbf16>
    %c0_8 = arith.constant 0 : index
    %c0_9 = arith.constant 0 : index
    %c0_10 = arith.constant 0 : index
    %c0_11 = arith.constant 0 : index
    %3 = vector.load %arg4[%c0_8, %c0_9, %c0_10, %c0_11] : memref<4x2x16x16xf32, #tpu.memory_space<vmem>>, vector<4x2x16x16xf32>
    %4 = vector.extract_strided_slice %0 {offsets = [0, 0, 0], sizes = [4, 16, 16], strides = [1, 1, 1]} : vector<4x16x32xbf16> to vector<4x16x16xbf16>
    %5 = vector.extract_strided_slice %1 {offsets = [0, 0, 0], sizes = [4, 16, 16], strides = [1, 1, 1]} : vector<4x16x32xbf16> to vector<4x16x16xbf16>
    %6 = vector.extract_strided_slice %2 {offsets = [0, 0, 0], sizes = [4, 16, 16], strides = [1, 1, 1]} : vector<4x16x32xbf16> to vector<4x16x16xbf16>
    "tpu.trace_start"() <{level = 10 : i32, message = "wqd,wkd->wqk"}> : () -> ()
    %cst = arith.constant dense<0.000000e+00> : vector<4x16x16xf32>
    %7 = tpu.matmul %4, %5, %cst {dimension_numbers = #tpu.dot_dimension_numbers<[2], [2], [1], [1], [0, 0, 0, 1, 1, 1], [0], [0]>} : vector<4x16x16xbf16>, vector<4x16x16xbf16>, vector<4x16x16xf32> -> vector<4x16x16xf32>
    "tpu.trace_stop"() : () -> ()
    %cst_12 = arith.constant 2.500000e-01 : f32
    %8 = vector.broadcast %cst_12 : f32 to vector<4x16x16xf32>
    %9 = arith.mulf %7, %8 : vector<4x16x16xf32>
    %10 = vector.extract_strided_slice %3 {offsets = [0, 0, 0, 0], sizes = [4, 1, 16, 16], strides = [1, 1, 1, 1]} : vector<4x2x16x16xf32> to vector<4x1x16x16xf32>
    %11 = vector.shape_cast %10 : vector<4x1x16x16xf32> to vector<4x16x16xf32>
    %12 = arith.addf %9, %11 : vector<4x16x16xf32>
    %cst_13 = arith.constant dense<0xFF800000> : vector<4x16xf32>
    %13 = vector.multi_reduction <maximumf>, %12, %cst_13 [2] : vector<4x16x16xf32> to vector<4x16xf32>
    %14 = vector.shape_cast %13 : vector<4x16xf32> to vector<4x16x1xf32>
    %15 = vector.broadcast %14 : vector<4x16x1xf32> to vector<4x16x16xf32>
    %16 = arith.subf %12, %15 : vector<4x16x16xf32>
    %17 = math.exp %16 : vector<4x16x16xf32>
    %cst_14 = arith.constant dense<0.000000e+00> : vector<4x16xf32>
    %18 = vector.multi_reduction <add>, %17, %cst_14 [2] : vector<4x16x16xf32> to vector<4x16xf32>
    %19 = vector.shape_cast %18 : vector<4x16xf32> to vector<4x16x1xf32>
    %20 = tpu.reciprocal %19 {approx = true} : vector<4x16x1xf32> -> vector<4x16x1xf32>
    %21 = vector.broadcast %20 : vector<4x16x1xf32> to vector<4x16x16xf32>
    %22 = arith.mulf %17, %21 : vector<4x16x16xf32>
    %23 = arith.truncf %22 : vector<4x16x16xf32> to vector<4x16x16xbf16>
    "tpu.trace_start"() <{level = 10 : i32, message = "wqk,wkd->wqd"}> : () -> ()
    %cst_15 = arith.constant dense<0.000000e+00> : vector<4x16x16xf32>
    %24 = tpu.matmul %23, %6, %cst_15 {dimension_numbers = #tpu.dot_dimension_numbers<[2], [1], [1], [2], [0, 0, 0, 1, 1, 2], [0], [0]>} : vector<4x16x16xbf16>, vector<4x16x16xbf16>, vector<4x16x16xf32> -> vector<4x16x16xf32>
    "tpu.trace_stop"() : () -> ()
    %25 = vector.extract_strided_slice %0 {offsets = [0, 0, 16], sizes = [4, 16, 16], strides = [1, 1, 1]} : vector<4x16x32xbf16> to vector<4x16x16xbf16>
    %26 = vector.extract_strided_slice %1 {offsets = [0, 0, 16], sizes = [4, 16, 16], strides = [1, 1, 1]} : vector<4x16x32xbf16> to vector<4x16x16xbf16>
    %27 = vector.extract_strided_slice %2 {offsets = [0, 0, 16], sizes = [4, 16, 16], strides = [1, 1, 1]} : vector<4x16x32xbf16> to vector<4x16x16xbf16>
    "tpu.trace_start"() <{level = 10 : i32, message = "wqd,wkd->wqk"}> : () -> ()
    %cst_16 = arith.constant dense<0.000000e+00> : vector<4x16x16xf32>
    %28 = tpu.matmul %25, %26, %cst_16 {dimension_numbers = #tpu.dot_dimension_numbers<[2], [2], [1], [1], [0, 0, 0, 1, 1, 1], [0], [0]>} : vector<4x16x16xbf16>, vector<4x16x16xbf16>, vector<4x16x16xf32> -> vector<4x16x16xf32>
    "tpu.trace_stop"() : () -> ()
    %cst_17 = arith.constant 2.500000e-01 : f32
    %29 = vector.broadcast %cst_17 : f32 to vector<4x16x16xf32>
    %30 = arith.mulf %28, %29 : vector<4x16x16xf32>
    %31 = vector.extract_strided_slice %3 {offsets = [0, 1, 0, 0], sizes = [4, 1, 16, 16], strides = [1, 1, 1, 1]} : vector<4x2x16x16xf32> to vector<4x1x16x16xf32>
    %32 = vector.shape_cast %31 : vector<4x1x16x16xf32> to vector<4x16x16xf32>
    %33 = arith.addf %30, %32 : vector<4x16x16xf32>
    %cst_18 = arith.constant dense<0xFF800000> : vector<4x16xf32>
    %34 = vector.multi_reduction <maximumf>, %33, %cst_18 [2] : vector<4x16x16xf32> to vector<4x16xf32>
    %35 = vector.shape_cast %34 : vector<4x16xf32> to vector<4x16x1xf32>
    %36 = vector.broadcast %35 : vector<4x16x1xf32> to vector<4x16x16xf32>
    %37 = arith.subf %33, %36 : vector<4x16x16xf32>
    %38 = math.exp %37 : vector<4x16x16xf32>
    %cst_19 = arith.constant dense<0.000000e+00> : vector<4x16xf32>
    %39 = vector.multi_reduction <add>, %38, %cst_19 [2] : vector<4x16x16xf32> to vector<4x16xf32>
    %40 = vector.shape_cast %39 : vector<4x16xf32> to vector<4x16x1xf32>
    %41 = tpu.reciprocal %40 {approx = true} : vector<4x16x1xf32> -> vector<4x16x1xf32>
    %42 = vector.broadcast %41 : vector<4x16x1xf32> to vector<4x16x16xf32>
    %43 = arith.mulf %38, %42 : vector<4x16x16xf32>
    %44 = arith.truncf %43 : vector<4x16x16xf32> to vector<4x16x16xbf16>
    "tpu.trace_start"() <{level = 10 : i32, message = "wqk,wkd->wqd"}> : () -> ()
    %cst_20 = arith.constant dense<0.000000e+00> : vector<4x16x16xf32>
    %45 = tpu.matmul %44, %27, %cst_20 {dimension_numbers = #tpu.dot_dimension_numbers<[2], [1], [1], [2], [0, 0, 0, 1, 1, 2], [0], [0]>} : vector<4x16x16xbf16>, vector<4x16x16xbf16>, vector<4x16x16xf32> -> vector<4x16x16xf32>
    "tpu.trace_stop"() : () -> ()
    %46 = tpu.concatenate %24, %45 in 2 : vector<4x16x16xf32>, vector<4x16x16xf32> -> vector<4x16x32xf32>
    %47 = arith.truncf %46 : vector<4x16x32xf32> to vector<4x16x32xbf16>
    %c0_21 = arith.constant 0 : index
    %c0_22 = arith.constant 0 : index
    %c0_23 = arith.constant 0 : index
    %48 = vector.load %arg5[%c0_21, %c0_22, %c0_23] : memref<4x16x32xbf16, #tpu.memory_space<vmem>>, vector<4x16x32xbf16>
    tpu.vector_store %arg5[%c0_21, %c0_22, %c0_23], %47 {strides = array<i32>} : memref<4x16x32xbf16, #tpu.memory_space<vmem>>, vector<4x16x32xbf16>,
    return
  }
  func.func @transform_0(%arg0: i32) -> (i32, i32, i32) {
    %c0_i32 = arith.constant 0 : i32
    %c0_i32_0 = arith.constant 0 : i32
    %c0_i32_1 = arith.constant 0 : i32
    return %arg0, %c0_i32, %c0_i32_0 : i32, i32, i32
  }
  func.func @transform_1(%arg0: i32) -> (i32, i32, i32) {
    %c0_i32 = arith.constant 0 : i32
    %c0_i32_0 = arith.constant 0 : i32
    %c0_i32_1 = arith.constant 0 : i32
    return %arg0, %c0_i32, %c0_i32_0 : i32, i32, i32
  }
  func.func @transform_2(%arg0: i32) -> (i32, i32, i32) {
    %c0_i32 = arith.constant 0 : i32
    %c0_i32_0 = arith.constant 0 : i32
    %c0_i32_1 = arith.constant 0 : i32
    return %arg0, %c0_i32, %c0_i32_0 : i32, i32, i32
  }
  func.func @transform_3(%arg0: i32) -> (i32, i32, i32, i32) {
    %c0_i32 = arith.constant 0 : i32
    %c0_i32_0 = arith.constant 0 : i32
    %c0_i32_1 = arith.constant 0 : i32
    %c0_i32_2 = arith.constant 0 : i32
    %c0_i32_3 = arith.constant 0 : i32
    return %c0_i32, %c0_i32_0, %c0_i32_1, %c0_i32_2 : i32, i32, i32, i32
  }
  func.func @transform_4(%arg0: i32) -> (i32, i32, i32) {
    %c0_i32 = arith.constant 0 : i32
    %c0_i32_0 = arith.constant 0 : i32
    %c0_i32_1 = arith.constant 0 : i32
    return %arg0, %c0_i32, %c0_i32_0 : i32, i32, i32
  }
}

module attributes {stable_mosaic.version = 11 : i64} {
  func.func @kernel(%arg0: i32, %arg1: i32, %arg2: i32, %arg3: memref<128x128xbf16, #tpu.memory_space<vmem>>, %arg4: memref<128x128xbf16, #tpu.memory_space<vmem>>, %arg5: memref<1x128xf32, #tpu.memory_space<vmem>>, %arg6: memref<128x128xf32, #tpu.memory_space<vmem>>, %arg7: memref<128x128xf32, #tpu.memory_space<vmem>>) attributes {dimension_semantics = [#tpu.dimension_semantics<parallel>, #tpu.dimension_semantics<parallel>, #tpu.dimension_semantics<arbitrary>], iteration_bounds = array<i64: 1, 1, 1>, scalar_prefetch = 0 : i64, scratch_operands = 1 : i64, tpu.core_type = #tpu.core_type<tc>, window_params = [{transform_indices = @transform_0, window_bounds = array<i64: 128, 128>}, {transform_indices = @transform_1, window_bounds = array<i64: 128, 128>}, {transform_indices = @transform_2, window_bounds = array<i64: 1, 128>}, {transform_indices = @transform_3, window_bounds = array<i64: 128, 128>}]} {
    %c0_i32 = arith.constant 0 : i32
    %0 = arith.cmpi eq, %arg2, %c0_i32 : i32
    %1 = arith.extui %0 : i1 to i32
    %c0_i32_0 = arith.constant 0 : i32
    %2 = arith.cmpi ne, %1, %c0_i32_0 : i32
    scf.if %2 {
      %cst_10 = arith.constant 0.000000e+00 : f32
      %12 = vector.broadcast %cst_10 : f32 to vector<128x128xf32>
      %c0_11 = arith.constant 0 : index
      %c0_12 = arith.constant 0 : index
      %13 = vector.load %arg7[%c0_11, %c0_12] : memref<128x128xf32, #tpu.memory_space<vmem>>, vector<128x128xf32>
      tpu.vector_store %arg7[%c0_11, %c0_12], %12 {strides = array<i32>} : memref<128x128xf32, #tpu.memory_space<vmem>>, vector<128x128xf32>,
    } else {
    }
    %c0 = arith.constant 0 : index
    %c0_1 = arith.constant 0 : index
    %3 = vector.load %arg7[%c0, %c0_1] : memref<128x128xf32, #tpu.memory_space<vmem>>, vector<128x128xf32>
    %c0_2 = arith.constant 0 : index
    %c0_3 = arith.constant 0 : index
    %4 = vector.load %arg3[%c0_2, %c0_3] : memref<128x128xbf16, #tpu.memory_space<vmem>>, vector<128x128xbf16>
    %c0_4 = arith.constant 0 : index
    %c0_5 = arith.constant 0 : index
    %5 = vector.load %arg4[%c0_4, %c0_5] : memref<128x128xbf16, #tpu.memory_space<vmem>>, vector<128x128xbf16>
    %cst = arith.constant dense<0.000000e+00> : vector<128x128xf32>
    %6 = tpu.matmul %4, %5, %cst {dimension_numbers = #tpu.dot_dimension_numbers<[1], [0], [0], [1], [0, 0, 1, 1], [], []>} : vector<128x128xbf16>, vector<128x128xbf16>, vector<128x128xf32> -> vector<128x128xf32>
    %7 = arith.addf %3, %6 : vector<128x128xf32>
    %c0_6 = arith.constant 0 : index
    %c0_7 = arith.constant 0 : index
    %8 = vector.load %arg7[%c0_6, %c0_7] : memref<128x128xf32, #tpu.memory_space<vmem>>, vector<128x128xf32>
    tpu.vector_store %arg7[%c0_6, %c0_7], %7 {strides = array<i32>} : memref<128x128xf32, #tpu.memory_space<vmem>>, vector<128x128xf32>,
    %c0_i32_8 = arith.constant 0 : i32
    %9 = arith.cmpi eq, %arg2, %c0_i32_8 : i32
    %10 = arith.extui %9 : i1 to i32
    %c0_i32_9 = arith.constant 0 : i32
    %11 = arith.cmpi ne, %10, %c0_i32_9 : i32
    scf.if %11 {
      %c0_10 = arith.constant 0 : index
      %c0_11 = arith.constant 0 : index
      %12 = vector.load %arg7[%c0_10, %c0_11] : memref<128x128xf32, #tpu.memory_space<vmem>>, vector<128x128xf32>
      %c0_12 = arith.constant 0 : index
      %c0_13 = arith.constant 0 : index
      %13 = vector.load %arg5[%c0_12, %c0_13] : memref<1x128xf32, #tpu.memory_space<vmem>>, vector<1x128xf32>
      %14 = vector.broadcast %13 : vector<1x128xf32> to vector<128x128xf32>
      %15 = arith.addf %12, %14 : vector<128x128xf32>
      %cst_14 = arith.constant 5.000000e-01 : f32
      %16 = vector.broadcast %cst_14 : f32 to vector<128x128xf32>
      %17 = arith.mulf %16, %15 : vector<128x128xf32>
      %cst_15 = arith.constant 0.707106769 : f32
      %18 = vector.broadcast %cst_15 : f32 to vector<128x128xf32>
      %19 = arith.mulf %15, %18 : vector<128x128xf32>
      %20 = math.absf %19 : vector<128x128xf32>
      %cst_16 = arith.constant 0.327591091 : f32
      %21 = vector.broadcast %cst_16 : f32 to vector<128x128xf32>
      %22 = arith.mulf %21, %20 : vector<128x128xf32>
      %cst_17 = arith.constant 1.000000e+00 : f32
      %23 = vector.broadcast %cst_17 : f32 to vector<128x128xf32>
      %24 = arith.addf %23, %22 : vector<128x128xf32>
      %cst_18 = arith.constant 1.000000e+00 : f32
      %25 = vector.broadcast %cst_18 : f32 to vector<128x128xf32>
      %26 = arith.divf %25, %24 : vector<128x128xf32>
      %cst_19 = arith.constant 1.06140542 : f32
      %27 = vector.broadcast %cst_19 : f32 to vector<128x128xf32>
      %28 = arith.mulf %27, %26 : vector<128x128xf32>
      %cst_20 = arith.constant -1.45315206 : f32
      %29 = vector.broadcast %cst_20 : f32 to vector<128x128xf32>
      %30 = arith.addf %28, %29 : vector<128x128xf32>
      %31 = arith.mulf %30, %26 : vector<128x128xf32>
      %cst_21 = arith.constant 1.42141378 : f32
      %32 = vector.broadcast %cst_21 : f32 to vector<128x128xf32>
      %33 = arith.addf %31, %32 : vector<128x128xf32>
      %34 = arith.mulf %33, %26 : vector<128x128xf32>
      %cst_22 = arith.constant -0.284496725 : f32
      %35 = vector.broadcast %cst_22 : f32 to vector<128x128xf32>
      %36 = arith.addf %34, %35 : vector<128x128xf32>
      %37 = arith.mulf %36, %26 : vector<128x128xf32>
      %cst_23 = arith.constant 0.254829586 : f32
      %38 = vector.broadcast %cst_23 : f32 to vector<128x128xf32>
      %39 = arith.addf %37, %38 : vector<128x128xf32>
      %40 = arith.mulf %39, %26 : vector<128x128xf32>
      %cst_24 = arith.constant 0.000000e+00 : f32
      %41 = vector.broadcast %cst_24 : f32 to vector<128x128xf32>
      %42 = arith.subf %41, %20 : vector<128x128xf32>
      %43 = arith.mulf %42, %20 : vector<128x128xf32>
      %44 = math.exp %43 : vector<128x128xf32>
      %45 = arith.mulf %40, %44 : vector<128x128xf32>
      %cst_25 = arith.constant 1.000000e+00 : f32
      %46 = vector.broadcast %cst_25 : f32 to vector<128x128xf32>
      %47 = arith.subf %46, %45 : vector<128x128xf32>
      %cst_26 = arith.constant 0.000000e+00 : f32
      %48 = vector.broadcast %cst_26 : f32 to vector<128x128xf32>
      %49 = arith.cmpf olt, %19, %48 : vector<128x128xf32>
      %cst_27 = arith.constant 0.000000e+00 : f32
      %50 = vector.broadcast %cst_27 : f32 to vector<128x128xf32>
      %51 = arith.subf %50, %47 : vector<128x128xf32>
      %52 = arith.select %49, %51, %47 : vector<128x128xi1>, vector<128x128xf32>
      %cst_28 = arith.constant 1.000000e+00 : f32
      %53 = vector.broadcast %cst_28 : f32 to vector<128x128xf32>
      %54 = arith.addf %53, %52 : vector<128x128xf32>
      %55 = arith.mulf %17, %54 : vector<128x128xf32>
      %c0_29 = arith.constant 0 : index
      %c0_30 = arith.constant 0 : index
      %56 = vector.load %arg6[%c0_29, %c0_30] : memref<128x128xf32, #tpu.memory_space<vmem>>, vector<128x128xf32>
      tpu.vector_store %arg6[%c0_29, %c0_30], %55 {strides = array<i32>} : memref<128x128xf32, #tpu.memory_space<vmem>>, vector<128x128xf32>,
    } else {
    }
    return
  }
  func.func @transform_0(%arg0: i32, %arg1: i32, %arg2: i32) -> (i32, i32) {
    %c0_i32 = arith.constant 0 : i32
    return %arg0, %arg2 : i32, i32
  }
  func.func @transform_1(%arg0: i32, %arg1: i32, %arg2: i32) -> (i32, i32) {
    %c0_i32 = arith.constant 0 : i32
    return %arg2, %arg1 : i32, i32
  }
  func.func @transform_2(%arg0: i32, %arg1: i32, %arg2: i32) -> (i32, i32) {
    %c0_i32 = arith.constant 0 : i32
    %c0_i32_0 = arith.constant 0 : i32
    return %c0_i32, %arg1 : i32, i32
  }
  func.func @transform_3(%arg0: i32, %arg1: i32, %arg2: i32) -> (i32, i32) {
    %c0_i32 = arith.constant 0 : i32
    return %arg0, %arg1 : i32, i32
  }
}

module attributes {stable_mosaic.version = 11 : i64} {
  func.func @kernel(%arg0: i32, %arg1: i32, %arg2: i32, %arg3: memref<128x128xbf16, #tpu.memory_space<vmem>>, %arg4: memref<128x128xbf16, #tpu.memory_space<vmem>>, %arg5: memref<1x128xf32, #tpu.memory_space<vmem>>, %arg6: memref<128x128xf32, #tpu.memory_space<vmem>>, %arg7: memref<128x128xf32, #tpu.memory_space<vmem>>, %arg8: memref<128x128xf32, #tpu.memory_space<vmem>>) attributes {dimension_semantics = [#tpu.dimension_semantics<parallel>, #tpu.dimension_semantics<parallel>, #tpu.dimension_semantics<arbitrary>], iteration_bounds = array<i64: 1, 1, 1>, scalar_prefetch = 0 : i64, scratch_operands = 1 : i64, tpu.core_type = #tpu.core_type<tc>, window_params = [{transform_indices = @transform_0, window_bounds = array<i64: 128, 128>}, {transform_indices = @transform_1, window_bounds = array<i64: 128, 128>}, {transform_indices = @transform_2, window_bounds = array<i64: 1, 128>}, {transform_indices = @transform_3, window_bounds = array<i64: 128, 128>}, {transform_indices = @transform_4, window_bounds = array<i64: 128, 128>}]} {
    %c0_i32 = arith.constant 0 : i32
    %0 = arith.cmpi eq, %arg2, %c0_i32 : i32
    %1 = arith.extui %0 : i1 to i32
    %c0_i32_0 = arith.constant 0 : i32
    %2 = arith.cmpi ne, %1, %c0_i32_0 : i32
    scf.if %2 {
      %cst_10 = arith.constant 0.000000e+00 : f32
      %12 = vector.broadcast %cst_10 : f32 to vector<128x128xf32>
      %c0_11 = arith.constant 0 : index
      %c0_12 = arith.constant 0 : index
      %13 = vector.load %arg8[%c0_11, %c0_12] : memref<128x128xf32, #tpu.memory_space<vmem>>, vector<128x128xf32>
      tpu.vector_store %arg8[%c0_11, %c0_12], %12 {strides = array<i32>} : memref<128x128xf32, #tpu.memory_space<vmem>>, vector<128x128xf32>,
    } else {
    }
    %c0 = arith.constant 0 : index
    %c0_1 = arith.constant 0 : index
    %3 = vector.load %arg8[%c0, %c0_1] : memref<128x128xf32, #tpu.memory_space<vmem>>, vector<128x128xf32>
    %c0_2 = arith.constant 0 : index
    %c0_3 = arith.constant 0 : index
    %4 = vector.load %arg3[%c0_2, %c0_3] : memref<128x128xbf16, #tpu.memory_space<vmem>>, vector<128x128xbf16>
    %c0_4 = arith.constant 0 : index
    %c0_5 = arith.constant 0 : index
    %5 = vector.load %arg4[%c0_4, %c0_5] : memref<128x128xbf16, #tpu.memory_space<vmem>>, vector<128x128xbf16>
    %cst = arith.constant dense<0.000000e+00> : vector<128x128xf32>
    %6 = tpu.matmul %4, %5, %cst {dimension_numbers = #tpu.dot_dimension_numbers<[1], [0], [0], [1], [0, 0, 1, 1], [], []>} : vector<128x128xbf16>, vector<128x128xbf16>, vector<128x128xf32> -> vector<128x128xf32>
    %7 = arith.addf %3, %6 : vector<128x128xf32>
    %c0_6 = arith.constant 0 : index
    %c0_7 = arith.constant 0 : index
    %8 = vector.load %arg8[%c0_6, %c0_7] : memref<128x128xf32, #tpu.memory_space<vmem>>, vector<128x128xf32>
    tpu.vector_store %arg8[%c0_6, %c0_7], %7 {strides = array<i32>} : memref<128x128xf32, #tpu.memory_space<vmem>>, vector<128x128xf32>,
    %c0_i32_8 = arith.constant 0 : i32
    %9 = arith.cmpi eq, %arg2, %c0_i32_8 : i32
    %10 = arith.extui %9 : i1 to i32
    %c0_i32_9 = arith.constant 0 : i32
    %11 = arith.cmpi ne, %10, %c0_i32_9 : i32
    scf.if %11 {
      %c0_10 = arith.constant 0 : index
      %c0_11 = arith.constant 0 : index
      %12 = vector.load %arg8[%c0_10, %c0_11] : memref<128x128xf32, #tpu.memory_space<vmem>>, vector<128x128xf32>
      %c0_12 = arith.constant 0 : index
      %c0_13 = arith.constant 0 : index
      %13 = vector.load %arg5[%c0_12, %c0_13] : memref<1x128xf32, #tpu.memory_space<vmem>>, vector<1x128xf32>
      %14 = vector.broadcast %13 : vector<1x128xf32> to vector<128x128xf32>
      %15 = arith.addf %12, %14 : vector<128x128xf32>
      %c0_14 = arith.constant 0 : index
      %c0_15 = arith.constant 0 : index
      %16 = vector.load %arg6[%c0_14, %c0_15] : memref<128x128xf32, #tpu.memory_space<vmem>>, vector<128x128xf32>
      %17 = arith.addf %15, %16 : vector<128x128xf32>
      %c0_16 = arith.constant 0 : index
      %c0_17 = arith.constant 0 : index
      %18 = vector.load %arg7[%c0_16, %c0_17] : memref<128x128xf32, #tpu.memory_space<vmem>>, vector<128x128xf32>
      tpu.vector_store %arg7[%c0_16, %c0_17], %17 {strides = array<i32>} : memref<128x128xf32, #tpu.memory_space<vmem>>, vector<128x128xf32>,
    } else {
    }
    return
  }
  func.func @transform_0(%arg0: i32, %arg1: i32, %arg2: i32) -> (i32, i32) {
    %c0_i32 = arith.constant 0 : i32
    return %arg0, %arg2 : i32, i32
  }
  func.func @transform_1(%arg0: i32, %arg1: i32, %arg2: i32) -> (i32, i32) {
    %c0_i32 = arith.constant 0 : i32
    return %arg2, %arg1 : i32, i32
  }
  func.func @transform_2(%arg0: i32, %arg1: i32, %arg2: i32) -> (i32, i32) {
    %c0_i32 = arith.constant 0 : i32
    %c0_i32_0 = arith.constant 0 : i32
    return %c0_i32, %arg1 : i32, i32
  }
  func.func @transform_3(%arg0: i32, %arg1: i32, %arg2: i32) -> (i32, i32) {
    %c0_i32 = arith.constant 0 : i32
    return %arg0, %arg1 : i32, i32
  }
  func.func @transform_4(%arg0: i32, %arg1: i32, %arg2: i32) -> (i32, i32) {
    %c0_i32 = arith.constant 0 : i32
    return %arg0, %arg1 : i32, i32
  }
}

module attributes {stable_mosaic.version = 11 : i64} {
  func.func @kernel(%arg0: i32, %arg1: i32, %arg2: i32, %arg3: memref<32x128xbf16, #tpu.memory_space<vmem>>, %arg4: memref<128x128xbf16, #tpu.memory_space<vmem>>, %arg5: memref<1x128xf32, #tpu.memory_space<vmem>>, %arg6: memref<32x128xf32, #tpu.memory_space<vmem>>, %arg7: memref<32x128xf32, #tpu.memory_space<vmem>>) attributes {dimension_semantics = [#tpu.dimension_semantics<parallel>, #tpu.dimension_semantics<parallel>, #tpu.dimension_semantics<arbitrary>], iteration_bounds = array<i64: 1, 1, 1>, scalar_prefetch = 0 : i64, scratch_operands = 1 : i64, tpu.core_type = #tpu.core_type<tc>, window_params = [{transform_indices = @transform_0, window_bounds = array<i64: 32, 128>}, {transform_indices = @transform_1, window_bounds = array<i64: 128, 128>}, {transform_indices = @transform_2, window_bounds = array<i64: 1, 128>}, {transform_indices = @transform_3, window_bounds = array<i64: 32, 128>}]} {
    %c0_i32 = arith.constant 0 : i32
    %0 = arith.cmpi eq, %arg2, %c0_i32 : i32
    %1 = arith.extui %0 : i1 to i32
    %c0_i32_0 = arith.constant 0 : i32
    %2 = arith.cmpi ne, %1, %c0_i32_0 : i32
    scf.if %2 {
      %cst_10 = arith.constant 0.000000e+00 : f32
      %12 = vector.broadcast %cst_10 : f32 to vector<32x128xf32>
      %c0_11 = arith.constant 0 : index
      %c0_12 = arith.constant 0 : index
      %13 = vector.load %arg7[%c0_11, %c0_12] : memref<32x128xf32, #tpu.memory_space<vmem>>, vector<32x128xf32>
      tpu.vector_store %arg7[%c0_11, %c0_12], %12 {strides = array<i32>} : memref<32x128xf32, #tpu.memory_space<vmem>>, vector<32x128xf32>,
    } else {
    }
    %c0 = arith.constant 0 : index
    %c0_1 = arith.constant 0 : index
    %3 = vector.load %arg7[%c0, %c0_1] : memref<32x128xf32, #tpu.memory_space<vmem>>, vector<32x128xf32>
    %c0_2 = arith.constant 0 : index
    %c0_3 = arith.constant 0 : index
    %4 = vector.load %arg3[%c0_2, %c0_3] : memref<32x128xbf16, #tpu.memory_space<vmem>>, vector<32x128xbf16>
    %c0_4 = arith.constant 0 : index
    %c0_5 = arith.constant 0 : index
    %5 = vector.load %arg4[%c0_4, %c0_5] : memref<128x128xbf16, #tpu.memory_space<vmem>>, vector<128x128xbf16>
    %cst = arith.constant dense<0.000000e+00> : vector<32x128xf32>
    %6 = tpu.matmul %4, %5, %cst {dimension_numbers = #tpu.dot_dimension_numbers<[1], [0], [0], [1], [0, 0, 1, 1], [], []>} : vector<32x128xbf16>, vector<128x128xbf16>, vector<32x128xf32> -> vector<32x128xf32>
    %7 = arith.addf %3, %6 : vector<32x128xf32>
    %c0_6 = arith.constant 0 : index
    %c0_7 = arith.constant 0 : index
    %8 = vector.load %arg7[%c0_6, %c0_7] : memref<32x128xf32, #tpu.memory_space<vmem>>, vector<32x128xf32>
    tpu.vector_store %arg7[%c0_6, %c0_7], %7 {strides = array<i32>} : memref<32x128xf32, #tpu.memory_space<vmem>>, vector<32x128xf32>,
    %c0_i32_8 = arith.constant 0 : i32
    %9 = arith.cmpi eq, %arg2, %c0_i32_8 : i32
    %10 = arith.extui %9 : i1 to i32
    %c0_i32_9 = arith.constant 0 : i32
    %11 = arith.cmpi ne, %10, %c0_i32_9 : i32
    scf.if %11 {
      %c0_10 = arith.constant 0 : index
      %c0_11 = arith.constant 0 : index
      %12 = vector.load %arg7[%c0_10, %c0_11] : memref<32x128xf32, #tpu.memory_space<vmem>>, vector<32x128xf32>
      %c0_12 = arith.constant 0 : index
      %c0_13 = arith.constant 0 : index
      %13 = vector.load %arg5[%c0_12, %c0_13] : memref<1x128xf32, #tpu.memory_space<vmem>>, vector<1x128xf32>
      %14 = vector.broadcast %13 : vector<1x128xf32> to vector<32x128xf32>
      %15 = arith.addf %12, %14 : vector<32x128xf32>
      %c0_14 = arith.constant 0 : index
      %c0_15 = arith.constant 0 : index
      %16 = vector.load %arg6[%c0_14, %c0_15] : memref<32x128xf32, #tpu.memory_space<vmem>>, vector<32x128xf32>
      tpu.vector_store %arg6[%c0_14, %c0_15], %15 {strides = array<i32>} : memref<32x128xf32, #tpu.memory_space<vmem>>, vector<32x128xf32>,
    } else {
    }
    return
  }
  func.func @transform_0(%arg0: i32, %arg1: i32, %arg2: i32) -> (i32, i32) {
    %c0_i32 = arith.constant 0 : i32
    return %arg0, %arg2 : i32, i32
  }
  func.func @transform_1(%arg0: i32, %arg1: i32, %arg2: i32) -> (i32, i32) {
    %c0_i32 = arith.constant 0 : i32
    return %arg2, %arg1 : i32, i32
  }
  func.func @transform_2(%arg0: i32, %arg1: i32, %arg2: i32) -> (i32, i32) {
    %c0_i32 = arith.constant 0 : i32
    %c0_i32_0 = arith.constant 0 : i32
    return %c0_i32, %arg1 : i32, i32
  }
  func.func @transform_3(%arg0: i32, %arg1: i32, %arg2: i32) -> (i32, i32) {
    %c0_i32 = arith.constant 0 : i32
    return %arg0, %arg1 : i32, i32
  }
}

module attributes {stable_mosaic.version = 11 : i64} {
  func.func @_layernorm_kernel(%arg0: i32, %arg1: memref<32x64xf32, #tpu.memory_space<vmem>>, %arg2: memref<1x64xf32, #tpu.memory_space<vmem>>, %arg3: memref<1x64xf32, #tpu.memory_space<vmem>>, %arg4: memref<32x64xf32, #tpu.memory_space<vmem>>) attributes {dimension_semantics = [#tpu.dimension_semantics<parallel>], iteration_bounds = array<i64: 1>, scalar_prefetch = 0 : i64, scratch_operands = 0 : i64, tpu.core_type = #tpu.core_type<tc>, window_params = [{transform_indices = @transform_0, window_bounds = array<i64: 32, 64>}, {pipeline_mode = #tpu.pipeline_mode<synchronous>, transform_indices = @transform_1, window_bounds = array<i64: 1, 64>}, {pipeline_mode = #tpu.pipeline_mode<synchronous>, transform_indices = @transform_2, window_bounds = array<i64: 1, 64>}, {transform_indices = @transform_3, window_bounds = array<i64: 32, 64>}]} {
    %c0 = arith.constant 0 : index
    %c0_0 = arith.constant 0 : index
    %0 = vector.load %arg1[%c0, %c0_0] : memref<32x64xf32, #tpu.memory_space<vmem>>, vector<32x64xf32>
    %cst = arith.constant dense<0.000000e+00> : vector<32xf32>
    %1 = vector.multi_reduction <add>, %0, %cst [1] : vector<32x64xf32> to vector<32xf32>
    %2 = vector.shape_cast %1 : vector<32xf32> to vector<32x1xf32>
    %cst_1 = arith.constant 6.400000e+01 : f32
    %3 = vector.broadcast %cst_1 : f32 to vector<32x1xf32>
    %4 = arith.divf %2, %3 : vector<32x1xf32>
    %5 = vector.broadcast %4 : vector<32x1xf32> to vector<32x64xf32>
    %6 = arith.subf %0, %5 : vector<32x64xf32>
    %7 = arith.mulf %6, %6 : vector<32x64xf32>
    %cst_2 = arith.constant dense<0.000000e+00> : vector<32xf32>
    %8 = vector.multi_reduction <add>, %7, %cst_2 [1] : vector<32x64xf32> to vector<32xf32>
    %9 = vector.shape_cast %8 : vector<32xf32> to vector<32x1xf32>
    %cst_3 = arith.constant 6.400000e+01 : f32
    %10 = vector.broadcast %cst_3 : f32 to vector<32x1xf32>
    %11 = arith.divf %9, %10 : vector<32x1xf32>
    %cst_4 = arith.constant 9.99999974E-6 : f32
    %12 = vector.broadcast %cst_4 : f32 to vector<32x1xf32>
    %13 = arith.addf %11, %12 : vector<32x1xf32>
    %14 = math.rsqrt %13 : vector<32x1xf32>
    %15 = vector.broadcast %14 : vector<32x1xf32> to vector<32x64xf32>
    %16 = arith.mulf %6, %15 : vector<32x64xf32>
    %c0_5 = arith.constant 0 : index
    %c0_6 = arith.constant 0 : index
    %17 = vector.load %arg2[%c0_5, %c0_6] : memref<1x64xf32, #tpu.memory_space<vmem>>, vector<1x64xf32>
    %18 = vector.broadcast %17 : vector<1x64xf32> to vector<32x64xf32>
    %19 = arith.mulf %16, %18 : vector<32x64xf32>
    %c0_7 = arith.constant 0 : index
    %c0_8 = arith.constant 0 : index
    %20 = vector.load %arg3[%c0_7, %c0_8] : memref<1x64xf32, #tpu.memory_space<vmem>>, vector<1x64xf32>
    %21 = vector.broadcast %20 : vector<1x64xf32> to vector<32x64xf32>
    %22 = arith.addf %19, %21 : vector<32x64xf32>
    %c0_9 = arith.constant 0 : index
    %c0_10 = arith.constant 0 : index
    %23 = vector.load %arg4[%c0_9, %c0_10] : memref<32x64xf32, #tpu.memory_space<vmem>>, vector<32x64xf32>
    tpu.vector_store %arg4[%c0_9, %c0_10], %22 {strides = array<i32>} : memref<32x64xf32, #tpu.memory_space<vmem>>, vector<32x64xf32>,
    return
  }
  func.func @transform_0(%arg0: i32) -> (i32, i32) {
    %c0_i32 = arith.constant 0 : i32
    %c0_i32_0 = arith.constant 0 : i32
    return %arg0, %c0_i32 : i32, i32
  }
  func.func @transform_1(%arg0: i32) -> (i32, i32) {
    %c0_i32 = arith.constant 0 : i32
    %c0_i32_0 = arith.constant 0 : i32
    %c0_i32_1 = arith.constant 0 : i32
    return %c0_i32, %c0_i32_0 : i32, i32
  }
  func.func @transform_2(%arg0: i32) -> (i32, i32) {
    %c0_i32 = arith.constant 0 : i32
    %c0_i32_0 = arith.constant 0 : i32
    %c0_i32_1 = arith.constant 0 : i32
    return %c0_i32, %c0_i32_0 : i32, i32
  }
  func.func @transform_3(%arg0: i32) -> (i32, i32) {
    %c0_i32 = arith.constant 0 : i32
    %c0_i32_0 = arith.constant 0 : i32
    return %arg0, %c0_i32 : i32, i32
  }
}

module attributes {stable_mosaic.version = 11 : i64} {
  func.func @_layernorm_kernel(%arg0: i32, %arg1: memref<32x128xf32, #tpu.memory_space<vmem>>, %arg2: memref<1x128xf32, #tpu.memory_space<vmem>>, %arg3: memref<1x128xf32, #tpu.memory_space<vmem>>, %arg4: memref<32x128xf32, #tpu.memory_space<vmem>>) attributes {dimension_semantics = [#tpu.dimension_semantics<parallel>], iteration_bounds = array<i64: 1>, scalar_prefetch = 0 : i64, scratch_operands = 0 : i64, tpu.core_type = #tpu.core_type<tc>, window_params = [{transform_indices = @transform_0, window_bounds = array<i64: 32, 128>}, {pipeline_mode = #tpu.pipeline_mode<synchronous>, transform_indices = @transform_1, window_bounds = array<i64: 1, 128>}, {pipeline_mode = #tpu.pipeline_mode<synchronous>, transform_indices = @transform_2, window_bounds = array<i64: 1, 128>}, {transform_indices = @transform_3, window_bounds = array<i64: 32, 128>}]} {
    %c0 = arith.constant 0 : index
    %c0_0 = arith.constant 0 : index
    %0 = vector.load %arg1[%c0, %c0_0] : memref<32x128xf32, #tpu.memory_space<vmem>>, vector<32x128xf32>
    %cst = arith.constant dense<0.000000e+00> : vector<32xf32>
    %1 = vector.multi_reduction <add>, %0, %cst [1] : vector<32x128xf32> to vector<32xf32>
    %2 = vector.shape_cast %1 : vector<32xf32> to vector<32x1xf32>
    %cst_1 = arith.constant 1.280000e+02 : f32
    %3 = vector.broadcast %cst_1 : f32 to vector<32x1xf32>
    %4 = arith.divf %2, %3 : vector<32x1xf32>
    %5 = vector.broadcast %4 : vector<32x1xf32> to vector<32x128xf32>
    %6 = arith.subf %0, %5 : vector<32x128xf32>
    %7 = arith.mulf %6, %6 : vector<32x128xf32>
    %cst_2 = arith.constant dense<0.000000e+00> : vector<32xf32>
    %8 = vector.multi_reduction <add>, %7, %cst_2 [1] : vector<32x128xf32> to vector<32xf32>
    %9 = vector.shape_cast %8 : vector<32xf32> to vector<32x1xf32>
    %cst_3 = arith.constant 1.280000e+02 : f32
    %10 = vector.broadcast %cst_3 : f32 to vector<32x1xf32>
    %11 = arith.divf %9, %10 : vector<32x1xf32>
    %cst_4 = arith.constant 9.99999974E-6 : f32
    %12 = vector.broadcast %cst_4 : f32 to vector<32x1xf32>
    %13 = arith.addf %11, %12 : vector<32x1xf32>
    %14 = math.rsqrt %13 : vector<32x1xf32>
    %15 = vector.broadcast %14 : vector<32x1xf32> to vector<32x128xf32>
    %16 = arith.mulf %6, %15 : vector<32x128xf32>
    %c0_5 = arith.constant 0 : index
    %c0_6 = arith.constant 0 : index
    %17 = vector.load %arg2[%c0_5, %c0_6] : memref<1x128xf32, #tpu.memory_space<vmem>>, vector<1x128xf32>
    %18 = vector.broadcast %17 : vector<1x128xf32> to vector<32x128xf32>
    %19 = arith.mulf %16, %18 : vector<32x128xf32>
    %c0_7 = arith.constant 0 : index
    %c0_8 = arith.constant 0 : index
    %20 = vector.load %arg3[%c0_7, %c0_8] : memref<1x128xf32, #tpu.memory_space<vmem>>, vector<1x128xf32>
    %21 = vector.broadcast %20 : vector<1x128xf32> to vector<32x128xf32>
    %22 = arith.addf %19, %21 : vector<32x128xf32>
    %c0_9 = arith.constant 0 : index
    %c0_10 = arith.constant 0 : index
    %23 = vector.load %arg4[%c0_9, %c0_10] : memref<32x128xf32, #tpu.memory_space<vmem>>, vector<32x128xf32>
    tpu.vector_store %arg4[%c0_9, %c0_10], %22 {strides = array<i32>} : memref<32x128xf32, #tpu.memory_space<vmem>>, vector<32x128xf32>,
    return
  }
  func.func @transform_0(%arg0: i32) -> (i32, i32) {
    %c0_i32 = arith.constant 0 : i32
    %c0_i32_0 = arith.constant 0 : i32
    return %arg0, %c0_i32 : i32, i32
  }
  func.func @transform_1(%arg0: i32) -> (i32, i32) {
    %c0_i32 = arith.constant 0 : i32
    %c0_i32_0 = arith.constant 0 : i32
    %c0_i32_1 = arith.constant 0 : i32
    return %c0_i32, %c0_i32_0 : i32, i32
  }
  func.func @transform_2(%arg0: i32) -> (i32, i32) {
    %c0_i32 = arith.constant 0 : i32
    %c0_i32_0 = arith.constant 0 : i32
    %c0_i32_1 = arith.constant 0 : i32
    return %c0_i32, %c0_i32_0 : i32, i32
  }
  func.func @transform_3(%arg0: i32) -> (i32, i32) {
    %c0_i32 = arith.constant 0 : i32
    %c0_i32_0 = arith.constant 0 : i32
    return %arg0, %c0_i32 : i32, i32
  }
}

module attributes {stable_mosaic.version = 11 : i64} {
  func.func @kernel(%arg0: i32, %arg1: i32, %arg2: i32, %arg3: memref<32x128xbf16, #tpu.memory_space<vmem>>, %arg4: memref<128x256xbf16, #tpu.memory_space<vmem>>, %arg5: memref<1x256xf32, #tpu.memory_space<vmem>>, %arg6: memref<32x256xf32, #tpu.memory_space<vmem>>, %arg7: memref<32x256xf32, #tpu.memory_space<vmem>>) attributes {dimension_semantics = [#tpu.dimension_semantics<parallel>, #tpu.dimension_semantics<parallel>, #tpu.dimension_semantics<arbitrary>], iteration_bounds = array<i64: 1, 1, 1>, scalar_prefetch = 0 : i64, scratch_operands = 1 : i64, tpu.core_type = #tpu.core_type<tc>, window_params = [{transform_indices = @transform_0, window_bounds = array<i64: 32, 128>}, {transform_indices = @transform_1, window_bounds = array<i64: 128, 256>}, {transform_indices = @transform_2, window_bounds = array<i64: 1, 256>}, {transform_indices = @transform_3, window_bounds = array<i64: 32, 256>}]} {
    %c0_i32 = arith.constant 0 : i32
    %0 = arith.cmpi eq, %arg2, %c0_i32 : i32
    %1 = arith.extui %0 : i1 to i32
    %c0_i32_0 = arith.constant 0 : i32
    %2 = arith.cmpi ne, %1, %c0_i32_0 : i32
    scf.if %2 {
      %cst_10 = arith.constant 0.000000e+00 : f32
      %12 = vector.broadcast %cst_10 : f32 to vector<32x256xf32>
      %c0_11 = arith.constant 0 : index
      %c0_12 = arith.constant 0 : index
      %13 = vector.load %arg7[%c0_11, %c0_12] : memref<32x256xf32, #tpu.memory_space<vmem>>, vector<32x256xf32>
      tpu.vector_store %arg7[%c0_11, %c0_12], %12 {strides = array<i32>} : memref<32x256xf32, #tpu.memory_space<vmem>>, vector<32x256xf32>,
    } else {
    }
    %c0 = arith.constant 0 : index
    %c0_1 = arith.constant 0 : index
    %3 = vector.load %arg7[%c0, %c0_1] : memref<32x256xf32, #tpu.memory_space<vmem>>, vector<32x256xf32>
    %c0_2 = arith.constant 0 : index
    %c0_3 = arith.constant 0 : index
    %4 = vector.load %arg3[%c0_2, %c0_3] : memref<32x128xbf16, #tpu.memory_space<vmem>>, vector<32x128xbf16>
    %c0_4 = arith.constant 0 : index
    %c0_5 = arith.constant 0 : index
    %5 = vector.load %arg4[%c0_4, %c0_5] : memref<128x256xbf16, #tpu.memory_space<vmem>>, vector<128x256xbf16>
    %cst = arith.constant dense<0.000000e+00> : vector<32x256xf32>
    %6 = tpu.matmul %4, %5, %cst {dimension_numbers = #tpu.dot_dimension_numbers<[1], [0], [0], [1], [0, 0, 1, 1], [], []>} : vector<32x128xbf16>, vector<128x256xbf16>, vector<32x256xf32> -> vector<32x256xf32>
    %7 = arith.addf %3, %6 : vector<32x256xf32>
    %c0_6 = arith.constant 0 : index
    %c0_7 = arith.constant 0 : index
    %8 = vector.load %arg7[%c0_6, %c0_7] : memref<32x256xf32, #tpu.memory_space<vmem>>, vector<32x256xf32>
    tpu.vector_store %arg7[%c0_6, %c0_7], %7 {strides = array<i32>} : memref<32x256xf32, #tpu.memory_space<vmem>>, vector<32x256xf32>,
    %c0_i32_8 = arith.constant 0 : i32
    %9 = arith.cmpi eq, %arg2, %c0_i32_8 : i32
    %10 = arith.extui %9 : i1 to i32
    %c0_i32_9 = arith.constant 0 : i32
    %11 = arith.cmpi ne, %10, %c0_i32_9 : i32
    scf.if %11 {
      %c0_10 = arith.constant 0 : index
      %c0_11 = arith.constant 0 : index
      %12 = vector.load %arg7[%c0_10, %c0_11] : memref<32x256xf32, #tpu.memory_space<vmem>>, vector<32x256xf32>
      %c0_12 = arith.constant 0 : index
      %c0_13 = arith.constant 0 : index
      %13 = vector.load %arg5[%c0_12, %c0_13] : memref<1x256xf32, #tpu.memory_space<vmem>>, vector<1x256xf32>
      %14 = vector.broadcast %13 : vector<1x256xf32> to vector<32x256xf32>
      %15 = arith.addf %12, %14 : vector<32x256xf32>
      %c0_14 = arith.constant 0 : index
      %c0_15 = arith.constant 0 : index
      %16 = vector.load %arg6[%c0_14, %c0_15] : memref<32x256xf32, #tpu.memory_space<vmem>>, vector<32x256xf32>
      tpu.vector_store %arg6[%c0_14, %c0_15], %15 {strides = array<i32>} : memref<32x256xf32, #tpu.memory_space<vmem>>, vector<32x256xf32>,
    } else {
    }
    return
  }
  func.func @transform_0(%arg0: i32, %arg1: i32, %arg2: i32) -> (i32, i32) {
    %c0_i32 = arith.constant 0 : i32
    return %arg0, %arg2 : i32, i32
  }
  func.func @transform_1(%arg0: i32, %arg1: i32, %arg2: i32) -> (i32, i32) {
    %c0_i32 = arith.constant 0 : i32
    return %arg2, %arg1 : i32, i32
  }
  func.func @transform_2(%arg0: i32, %arg1: i32, %arg2: i32) -> (i32, i32) {
    %c0_i32 = arith.constant 0 : i32
    %c0_i32_0 = arith.constant 0 : i32
    return %c0_i32, %arg1 : i32, i32
  }
  func.func @transform_3(%arg0: i32, %arg1: i32, %arg2: i32) -> (i32, i32) {
    %c0_i32 = arith.constant 0 : i32
    return %arg0, %arg1 : i32, i32
  }
}

module attributes {stable_mosaic.version = 11 : i64} {
  func.func @kernel(%arg0: i32, %arg1: memref<1x16x64xbf16, #tpu.memory_space<vmem>>, %arg2: memref<1x16x64xbf16, #tpu.memory_space<vmem>>, %arg3: memref<1x16x64xbf16, #tpu.memory_space<vmem>>, %arg4: memref<1x4x16x16xf32, #tpu.memory_space<vmem>>, %arg5: memref<1x16x64xbf16, #tpu.memory_space<vmem>>) attributes {dimension_semantics = [#tpu.dimension_semantics<parallel>], iteration_bounds = array<i64: 2>, scalar_prefetch = 0 : i64, scratch_operands = 0 : i64, tpu.core_type = #tpu.core_type<tc>, window_params = [{transform_indices = @transform_0, window_bounds = array<i64: 1, 16, 64>}, {transform_indices = @transform_1, window_bounds = array<i64: 1, 16, 64>}, {transform_indices = @transform_2, window_bounds = array<i64: 1, 16, 64>}, {pipeline_mode = #tpu.pipeline_mode<synchronous>, transform_indices = @transform_3, window_bounds = array<i64: 1, 4, 16, 16>}, {transform_indices = @transform_4, window_bounds = array<i64: 1, 16, 64>}]} {
    %c0 = arith.constant 0 : index
    %c0_0 = arith.constant 0 : index
    %c0_1 = arith.constant 0 : index
    %0 = vector.load %arg1[%c0, %c0_0, %c0_1] : memref<1x16x64xbf16, #tpu.memory_space<vmem>>, vector<1x16x64xbf16>
    %c0_2 = arith.constant 0 : index
    %c0_3 = arith.constant 0 : index
    %c0_4 = arith.constant 0 : index
    %1 = vector.load %arg2[%c0_2, %c0_3, %c0_4] : memref<1x16x64xbf16, #tpu.memory_space<vmem>>, vector<1x16x64xbf16>
    %c0_5 = arith.constant 0 : index
    %c0_6 = arith.constant 0 : index
    %c0_7 = arith.constant 0 : index
    %2 = vector.load %arg3[%c0_5, %c0_6, %c0_7] : memref<1x16x64xbf16, #tpu.memory_space<vmem>>, vector<1x16x64xbf16>
    %c0_8 = arith.constant 0 : index
    %c0_9 = arith.constant 0 : index
    %c0_10 = arith.constant 0 : index
    %c0_11 = arith.constant 0 : index
    %3 = vector.load %arg4[%c0_8, %c0_9, %c0_10, %c0_11] : memref<1x4x16x16xf32, #tpu.memory_space<vmem>>, vector<1x4x16x16xf32>
    %4 = vector.extract_strided_slice %0 {offsets = [0, 0, 0], sizes = [1, 16, 16], strides = [1, 1, 1]} : vector<1x16x64xbf16> to vector<1x16x16xbf16>
    %5 = vector.extract_strided_slice %1 {offsets = [0, 0, 0], sizes = [1, 16, 16], strides = [1, 1, 1]} : vector<1x16x64xbf16> to vector<1x16x16xbf16>
    %6 = vector.extract_strided_slice %2 {offsets = [0, 0, 0], sizes = [1, 16, 16], strides = [1, 1, 1]} : vector<1x16x64xbf16> to vector<1x16x16xbf16>
    "tpu.trace_start"() <{level = 10 : i32, message = "wqd,wkd->wqk"}> : () -> ()
    %cst = arith.constant dense<0.000000e+00> : vector<1x16x16xf32>
    %7 = tpu.matmul %4, %5, %cst {dimension_numbers = #tpu.dot_dimension_numbers<[2], [2], [1], [1], [0, 0, 0, 1, 1, 1], [0], [0]>} : vector<1x16x16xbf16>, vector<1x16x16xbf16>, vector<1x16x16xf32> -> vector<1x16x16xf32>
    "tpu.trace_stop"() : () -> ()
    %cst_12 = arith.constant 2.500000e-01 : f32
    %8 = vector.broadcast %cst_12 : f32 to vector<1x16x16xf32>
    %9 = arith.mulf %7, %8 : vector<1x16x16xf32>
    %10 = vector.extract_strided_slice %3 {offsets = [0, 0, 0, 0], sizes = [1, 1, 16, 16], strides = [1, 1, 1, 1]} : vector<1x4x16x16xf32> to vector<1x1x16x16xf32>
    %11 = vector.shape_cast %10 : vector<1x1x16x16xf32> to vector<1x16x16xf32>
    %12 = arith.addf %9, %11 : vector<1x16x16xf32>
    %cst_13 = arith.constant dense<0xFF800000> : vector<1x16xf32>
    %13 = vector.multi_reduction <maximumf>, %12, %cst_13 [2] : vector<1x16x16xf32> to vector<1x16xf32>
    %14 = vector.shape_cast %13 : vector<1x16xf32> to vector<1x16x1xf32>
    %15 = vector.broadcast %14 : vector<1x16x1xf32> to vector<1x16x16xf32>
    %16 = arith.subf %12, %15 : vector<1x16x16xf32>
    %17 = math.exp %16 : vector<1x16x16xf32>
    %cst_14 = arith.constant dense<0.000000e+00> : vector<1x16xf32>
    %18 = vector.multi_reduction <add>, %17, %cst_14 [2] : vector<1x16x16xf32> to vector<1x16xf32>
    %19 = vector.shape_cast %18 : vector<1x16xf32> to vector<1x16x1xf32>
    %20 = tpu.reciprocal %19 {approx = true} : vector<1x16x1xf32> -> vector<1x16x1xf32>
    %21 = vector.broadcast %20 : vector<1x16x1xf32> to vector<1x16x16xf32>
    %22 = arith.mulf %17, %21 : vector<1x16x16xf32>
    %23 = arith.truncf %22 : vector<1x16x16xf32> to vector<1x16x16xbf16>
    "tpu.trace_start"() <{level = 10 : i32, message = "wqk,wkd->wqd"}> : () -> ()
    %cst_15 = arith.constant dense<0.000000e+00> : vector<1x16x16xf32>
    %24 = tpu.matmul %23, %6, %cst_15 {dimension_numbers = #tpu.dot_dimension_numbers<[2], [1], [1], [2], [0, 0, 0, 1, 1, 2], [0], [0]>} : vector<1x16x16xbf16>, vector<1x16x16xbf16>, vector<1x16x16xf32> -> vector<1x16x16xf32>
    "tpu.trace_stop"() : () -> ()
    %25 = vector.extract_strided_slice %0 {offsets = [0, 0, 16], sizes = [1, 16, 16], strides = [1, 1, 1]} : vector<1x16x64xbf16> to vector<1x16x16xbf16>
    %26 = vector.extract_strided_slice %1 {offsets = [0, 0, 16], sizes = [1, 16, 16], strides = [1, 1, 1]} : vector<1x16x64xbf16> to vector<1x16x16xbf16>
    %27 = vector.extract_strided_slice %2 {offsets = [0, 0, 16], sizes = [1, 16, 16], strides = [1, 1, 1]} : vector<1x16x64xbf16> to vector<1x16x16xbf16>
    "tpu.trace_start"() <{level = 10 : i32, message = "wqd,wkd->wqk"}> : () -> ()
    %cst_16 = arith.constant dense<0.000000e+00> : vector<1x16x16xf32>
    %28 = tpu.matmul %25, %26, %cst_16 {dimension_numbers = #tpu.dot_dimension_numbers<[2], [2], [1], [1], [0, 0, 0, 1, 1, 1], [0], [0]>} : vector<1x16x16xbf16>, vector<1x16x16xbf16>, vector<1x16x16xf32> -> vector<1x16x16xf32>
    "tpu.trace_stop"() : () -> ()
    %cst_17 = arith.constant 2.500000e-01 : f32
    %29 = vector.broadcast %cst_17 : f32 to vector<1x16x16xf32>
    %30 = arith.mulf %28, %29 : vector<1x16x16xf32>
    %31 = vector.extract_strided_slice %3 {offsets = [0, 1, 0, 0], sizes = [1, 1, 16, 16], strides = [1, 1, 1, 1]} : vector<1x4x16x16xf32> to vector<1x1x16x16xf32>
    %32 = vector.shape_cast %31 : vector<1x1x16x16xf32> to vector<1x16x16xf32>
    %33 = arith.addf %30, %32 : vector<1x16x16xf32>
    %cst_18 = arith.constant dense<0xFF800000> : vector<1x16xf32>
    %34 = vector.multi_reduction <maximumf>, %33, %cst_18 [2] : vector<1x16x16xf32> to vector<1x16xf32>
    %35 = vector.shape_cast %34 : vector<1x16xf32> to vector<1x16x1xf32>
    %36 = vector.broadcast %35 : vector<1x16x1xf32> to vector<1x16x16xf32>
    %37 = arith.subf %33, %36 : vector<1x16x16xf32>
    %38 = math.exp %37 : vector<1x16x16xf32>
    %cst_19 = arith.constant dense<0.000000e+00> : vector<1x16xf32>
    %39 = vector.multi_reduction <add>, %38, %cst_19 [2] : vector<1x16x16xf32> to vector<1x16xf32>
    %40 = vector.shape_cast %39 : vector<1x16xf32> to vector<1x16x1xf32>
    %41 = tpu.reciprocal %40 {approx = true} : vector<1x16x1xf32> -> vector<1x16x1xf32>
    %42 = vector.broadcast %41 : vector<1x16x1xf32> to vector<1x16x16xf32>
    %43 = arith.mulf %38, %42 : vector<1x16x16xf32>
    %44 = arith.truncf %43 : vector<1x16x16xf32> to vector<1x16x16xbf16>
    "tpu.trace_start"() <{level = 10 : i32, message = "wqk,wkd->wqd"}> : () -> ()
    %cst_20 = arith.constant dense<0.000000e+00> : vector<1x16x16xf32>
    %45 = tpu.matmul %44, %27, %cst_20 {dimension_numbers = #tpu.dot_dimension_numbers<[2], [1], [1], [2], [0, 0, 0, 1, 1, 2], [0], [0]>} : vector<1x16x16xbf16>, vector<1x16x16xbf16>, vector<1x16x16xf32> -> vector<1x16x16xf32>
    "tpu.trace_stop"() : () -> ()
    %46 = vector.extract_strided_slice %0 {offsets = [0, 0, 32], sizes = [1, 16, 16], strides = [1, 1, 1]} : vector<1x16x64xbf16> to vector<1x16x16xbf16>
    %47 = vector.extract_strided_slice %1 {offsets = [0, 0, 32], sizes = [1, 16, 16], strides = [1, 1, 1]} : vector<1x16x64xbf16> to vector<1x16x16xbf16>
    %48 = vector.extract_strided_slice %2 {offsets = [0, 0, 32], sizes = [1, 16, 16], strides = [1, 1, 1]} : vector<1x16x64xbf16> to vector<1x16x16xbf16>
    "tpu.trace_start"() <{level = 10 : i32, message = "wqd,wkd->wqk"}> : () -> ()
    %cst_21 = arith.constant dense<0.000000e+00> : vector<1x16x16xf32>
    %49 = tpu.matmul %46, %47, %cst_21 {dimension_numbers = #tpu.dot_dimension_numbers<[2], [2], [1], [1], [0, 0, 0, 1, 1, 1], [0], [0]>} : vector<1x16x16xbf16>, vector<1x16x16xbf16>, vector<1x16x16xf32> -> vector<1x16x16xf32>
    "tpu.trace_stop"() : () -> ()
    %cst_22 = arith.constant 2.500000e-01 : f32
    %50 = vector.broadcast %cst_22 : f32 to vector<1x16x16xf32>
    %51 = arith.mulf %49, %50 : vector<1x16x16xf32>
    %52 = vector.extract_strided_slice %3 {offsets = [0, 2, 0, 0], sizes = [1, 1, 16, 16], strides = [1, 1, 1, 1]} : vector<1x4x16x16xf32> to vector<1x1x16x16xf32>
    %53 = vector.shape_cast %52 : vector<1x1x16x16xf32> to vector<1x16x16xf32>
    %54 = arith.addf %51, %53 : vector<1x16x16xf32>
    %cst_23 = arith.constant dense<0xFF800000> : vector<1x16xf32>
    %55 = vector.multi_reduction <maximumf>, %54, %cst_23 [2] : vector<1x16x16xf32> to vector<1x16xf32>
    %56 = vector.shape_cast %55 : vector<1x16xf32> to vector<1x16x1xf32>
    %57 = vector.broadcast %56 : vector<1x16x1xf32> to vector<1x16x16xf32>
    %58 = arith.subf %54, %57 : vector<1x16x16xf32>
    %59 = math.exp %58 : vector<1x16x16xf32>
    %cst_24 = arith.constant dense<0.000000e+00> : vector<1x16xf32>
    %60 = vector.multi_reduction <add>, %59, %cst_24 [2] : vector<1x16x16xf32> to vector<1x16xf32>
    %61 = vector.shape_cast %60 : vector<1x16xf32> to vector<1x16x1xf32>
    %62 = tpu.reciprocal %61 {approx = true} : vector<1x16x1xf32> -> vector<1x16x1xf32>
    %63 = vector.broadcast %62 : vector<1x16x1xf32> to vector<1x16x16xf32>
    %64 = arith.mulf %59, %63 : vector<1x16x16xf32>
    %65 = arith.truncf %64 : vector<1x16x16xf32> to vector<1x16x16xbf16>
    "tpu.trace_start"() <{level = 10 : i32, message = "wqk,wkd->wqd"}> : () -> ()
    %cst_25 = arith.constant dense<0.000000e+00> : vector<1x16x16xf32>
    %66 = tpu.matmul %65, %48, %cst_25 {dimension_numbers = #tpu.dot_dimension_numbers<[2], [1], [1], [2], [0, 0, 0, 1, 1, 2], [0], [0]>} : vector<1x16x16xbf16>, vector<1x16x16xbf16>, vector<1x16x16xf32> -> vector<1x16x16xf32>
    "tpu.trace_stop"() : () -> ()
    %67 = vector.extract_strided_slice %0 {offsets = [0, 0, 48], sizes = [1, 16, 16], strides = [1, 1, 1]} : vector<1x16x64xbf16> to vector<1x16x16xbf16>
    %68 = vector.extract_strided_slice %1 {offsets = [0, 0, 48], sizes = [1, 16, 16], strides = [1, 1, 1]} : vector<1x16x64xbf16> to vector<1x16x16xbf16>
    %69 = vector.extract_strided_slice %2 {offsets = [0, 0, 48], sizes = [1, 16, 16], strides = [1, 1, 1]} : vector<1x16x64xbf16> to vector<1x16x16xbf16>
    "tpu.trace_start"() <{level = 10 : i32, message = "wqd,wkd->wqk"}> : () -> ()
    %cst_26 = arith.constant dense<0.000000e+00> : vector<1x16x16xf32>
    %70 = tpu.matmul %67, %68, %cst_26 {dimension_numbers = #tpu.dot_dimension_numbers<[2], [2], [1], [1], [0, 0, 0, 1, 1, 1], [0], [0]>} : vector<1x16x16xbf16>, vector<1x16x16xbf16>, vector<1x16x16xf32> -> vector<1x16x16xf32>
    "tpu.trace_stop"() : () -> ()
    %cst_27 = arith.constant 2.500000e-01 : f32
    %71 = vector.broadcast %cst_27 : f32 to vector<1x16x16xf32>
    %72 = arith.mulf %70, %71 : vector<1x16x16xf32>
    %73 = vector.extract_strided_slice %3 {offsets = [0, 3, 0, 0], sizes = [1, 1, 16, 16], strides = [1, 1, 1, 1]} : vector<1x4x16x16xf32> to vector<1x1x16x16xf32>
    %74 = vector.shape_cast %73 : vector<1x1x16x16xf32> to vector<1x16x16xf32>
    %75 = arith.addf %72, %74 : vector<1x16x16xf32>
    %cst_28 = arith.constant dense<0xFF800000> : vector<1x16xf32>
    %76 = vector.multi_reduction <maximumf>, %75, %cst_28 [2] : vector<1x16x16xf32> to vector<1x16xf32>
    %77 = vector.shape_cast %76 : vector<1x16xf32> to vector<1x16x1xf32>
    %78 = vector.broadcast %77 : vector<1x16x1xf32> to vector<1x16x16xf32>
    %79 = arith.subf %75, %78 : vector<1x16x16xf32>
    %80 = math.exp %79 : vector<1x16x16xf32>
    %cst_29 = arith.constant dense<0.000000e+00> : vector<1x16xf32>
    %81 = vector.multi_reduction <add>, %80, %cst_29 [2] : vector<1x16x16xf32> to vector<1x16xf32>
    %82 = vector.shape_cast %81 : vector<1x16xf32> to vector<1x16x1xf32>
    %83 = tpu.reciprocal %82 {approx = true} : vector<1x16x1xf32> -> vector<1x16x1xf32>
    %84 = vector.broadcast %83 : vector<1x16x1xf32> to vector<1x16x16xf32>
    %85 = arith.mulf %80, %84 : vector<1x16x16xf32>
    %86 = arith.truncf %85 : vector<1x16x16xf32> to vector<1x16x16xbf16>
    "tpu.trace_start"() <{level = 10 : i32, message = "wqk,wkd->wqd"}> : () -> ()
    %cst_30 = arith.constant dense<0.000000e+00> : vector<1x16x16xf32>
    %87 = tpu.matmul %86, %69, %cst_30 {dimension_numbers = #tpu.dot_dimension_numbers<[2], [1], [1], [2], [0, 0, 0, 1, 1, 2], [0], [0]>} : vector<1x16x16xbf16>, vector<1x16x16xbf16>, vector<1x16x16xf32> -> vector<1x16x16xf32>
    "tpu.trace_stop"() : () -> ()
    %88 = tpu.concatenate %24, %45, %66, %87 in 2 : vector<1x16x16xf32>, vector<1x16x16xf32>, vector<1x16x16xf32>, vector<1x16x16xf32> -> vector<1x16x64xf32>
    %89 = arith.truncf %88 : vector<1x16x64xf32> to vector<1x16x64xbf16>
    %c0_31 = arith.constant 0 : index
    %c0_32 = arith.constant 0 : index
    %c0_33 = arith.constant 0 : index
    %90 = vector.load %arg5[%c0_31, %c0_32, %c0_33] : memref<1x16x64xbf16, #tpu.memory_space<vmem>>, vector<1x16x64xbf16>
    tpu.vector_store %arg5[%c0_31, %c0_32, %c0_33], %89 {strides = array<i32>} : memref<1x16x64xbf16, #tpu.memory_space<vmem>>, vector<1x16x64xbf16>,
    return
  }
  func.func @transform_0(%arg0: i32) -> (i32, i32, i32) {
    %c0_i32 = arith.constant 0 : i32
    %c0_i32_0 = arith.constant 0 : i32
    %c0_i32_1 = arith.constant 0 : i32
    return %arg0, %c0_i32, %c0_i32_0 : i32, i32, i32
  }
  func.func @transform_1(%arg0: i32) -> (i32, i32, i32) {
    %c0_i32 = arith.constant 0 : i32
    %c0_i32_0 = arith.constant 0 : i32
    %c0_i32_1 = arith.constant 0 : i32
    return %arg0, %c0_i32, %c0_i32_0 : i32, i32, i32
  }
  func.func @transform_2(%arg0: i32) -> (i32, i32, i32) {
    %c0_i32 = arith.constant 0 : i32
    %c0_i32_0 = arith.constant 0 : i32
    %c0_i32_1 = arith.constant 0 : i32
    return %arg0, %c0_i32, %c0_i32_0 : i32, i32, i32
  }
  func.func @transform_3(%arg0: i32) -> (i32, i32, i32, i32) {
    %c0_i32 = arith.constant 0 : i32
    %c0_i32_0 = arith.constant 0 : i32
    %c0_i32_1 = arith.constant 0 : i32
    %c0_i32_2 = arith.constant 0 : i32
    %c0_i32_3 = arith.constant 0 : i32
    return %c0_i32, %c0_i32_0, %c0_i32_1, %c0_i32_2 : i32, i32, i32, i32
  }
  func.func @transform_4(%arg0: i32) -> (i32, i32, i32) {
    %c0_i32 = arith.constant 0 : i32
    %c0_i32_0 = arith.constant 0 : i32
    %c0_i32_1 = arith.constant 0 : i32
    return %arg0, %c0_i32, %c0_i32_0 : i32, i32, i32
  }
}

module attributes {stable_mosaic.version = 11 : i64} {
  func.func @kernel(%arg0: i32, %arg1: i32, %arg2: i32, %arg3: memref<32x128xbf16, #tpu.memory_space<vmem>>, %arg4: memref<128x256xbf16, #tpu.memory_space<vmem>>, %arg5: memref<1x256xf32, #tpu.memory_space<vmem>>, %arg6: memref<32x256xf32, #tpu.memory_space<vmem>>, %arg7: memref<32x256xf32, #tpu.memory_space<vmem>>) attributes {dimension_semantics = [#tpu.dimension_semantics<parallel>, #tpu.dimension_semantics<parallel>, #tpu.dimension_semantics<arbitrary>], iteration_bounds = array<i64: 1, 1, 1>, scalar_prefetch = 0 : i64, scratch_operands = 1 : i64, tpu.core_type = #tpu.core_type<tc>, window_params = [{transform_indices = @transform_0, window_bounds = array<i64: 32, 128>}, {transform_indices = @transform_1, window_bounds = array<i64: 128, 256>}, {transform_indices = @transform_2, window_bounds = array<i64: 1, 256>}, {transform_indices = @transform_3, window_bounds = array<i64: 32, 256>}]} {
    %c0_i32 = arith.constant 0 : i32
    %0 = arith.cmpi eq, %arg2, %c0_i32 : i32
    %1 = arith.extui %0 : i1 to i32
    %c0_i32_0 = arith.constant 0 : i32
    %2 = arith.cmpi ne, %1, %c0_i32_0 : i32
    scf.if %2 {
      %cst_10 = arith.constant 0.000000e+00 : f32
      %12 = vector.broadcast %cst_10 : f32 to vector<32x256xf32>
      %c0_11 = arith.constant 0 : index
      %c0_12 = arith.constant 0 : index
      %13 = vector.load %arg7[%c0_11, %c0_12] : memref<32x256xf32, #tpu.memory_space<vmem>>, vector<32x256xf32>
      tpu.vector_store %arg7[%c0_11, %c0_12], %12 {strides = array<i32>} : memref<32x256xf32, #tpu.memory_space<vmem>>, vector<32x256xf32>,
    } else {
    }
    %c0 = arith.constant 0 : index
    %c0_1 = arith.constant 0 : index
    %3 = vector.load %arg7[%c0, %c0_1] : memref<32x256xf32, #tpu.memory_space<vmem>>, vector<32x256xf32>
    %c0_2 = arith.constant 0 : index
    %c0_3 = arith.constant 0 : index
    %4 = vector.load %arg3[%c0_2, %c0_3] : memref<32x128xbf16, #tpu.memory_space<vmem>>, vector<32x128xbf16>
    %c0_4 = arith.constant 0 : index
    %c0_5 = arith.constant 0 : index
    %5 = vector.load %arg4[%c0_4, %c0_5] : memref<128x256xbf16, #tpu.memory_space<vmem>>, vector<128x256xbf16>
    %cst = arith.constant dense<0.000000e+00> : vector<32x256xf32>
    %6 = tpu.matmul %4, %5, %cst {dimension_numbers = #tpu.dot_dimension_numbers<[1], [0], [0], [1], [0, 0, 1, 1], [], []>} : vector<32x128xbf16>, vector<128x256xbf16>, vector<32x256xf32> -> vector<32x256xf32>
    %7 = arith.addf %3, %6 : vector<32x256xf32>
    %c0_6 = arith.constant 0 : index
    %c0_7 = arith.constant 0 : index
    %8 = vector.load %arg7[%c0_6, %c0_7] : memref<32x256xf32, #tpu.memory_space<vmem>>, vector<32x256xf32>
    tpu.vector_store %arg7[%c0_6, %c0_7], %7 {strides = array<i32>} : memref<32x256xf32, #tpu.memory_space<vmem>>, vector<32x256xf32>,
    %c0_i32_8 = arith.constant 0 : i32
    %9 = arith.cmpi eq, %arg2, %c0_i32_8 : i32
    %10 = arith.extui %9 : i1 to i32
    %c0_i32_9 = arith.constant 0 : i32
    %11 = arith.cmpi ne, %10, %c0_i32_9 : i32
    scf.if %11 {
      %c0_10 = arith.constant 0 : index
      %c0_11 = arith.constant 0 : index
      %12 = vector.load %arg7[%c0_10, %c0_11] : memref<32x256xf32, #tpu.memory_space<vmem>>, vector<32x256xf32>
      %c0_12 = arith.constant 0 : index
      %c0_13 = arith.constant 0 : index
      %13 = vector.load %arg5[%c0_12, %c0_13] : memref<1x256xf32, #tpu.memory_space<vmem>>, vector<1x256xf32>
      %14 = vector.broadcast %13 : vector<1x256xf32> to vector<32x256xf32>
      %15 = arith.addf %12, %14 : vector<32x256xf32>
      %cst_14 = arith.constant 5.000000e-01 : f32
      %16 = vector.broadcast %cst_14 : f32 to vector<32x256xf32>
      %17 = arith.mulf %16, %15 : vector<32x256xf32>
      %cst_15 = arith.constant 0.707106769 : f32
      %18 = vector.broadcast %cst_15 : f32 to vector<32x256xf32>
      %19 = arith.mulf %15, %18 : vector<32x256xf32>
      %20 = math.absf %19 : vector<32x256xf32>
      %cst_16 = arith.constant 0.327591091 : f32
      %21 = vector.broadcast %cst_16 : f32 to vector<32x256xf32>
      %22 = arith.mulf %21, %20 : vector<32x256xf32>
      %cst_17 = arith.constant 1.000000e+00 : f32
      %23 = vector.broadcast %cst_17 : f32 to vector<32x256xf32>
      %24 = arith.addf %23, %22 : vector<32x256xf32>
      %cst_18 = arith.constant 1.000000e+00 : f32
      %25 = vector.broadcast %cst_18 : f32 to vector<32x256xf32>
      %26 = arith.divf %25, %24 : vector<32x256xf32>
      %cst_19 = arith.constant 1.06140542 : f32
      %27 = vector.broadcast %cst_19 : f32 to vector<32x256xf32>
      %28 = arith.mulf %27, %26 : vector<32x256xf32>
      %cst_20 = arith.constant -1.45315206 : f32
      %29 = vector.broadcast %cst_20 : f32 to vector<32x256xf32>
      %30 = arith.addf %28, %29 : vector<32x256xf32>
      %31 = arith.mulf %30, %26 : vector<32x256xf32>
      %cst_21 = arith.constant 1.42141378 : f32
      %32 = vector.broadcast %cst_21 : f32 to vector<32x256xf32>
      %33 = arith.addf %31, %32 : vector<32x256xf32>
      %34 = arith.mulf %33, %26 : vector<32x256xf32>
      %cst_22 = arith.constant -0.284496725 : f32
      %35 = vector.broadcast %cst_22 : f32 to vector<32x256xf32>
      %36 = arith.addf %34, %35 : vector<32x256xf32>
      %37 = arith.mulf %36, %26 : vector<32x256xf32>
      %cst_23 = arith.constant 0.254829586 : f32
      %38 = vector.broadcast %cst_23 : f32 to vector<32x256xf32>
      %39 = arith.addf %37, %38 : vector<32x256xf32>
      %40 = arith.mulf %39, %26 : vector<32x256xf32>
      %cst_24 = arith.constant 0.000000e+00 : f32
      %41 = vector.broadcast %cst_24 : f32 to vector<32x256xf32>
      %42 = arith.subf %41, %20 : vector<32x256xf32>
      %43 = arith.mulf %42, %20 : vector<32x256xf32>
      %44 = math.exp %43 : vector<32x256xf32>
      %45 = arith.mulf %40, %44 : vector<32x256xf32>
      %cst_25 = arith.constant 1.000000e+00 : f32
      %46 = vector.broadcast %cst_25 : f32 to vector<32x256xf32>
      %47 = arith.subf %46, %45 : vector<32x256xf32>
      %cst_26 = arith.constant 0.000000e+00 : f32
      %48 = vector.broadcast %cst_26 : f32 to vector<32x256xf32>
      %49 = arith.cmpf olt, %19, %48 : vector<32x256xf32>
      %cst_27 = arith.constant 0.000000e+00 : f32
      %50 = vector.broadcast %cst_27 : f32 to vector<32x256xf32>
      %51 = arith.subf %50, %47 : vector<32x256xf32>
      %52 = arith.select %49, %51, %47 : vector<32x256xi1>, vector<32x256xf32>
      %cst_28 = arith.constant 1.000000e+00 : f32
      %53 = vector.broadcast %cst_28 : f32 to vector<32x256xf32>
      %54 = arith.addf %53, %52 : vector<32x256xf32>
      %55 = arith.mulf %17, %54 : vector<32x256xf32>
      %c0_29 = arith.constant 0 : index
      %c0_30 = arith.constant 0 : index
      %56 = vector.load %arg6[%c0_29, %c0_30] : memref<32x256xf32, #tpu.memory_space<vmem>>, vector<32x256xf32>
      tpu.vector_store %arg6[%c0_29, %c0_30], %55 {strides = array<i32>} : memref<32x256xf32, #tpu.memory_space<vmem>>, vector<32x256xf32>,
    } else {
    }
    return
  }
  func.func @transform_0(%arg0: i32, %arg1: i32, %arg2: i32) -> (i32, i32) {
    %c0_i32 = arith.constant 0 : i32
    return %arg0, %arg2 : i32, i32
  }
  func.func @transform_1(%arg0: i32, %arg1: i32, %arg2: i32) -> (i32, i32) {
    %c0_i32 = arith.constant 0 : i32
    return %arg2, %arg1 : i32, i32
  }
  func.func @transform_2(%arg0: i32, %arg1: i32, %arg2: i32) -> (i32, i32) {
    %c0_i32 = arith.constant 0 : i32
    %c0_i32_0 = arith.constant 0 : i32
    return %c0_i32, %arg1 : i32, i32
  }
  func.func @transform_3(%arg0: i32, %arg1: i32, %arg2: i32) -> (i32, i32) {
    %c0_i32 = arith.constant 0 : i32
    return %arg0, %arg1 : i32, i32
  }
}

module attributes {stable_mosaic.version = 11 : i64} {
  func.func @kernel(%arg0: i32, %arg1: i32, %arg2: i32, %arg3: memref<32x256xbf16, #tpu.memory_space<vmem>>, %arg4: memref<256x128xbf16, #tpu.memory_space<vmem>>, %arg5: memref<1x128xf32, #tpu.memory_space<vmem>>, %arg6: memref<32x128xf32, #tpu.memory_space<vmem>>, %arg7: memref<32x128xf32, #tpu.memory_space<vmem>>, %arg8: memref<32x128xf32, #tpu.memory_space<vmem>>) attributes {dimension_semantics = [#tpu.dimension_semantics<parallel>, #tpu.dimension_semantics<parallel>, #tpu.dimension_semantics<arbitrary>], iteration_bounds = array<i64: 1, 1, 1>, scalar_prefetch = 0 : i64, scratch_operands = 1 : i64, tpu.core_type = #tpu.core_type<tc>, window_params = [{transform_indices = @transform_0, window_bounds = array<i64: 32, 256>}, {transform_indices = @transform_1, window_bounds = array<i64: 256, 128>}, {transform_indices = @transform_2, window_bounds = array<i64: 1, 128>}, {transform_indices = @transform_3, window_bounds = array<i64: 32, 128>}, {transform_indices = @transform_4, window_bounds = array<i64: 32, 128>}]} {
    %c0_i32 = arith.constant 0 : i32
    %0 = arith.cmpi eq, %arg2, %c0_i32 : i32
    %1 = arith.extui %0 : i1 to i32
    %c0_i32_0 = arith.constant 0 : i32
    %2 = arith.cmpi ne, %1, %c0_i32_0 : i32
    scf.if %2 {
      %cst_10 = arith.constant 0.000000e+00 : f32
      %12 = vector.broadcast %cst_10 : f32 to vector<32x128xf32>
      %c0_11 = arith.constant 0 : index
      %c0_12 = arith.constant 0 : index
      %13 = vector.load %arg8[%c0_11, %c0_12] : memref<32x128xf32, #tpu.memory_space<vmem>>, vector<32x128xf32>
      tpu.vector_store %arg8[%c0_11, %c0_12], %12 {strides = array<i32>} : memref<32x128xf32, #tpu.memory_space<vmem>>, vector<32x128xf32>,
    } else {
    }
    %c0 = arith.constant 0 : index
    %c0_1 = arith.constant 0 : index
    %3 = vector.load %arg8[%c0, %c0_1] : memref<32x128xf32, #tpu.memory_space<vmem>>, vector<32x128xf32>
    %c0_2 = arith.constant 0 : index
    %c0_3 = arith.constant 0 : index
    %4 = vector.load %arg3[%c0_2, %c0_3] : memref<32x256xbf16, #tpu.memory_space<vmem>>, vector<32x256xbf16>
    %c0_4 = arith.constant 0 : index
    %c0_5 = arith.constant 0 : index
    %5 = vector.load %arg4[%c0_4, %c0_5] : memref<256x128xbf16, #tpu.memory_space<vmem>>, vector<256x128xbf16>
    %cst = arith.constant dense<0.000000e+00> : vector<32x128xf32>
    %6 = tpu.matmul %4, %5, %cst {dimension_numbers = #tpu.dot_dimension_numbers<[1], [0], [0], [1], [0, 0, 1, 1], [], []>} : vector<32x256xbf16>, vector<256x128xbf16>, vector<32x128xf32> -> vector<32x128xf32>
    %7 = arith.addf %3, %6 : vector<32x128xf32>
    %c0_6 = arith.constant 0 : index
    %c0_7 = arith.constant 0 : index
    %8 = vector.load %arg8[%c0_6, %c0_7] : memref<32x128xf32, #tpu.memory_space<vmem>>, vector<32x128xf32>
    tpu.vector_store %arg8[%c0_6, %c0_7], %7 {strides = array<i32>} : memref<32x128xf32, #tpu.memory_space<vmem>>, vector<32x128xf32>,
    %c0_i32_8 = arith.constant 0 : i32
    %9 = arith.cmpi eq, %arg2, %c0_i32_8 : i32
    %10 = arith.extui %9 : i1 to i32
    %c0_i32_9 = arith.constant 0 : i32
    %11 = arith.cmpi ne, %10, %c0_i32_9 : i32
    scf.if %11 {
      %c0_10 = arith.constant 0 : index
      %c0_11 = arith.constant 0 : index
      %12 = vector.load %arg8[%c0_10, %c0_11] : memref<32x128xf32, #tpu.memory_space<vmem>>, vector<32x128xf32>
      %c0_12 = arith.constant 0 : index
      %c0_13 = arith.constant 0 : index
      %13 = vector.load %arg5[%c0_12, %c0_13] : memref<1x128xf32, #tpu.memory_space<vmem>>, vector<1x128xf32>
      %14 = vector.broadcast %13 : vector<1x128xf32> to vector<32x128xf32>
      %15 = arith.addf %12, %14 : vector<32x128xf32>
      %c0_14 = arith.constant 0 : index
      %c0_15 = arith.constant 0 : index
      %16 = vector.load %arg6[%c0_14, %c0_15] : memref<32x128xf32, #tpu.memory_space<vmem>>, vector<32x128xf32>
      %17 = arith.addf %15, %16 : vector<32x128xf32>
      %c0_16 = arith.constant 0 : index
      %c0_17 = arith.constant 0 : index
      %18 = vector.load %arg7[%c0_16, %c0_17] : memref<32x128xf32, #tpu.memory_space<vmem>>, vector<32x128xf32>
      tpu.vector_store %arg7[%c0_16, %c0_17], %17 {strides = array<i32>} : memref<32x128xf32, #tpu.memory_space<vmem>>, vector<32x128xf32>,
    } else {
    }
    return
  }
  func.func @transform_0(%arg0: i32, %arg1: i32, %arg2: i32) -> (i32, i32) {
    %c0_i32 = arith.constant 0 : i32
    return %arg0, %arg2 : i32, i32
  }
  func.func @transform_1(%arg0: i32, %arg1: i32, %arg2: i32) -> (i32, i32) {
    %c0_i32 = arith.constant 0 : i32
    return %arg2, %arg1 : i32, i32
  }
  func.func @transform_2(%arg0: i32, %arg1: i32, %arg2: i32) -> (i32, i32) {
    %c0_i32 = arith.constant 0 : i32
    %c0_i32_0 = arith.constant 0 : i32
    return %c0_i32, %arg1 : i32, i32
  }
  func.func @transform_3(%arg0: i32, %arg1: i32, %arg2: i32) -> (i32, i32) {
    %c0_i32 = arith.constant 0 : i32
    return %arg0, %arg1 : i32, i32
  }
  func.func @transform_4(%arg0: i32, %arg1: i32, %arg2: i32) -> (i32, i32) {
    %c0_i32 = arith.constant 0 : i32
    return %arg0, %arg1 : i32, i32
  }
}

module attributes {stable_mosaic.version = 11 : i64} {
  func.func @kernel(%arg0: i32, %arg1: i32, %arg2: i32, %arg3: memref<8x128xbf16, #tpu.memory_space<vmem>>, %arg4: memref<128x128xbf16, #tpu.memory_space<vmem>>, %arg5: memref<1x128xf32, #tpu.memory_space<vmem>>, %arg6: memref<8x128xf32, #tpu.memory_space<vmem>>, %arg7: memref<8x128xf32, #tpu.memory_space<vmem>>) attributes {dimension_semantics = [#tpu.dimension_semantics<parallel>, #tpu.dimension_semantics<parallel>, #tpu.dimension_semantics<arbitrary>], iteration_bounds = array<i64: 1, 1, 1>, scalar_prefetch = 0 : i64, scratch_operands = 1 : i64, tpu.core_type = #tpu.core_type<tc>, window_params = [{transform_indices = @transform_0, window_bounds = array<i64: 8, 128>}, {transform_indices = @transform_1, window_bounds = array<i64: 128, 128>}, {transform_indices = @transform_2, window_bounds = array<i64: 1, 128>}, {transform_indices = @transform_3, window_bounds = array<i64: 8, 128>}]} {
    %c0_i32 = arith.constant 0 : i32
    %0 = arith.cmpi eq, %arg2, %c0_i32 : i32
    %1 = arith.extui %0 : i1 to i32
    %c0_i32_0 = arith.constant 0 : i32
    %2 = arith.cmpi ne, %1, %c0_i32_0 : i32
    scf.if %2 {
      %cst_10 = arith.constant 0.000000e+00 : f32
      %12 = vector.broadcast %cst_10 : f32 to vector<8x128xf32>
      %c0_11 = arith.constant 0 : index
      %c0_12 = arith.constant 0 : index
      %13 = vector.load %arg7[%c0_11, %c0_12] : memref<8x128xf32, #tpu.memory_space<vmem>>, vector<8x128xf32>
      tpu.vector_store %arg7[%c0_11, %c0_12], %12 {strides = array<i32>} : memref<8x128xf32, #tpu.memory_space<vmem>>, vector<8x128xf32>,
    } else {
    }
    %c0 = arith.constant 0 : index
    %c0_1 = arith.constant 0 : index
    %3 = vector.load %arg7[%c0, %c0_1] : memref<8x128xf32, #tpu.memory_space<vmem>>, vector<8x128xf32>
    %c0_2 = arith.constant 0 : index
    %c0_3 = arith.constant 0 : index
    %4 = vector.load %arg3[%c0_2, %c0_3] : memref<8x128xbf16, #tpu.memory_space<vmem>>, vector<8x128xbf16>
    %c0_4 = arith.constant 0 : index
    %c0_5 = arith.constant 0 : index
    %5 = vector.load %arg4[%c0_4, %c0_5] : memref<128x128xbf16, #tpu.memory_space<vmem>>, vector<128x128xbf16>
    %cst = arith.constant dense<0.000000e+00> : vector<8x128xf32>
    %6 = tpu.matmul %4, %5, %cst {dimension_numbers = #tpu.dot_dimension_numbers<[1], [0], [0], [1], [0, 0, 1, 1], [], []>} : vector<8x128xbf16>, vector<128x128xbf16>, vector<8x128xf32> -> vector<8x128xf32>
    %7 = arith.addf %3, %6 : vector<8x128xf32>
    %c0_6 = arith.constant 0 : index
    %c0_7 = arith.constant 0 : index
    %8 = vector.load %arg7[%c0_6, %c0_7] : memref<8x128xf32, #tpu.memory_space<vmem>>, vector<8x128xf32>
    tpu.vector_store %arg7[%c0_6, %c0_7], %7 {strides = array<i32>} : memref<8x128xf32, #tpu.memory_space<vmem>>, vector<8x128xf32>,
    %c0_i32_8 = arith.constant 0 : i32
    %9 = arith.cmpi eq, %arg2, %c0_i32_8 : i32
    %10 = arith.extui %9 : i1 to i32
    %c0_i32_9 = arith.constant 0 : i32
    %11 = arith.cmpi ne, %10, %c0_i32_9 : i32
    scf.if %11 {
      %c0_10 = arith.constant 0 : index
      %c0_11 = arith.constant 0 : index
      %12 = vector.load %arg7[%c0_10, %c0_11] : memref<8x128xf32, #tpu.memory_space<vmem>>, vector<8x128xf32>
      %c0_12 = arith.constant 0 : index
      %c0_13 = arith.constant 0 : index
      %13 = vector.load %arg5[%c0_12, %c0_13] : memref<1x128xf32, #tpu.memory_space<vmem>>, vector<1x128xf32>
      %14 = vector.broadcast %13 : vector<1x128xf32> to vector<8x128xf32>
      %15 = arith.addf %12, %14 : vector<8x128xf32>
      %c0_14 = arith.constant 0 : index
      %c0_15 = arith.constant 0 : index
      %16 = vector.load %arg6[%c0_14, %c0_15] : memref<8x128xf32, #tpu.memory_space<vmem>>, vector<8x128xf32>
      tpu.vector_store %arg6[%c0_14, %c0_15], %15 {strides = array<i32>} : memref<8x128xf32, #tpu.memory_space<vmem>>, vector<8x128xf32>,
    } else {
    }
    return
  }
  func.func @transform_0(%arg0: i32, %arg1: i32, %arg2: i32) -> (i32, i32) {
    %c0_i32 = arith.constant 0 : i32
    return %arg0, %arg2 : i32, i32
  }
  func.func @transform_1(%arg0: i32, %arg1: i32, %arg2: i32) -> (i32, i32) {
    %c0_i32 = arith.constant 0 : i32
    return %arg2, %arg1 : i32, i32
  }
  func.func @transform_2(%arg0: i32, %arg1: i32, %arg2: i32) -> (i32, i32) {
    %c0_i32 = arith.constant 0 : i32
    %c0_i32_0 = arith.constant 0 : i32
    return %c0_i32, %arg1 : i32, i32
  }
  func.func @transform_3(%arg0: i32, %arg1: i32, %arg2: i32) -> (i32, i32) {
    %c0_i32 = arith.constant 0 : i32
    return %arg0, %arg1 : i32, i32
  }
}

</mosaic_0001>

<bundles_post_ra>
// kernel: _lambda_.35
= control target key start
LH: loop header
LB: loop body
LE: loop exit
PB: predicated region body
PF: predicated region fallthrough
CT: control target
= control target key end

     0   :  { %vm30_vm0 = vcmask 261120   ;;  %s666_s0 = inlined_call_operand.vmem [shape: f32[128,32], index: 0, kind: input, shape index: {}]   ;;  %s667_s1 = inlined_call_operand.vmem [shape: f32[1,32], index: 1, kind: input, shape index: {}]   ;;  %s668_s2 = inlined_call_operand.vmem [shape: f32[1,32], index: 2, kind: input, shape index: {}]   ;;  %s669_s3 = inlined_call_operand.vmem [shape: f32[128,32], index: 3, kind: output, shape index: {}]  }
   0x1   :  { %v14_v0 = vld [vmem:[%s666_s0] sm:$0xff]  ;;  %v16_v1 = vld [vmem:[%s666_s0 + $0x10] sm:$0xff]  ;;  %v15_v2 = vld [vmem:[%s666_s0 + $0x8] sm:$0xff] }
   0x2   :  { %v31_v3 = vsel %vm30_vm0, %v14_v0, 0.0  ;;  %v37_v4 = vsel %vm30_vm0, %v16_v1, 0.0  ;;  %v17_v5 = vld [vmem:[%s666_s0 + $0x18] sm:$0xff]  ;;  %v34_v6 = vsel %vm30_vm0, %v15_v2, 0.0  ;;  %v18_v8 = vld [vmem:[%s666_s0 + $0x20] sm:$0xff]  ;;  %v19_v9 = vld [vmem:[%s666_s0 + $0x28] sm:$0xff] }
   0x3   :  { %32 = vadd.xlane.f32.xlu0 %v31_v3  ;;  %38 = vadd.xlane.f32.xlu1 %v37_v4  ;;  %v40_v7 = vsel %vm30_vm0, %v17_v5, 0.0  ;;  %v43_v10 = vsel %vm30_vm0, %v18_v8, 0.0  ;;  %v46_v11 = vsel %vm30_vm0, %v19_v9, 0.0  ;;  %v387_v12 = vld [vmem:[%s666_s0 + $0x30] sm:$0xff]  ;;  %v392_v13 = vld [vmem:[%s666_s0 + $0x38] sm:$0xff]  ;;  %v401_v16 = vld [vmem:[%s666_s0 + $0x40] sm:$0xff] }
   0x4   :  { %v49_v14 = vsel %vm30_vm0, %v387_v12, 0.0  ;;  %v52_v15 = vsel %vm30_vm0, %v392_v13, 0.0  ;;  %v406_v17 = vld [vmem:[%s666_s0 + $0x48] sm:$0xff]  ;;  %v55_v18 = vsel %vm30_vm0, %v401_v16, 0.0  ;;  %v415_v20 = vld [vmem:[%s666_s0 + $0x50] sm:$0xff]  ;;  %v420_v21 = vld [vmem:[%s666_s0 + $0x58] sm:$0xff] }
   0x5   :  { %v58_v19 = vsel %vm30_vm0, %v406_v17, 0.0  ;;  %v61_v22 = vsel %vm30_vm0, %v415_v20, 0.0  ;;  %v64_v23 = vsel %vm30_vm0, %v420_v21, 0.0  ;;  %v429_v24 = vld [vmem:[%s666_s0 + $0x60] sm:$0xff]  ;;  %v434_v25 = vld [vmem:[%s666_s0 + $0x68] sm:$0xff]  ;;  %v443_v28 = vld [vmem:[%s666_s0 + $0x70] sm:$0xff] }
   0x6   :  { %v67_v26 = vsel %vm30_vm0, %v429_v24, 0.0  ;;  %v70_v27 = vsel %vm30_vm0, %v434_v25, 0.0  ;;  %v448_v29 = vld [vmem:[%s666_s0 + $0x78] sm:$0xff]  ;;  %v73_v30 = vsel %vm30_vm0, %v443_v28, 0.0 }
   0x7   :  { %35 = vadd.xlane.f32.xlu0 %v34_v6  ;;  %41 = vadd.xlane.f32.xlu1 %v40_v7  ;;  %v76_v31 = vsel %vm30_vm0, %v448_v29, 0.0 }
   0xb   :  { %44 = vadd.xlane.f32.xlu0 %v43_v10  ;;  %47 = vadd.xlane.f32.xlu1 %v46_v11 }
   0xf   :  { %50 = vadd.xlane.f32.xlu0 %v49_v14  ;;  %53 = vadd.xlane.f32.xlu1 %v52_v15 }
  0x13   :  { %56 = vadd.xlane.f32.xlu0 %v55_v18  ;;  %59 = vadd.xlane.f32.xlu1 %v58_v19 }
  0x17   :  { %62 = vadd.xlane.f32.xlu0 %v61_v22  ;;  %65 = vadd.xlane.f32.xlu1 %v64_v23 }
  0x1b   :  { %68 = vadd.xlane.f32.xlu0 %v67_v26  ;;  %71 = vadd.xlane.f32.xlu1 %v70_v27 }
  0x1f   :  { %74 = vadd.xlane.f32.xlu0 %v73_v30  ;;  %77 = vadd.xlane.f32.xlu1 %v76_v31 }
  0x90   :  { %v33_v32 = vpop.xlane.xlu0 %32  ;;  %v39_v33 = vpop.xlane.xlu1 %38 }
  0x91   :  { %v80_v34 = vmul.f32 0.03125, %v33_v32  ;;  %v82_v35 = vmul.f32 0.03125, %v39_v33 }
  0x93   :  { %v454_v36 = vsub.f32 %v14_v0, %v80_v34  ;;  %v456_v37 = vsub.f32 %v16_v1, %v82_v35 }
  0x94   :  { %v36_v38 = vpop.xlane.xlu0 %35  ;;  %v42_v39 = vpop.xlane.xlu1 %41 }
  0x95   :  { %v81_v40 = vmul.f32 0.03125, %v36_v38  ;;  %v83_v41 = vmul.f32 0.03125, %v42_v39  ;;  %v112_v42 = vmul.f32 %v454_v36, %v454_v36  ;;  %v114_v43 = vmul.f32 %v456_v37, %v456_v37 }
  0x97   :  { %v462_v44 = vsub.f32 %v15_v2, %v81_v40  ;;  %v464_v45 = vsub.f32 %v17_v5, %v83_v41  ;;  %v128_v46 = vsel %vm30_vm0, %v112_v42, 0.0  ;;  %v134_v49 = vsel %vm30_vm0, %v114_v43, 0.0 }
  0x98   :  { %129 = vadd.xlane.f32.xlu0 %v128_v46  ;;  %v45_v47 = vpop.xlane.xlu0 %44  ;;  %v48_v48 = vpop.xlane.xlu1 %47 }
  0x99   :  { %v84_v50 = vmul.f32 0.03125, %v45_v47  ;;  %v85_v51 = vmul.f32 0.03125, %v48_v48  ;;  %v113_v52 = vmul.f32 %v462_v44, %v462_v44  ;;  %v115_v53 = vmul.f32 %v464_v45, %v464_v45 }
  0x9b   :  { %v472_v54 = vsub.f32 %v18_v8, %v84_v50  ;;  %v474_v55 = vsub.f32 %v19_v9, %v85_v51  ;;  %v131_v56 = vsel %vm30_vm0, %v113_v52, 0.0  ;;  %v137_v59 = vsel %vm30_vm0, %v115_v53, 0.0 }
  0x9c   :  { %135 = vadd.xlane.f32.xlu0 %v134_v49  ;;  %132 = vadd.xlane.f32.xlu1 %v131_v56  ;;  %v51_v57 = vpop.xlane.xlu0 %50  ;;  %v54_v58 = vpop.xlane.xlu1 %53 }
  0x9d   :  { %v86_v60 = vmul.f32 0.03125, %v51_v57  ;;  %v87_v61 = vmul.f32 0.03125, %v54_v58  ;;  %v116_v62 = vmul.f32 %v472_v54, %v472_v54  ;;  %v117_v63 = vmul.f32 %v474_v55, %v474_v55 }
  0x9f   :  { %v483_v0 = vsub.f32 %v387_v12, %v86_v60  ;;  %v486_v1 = vsub.f32 %v392_v13, %v87_v61  ;;  %v140_v2 = vsel %vm30_vm0, %v116_v62, 0.0  ;;  %v143_v5 = vsel %vm30_vm0, %v117_v63, 0.0 }
  0xa0   :  { %138 = vadd.xlane.f32.xlu1 %v137_v59  ;;  %141 = vadd.xlane.f32.xlu0 %v140_v2  ;;  %v57_v3 = vpop.xlane.xlu0 %56  ;;  %v60_v4 = vpop.xlane.xlu1 %59 }
  0xa1   :  { %v88_v6 = vmul.f32 0.03125, %v57_v3  ;;  %v89_v7 = vmul.f32 0.03125, %v60_v4  ;;  %v118_v8 = vmul.f32 %v483_v0, %v483_v0  ;;  %v119_v9 = vmul.f32 %v486_v1, %v486_v1 }
  0xa3   :  { %v495_v10 = vsub.f32 %v401_v16, %v88_v6  ;;  %v498_v11 = vsub.f32 %v406_v17, %v89_v7  ;;  %v146_v12 = vsel %vm30_vm0, %v118_v8, 0.0  ;;  %v149_v15 = vsel %vm30_vm0, %v119_v9, 0.0 }
  0xa4   :  { %144 = vadd.xlane.f32.xlu1 %v143_v5  ;;  %147 = vadd.xlane.f32.xlu0 %v146_v12  ;;  %v63_v13 = vpop.xlane.xlu0 %62  ;;  %v66_v14 = vpop.xlane.xlu1 %65 }
  0xa5   :  { %v90_v18 = vmul.f32 0.03125, %v63_v13  ;;  %v91_v19 = vmul.f32 0.03125, %v66_v14  ;;  %v120_v22 = vmul.f32 %v495_v10, %v495_v10  ;;  %v121_v16 = vmul.f32 %v498_v11, %v498_v11  ;;  %v547_v14 = vld [vmem:[%s667_s1] ss:$0 sm:$0xff] }
  0xa7   :  { %v507_v23 = vsub.f32 %v415_v20, %v90_v18  ;;  %v510_v17 = vsub.f32 %v420_v21, %v91_v19  ;;  %v152_v26 = vsel %vm30_vm0, %v120_v22, 0.0  ;;  %v155_v31 = vsel %vm30_vm0, %v121_v16, 0.0 }
  0xa8   :  { %150 = vadd.xlane.f32.xlu1 %v149_v15  ;;  %153 = vadd.xlane.f32.xlu0 %v152_v26  ;;  %v69_v27 = vpop.xlane.xlu0 %68  ;;  %v72_v30 = vpop.xlane.xlu1 %71  ;;  %v553_v26 = vld [vmem:[%s668_s2] ss:$0 sm:$0xff] }
  0xa9   :  { %v92_v32 = vmul.f32 0.03125, %v69_v27  ;;  %v93_v33 = vmul.f32 0.03125, %v72_v30  ;;  %v122_v34 = vmul.f32 %v507_v23, %v507_v23  ;;  %v123_v20 = vmul.f32 %v510_v17, %v510_v17 }
  0xab   :  { %v519_v35 = vsub.f32 %v429_v24, %v92_v32  ;;  %v522_v21 = vsub.f32 %v434_v25, %v93_v33  ;;  %v158_v38 = vsel %vm30_vm0, %v122_v34, 0.0  ;;  %v161_v41 = vsel %vm30_vm0, %v123_v20, 0.0 }
  0xac   :  { %156 = vadd.xlane.f32.xlu1 %v155_v31  ;;  %159 = vadd.xlane.f32.xlu0 %v158_v38  ;;  %v75_v39 = vpop.xlane.xlu0 %74  ;;  %v78_v40 = vpop.xlane.xlu1 %77 }
  0xad   :  { %v94_v42 = vmul.f32 0.03125, %v75_v39  ;;  %v95_v43 = vmul.f32 0.03125, %v78_v40  ;;  %v124_v46 = vmul.f32 %v519_v35, %v519_v35  ;;  %v125_v24 = vmul.f32 %v522_v21, %v522_v21 }
  0xaf   :  { %v531_v47 = vsub.f32 %v443_v28, %v94_v42  ;;  %v534_v25 = vsub.f32 %v448_v29, %v95_v43  ;;  %v164_v48 = vsel %vm30_vm0, %v124_v46, 0.0  ;;  %v167_v49 = vsel %vm30_vm0, %v125_v24, 0.0 }
  0xb0   :  { %162 = vadd.xlane.f32.xlu1 %v161_v41  ;;  %165 = vadd.xlane.f32.xlu0 %v164_v48 }
  0xb1   :  { %v126_v50 = vmul.f32 %v531_v47, %v531_v47  ;;  %v127_v51 = vmul.f32 %v534_v25, %v534_v25 }
  0xb3   :  { %v170_v52 = vsel %vm30_vm0, %v126_v50, 0.0  ;;  %v173_v28 = vsel %vm30_vm0, %v127_v51, 0.0 }
  0xb4   :  { %168 = vadd.xlane.f32.xlu1 %v167_v49  ;;  %171 = vadd.xlane.f32.xlu0 %v170_v52 }
  0xb8   :  { %174 = vadd.xlane.f32.xlu1 %v173_v28 }
 0x125   :  { %v130_v29 = vpop.xlane.xlu0 %129 }
 0x126   :  { %v176_v53 = vmul.f32 0.03125, %v130_v29 }
 0x128   :  { %v192_v56 = vadd.f32 1e-05, %v176_v53 }
 0x129   :  { %v133_v57 = vpop.xlane.xlu1 %132  ;;  %v136_v58 = vpop.xlane.xlu0 %135 }
 0x12a   :  { %308 = vrsqrt.f32 %v192_v56  ;;  %v177_v59 = vmul.f32 0.03125, %v133_v57  ;;  %v178_v60 = vmul.f32 0.03125, %v136_v58 }
 0x12c   :  { %v193_v61 = vadd.f32 1e-05, %v177_v59  ;;  %v194_v62 = vadd.f32 1e-05, %v178_v60 }
 0x12d   :  { %v139_v63 = vpop.xlane.xlu1 %138  ;;  %v142_v2 = vpop.xlane.xlu0 %141 }
 0x12e   :  { %310 = vrsqrt.f32 %v193_v61  ;;  %v179_v3 = vmul.f32 0.03125, %v139_v63  ;;  %v180_v4 = vmul.f32 0.03125, %v142_v2 }
 0x12f   :  { %312 = vrsqrt.f32 %v194_v62 }
 0x130   :  { %v195_v5 = vadd.f32 1e-05, %v179_v3  ;;  %v196_v6 = vadd.f32 1e-05, %v180_v4 }
 0x131   :  { %v145_v7 = vpop.xlane.xlu1 %144  ;;  %v148_v8 = vpop.xlane.xlu0 %147 }
 0x132   :  { %314 = vrsqrt.f32 %v195_v5  ;;  %v181_v9 = vmul.f32 0.03125, %v145_v7  ;;  %v182_v12 = vmul.f32 0.03125, %v148_v8 }
 0x133   :  { %316 = vrsqrt.f32 %v196_v6 }
 0x134   :  { %v309_v13 = vpop.eup %308  ;;  %v197_v15 = vadd.f32 1e-05, %v181_v9  ;;  %v198_v18 = vadd.f32 1e-05, %v182_v12 }
 0x135   :  { %v224_v19 = vmul.f32 %v309_v13, %v454_v36  ;;  %v151_v22 = vpop.xlane.xlu1 %150  ;;  %v154_v16 = vpop.xlane.xlu0 %153 }
 0x136   :  { %318 = vrsqrt.f32 %v197_v15  ;;  %v183_v27 = vmul.f32 0.03125, %v151_v22  ;;  %v184_v30 = vmul.f32 0.03125, %v154_v16 }
 0x137   :  { %v247_v31 = vmul.f32 %v547_v14, %v224_v19  ;;  %320 = vrsqrt.f32 %v198_v18 }
 0x138   :  { %v311_v32 = vpop.eup %310  ;;  %v199_v33 = vadd.f32 1e-05, %v183_v27  ;;  %v200_v34 = vadd.f32 1e-05, %v184_v30 }
 0x139   :  { %v313_v20 = vpop.eup %312  ;;  %v270_v38 = vadd.f32 %v553_v26, %v247_v31  ;;  %v225_v36 = vmul.f32 %v311_v32, %v462_v44  ;;  %v157_v39 = vpop.xlane.xlu1 %156 }
 0x13a   :  { %v160_v40 = vpop.xlane.xlu0 %159  ;;  %v226_v41 = vmul.f32 %v313_v20, %v456_v37  ;;  %322 = vrsqrt.f32 %v199_v33  ;;  %v185_v42 = vmul.f32 0.03125, %v157_v39 }
 0x13b   :  { %v186_v43 = vmul.f32 0.03125, %v160_v40  ;;  %286 = vst.msk [vmem:[%s669_s3] sm:$0xff] %vm30_vm0, %v270_v38  ;;  %v248_v46 = vmul.f32 %v547_v14, %v225_v36  ;;  %324 = vrsqrt.f32 %v200_v34 }
 0x13c   :  { %v315_v24 = vpop.eup %314  ;;  %v249_v48 = vmul.f32 %v547_v14, %v226_v41  ;;  %v201_v49 = vadd.f32 1e-05, %v185_v42 }
 0x13d   :  { %v202_v44 = vadd.f32 1e-05, %v186_v43  ;;  %v317_v50 = vpop.eup %316  ;;  %v271_v51 = vadd.f32 %v553_v26, %v248_v46  ;;  %v227_v37 = vmul.f32 %v315_v24, %v464_v45  ;;  %v163_v52 = vpop.xlane.xlu1 %162 }
 0x13e   :  { %v166_v28 = vpop.xlane.xlu0 %165  ;;  %v272_v29 = vadd.f32 %v553_v26, %v249_v48  ;;  %v228_v53 = vmul.f32 %v317_v50, %v472_v54  ;;  %326 = vrsqrt.f32 %v201_v49  ;;  %v187_v56 = vmul.f32 0.03125, %v163_v52 }
 0x13f   :  { %287 = vst.msk [vmem:[%s669_s3 + $0x8] sm:$0xff] %vm30_vm0, %v271_v51  ;;  %v250_v57 = vmul.f32 %v547_v14, %v227_v37  ;;  %328 = vrsqrt.f32 %v202_v44  ;;  %v188_v58 = vmul.f32 0.03125, %v166_v28 }
 0x140   :  { %v319_v59 = vpop.eup %318  ;;  %288 = vst.msk [vmem:[%s669_s3 + $0x10] sm:$0xff] %vm30_vm0, %v272_v29  ;;  %v251_v45 = vmul.f32 %v547_v14, %v228_v53  ;;  %v203_v54 = vadd.f32 1e-05, %v187_v56 }
 0x141   :  { %v321_v60 = vpop.eup %320  ;;  %v273_v61 = vadd.f32 %v553_v26, %v250_v57  ;;  %v229_v62 = vmul.f32 %v319_v59, %v474_v55  ;;  %v204_v63 = vadd.f32 1e-05, %v188_v58  ;;  %v169_v2 = vpop.xlane.xlu1 %168 }
 0x142   :  { %v172_v3 = vpop.xlane.xlu0 %171  ;;  %v274_v4 = vadd.f32 %v553_v26, %v251_v45  ;;  %v230_v5 = vmul.f32 %v321_v60, %v483_v0  ;;  %330 = vrsqrt.f32 %v203_v54  ;;  %v189_v6 = vmul.f32 0.03125, %v169_v2 }
 0x143   :  { %289 = vst.msk [vmem:[%s669_s3 + $0x18] sm:$0xff] %vm30_vm0, %v273_v61  ;;  %v252_v7 = vmul.f32 %v547_v14, %v229_v62  ;;  %332 = vrsqrt.f32 %v204_v63  ;;  %v190_v8 = vmul.f32 0.03125, %v172_v3 }
 0x144   :  { %v323_v9 = vpop.eup %322  ;;  %290 = vst.msk [vmem:[%s669_s3 + $0x20] sm:$0xff] %vm30_vm0, %v274_v4  ;;  %v253_v55 = vmul.f32 %v547_v14, %v230_v5  ;;  %v205_v0 = vadd.f32 1e-05, %v189_v6 }
 0x145   :  { %v325_v12 = vpop.eup %324  ;;  %v275_v13 = vadd.f32 %v553_v26, %v252_v7  ;;  %v231_v15 = vmul.f32 %v323_v9, %v486_v1  ;;  %v206_v18 = vadd.f32 1e-05, %v190_v8  ;;  %v175_v19 = vpop.xlane.xlu1 %174 }
 0x146   :  { %v276_v22 = vadd.f32 %v553_v26, %v253_v55  ;;  %v232_v16 = vmul.f32 %v325_v12, %v495_v10  ;;  %334 = vrsqrt.f32 %v205_v0  ;;  %v191_v27 = vmul.f32 0.03125, %v175_v19 }
 0x147   :  { %291 = vst.msk [vmem:[%s669_s3 + $0x28] sm:$0xff] %vm30_vm0, %v275_v13  ;;  %v254_v30 = vmul.f32 %v547_v14, %v231_v15  ;;  %336 = vrsqrt.f32 %v206_v18 }
 0x148   :  { %v327_v31 = vpop.eup %326  ;;  %292 = vst.msk [vmem:[%s669_s3 + $0x30] sm:$0xff] %vm30_vm0, %v276_v22  ;;  %v255_v1 = vmul.f32 %v547_v14, %v232_v16  ;;  %v207_v32 = vadd.f32 1e-05, %v191_v27 }
 0x149   :  { %v329_v10 = vpop.eup %328  ;;  %v277_v33 = vadd.f32 %v553_v26, %v254_v30  ;;  %v233_v34 = vmul.f32 %v327_v31, %v498_v11 }
 0x14a   :  { %v278_v20 = vadd.f32 %v553_v26, %v255_v1  ;;  %v234_v38 = vmul.f32 %v329_v10, %v507_v23  ;;  %338 = vrsqrt.f32 %v207_v32 }
 0x14b   :  { %293 = vst.msk [vmem:[%s669_s3 + $0x38] sm:$0xff] %vm30_vm0, %v277_v33  ;;  %v256_v36 = vmul.f32 %v547_v14, %v233_v34 }
 0x14c   :  { %v331_v39 = vpop.eup %330  ;;  %294 = vst.msk [vmem:[%s669_s3 + $0x40] sm:$0xff] %vm30_vm0, %v278_v20  ;;  %v257_v11 = vmul.f32 %v547_v14, %v234_v38 }
 0x14d   :  { %v333_v40 = vpop.eup %332  ;;  %v279_v41 = vadd.f32 %v553_v26, %v256_v36  ;;  %v235_v23 = vmul.f32 %v331_v39, %v510_v17 }
 0x14e   :  { %v280_v42 = vadd.f32 %v553_v26, %v257_v11  ;;  %v236_v43 = vmul.f32 %v333_v40, %v519_v35 }
 0x14f   :  { %295 = vst.msk [vmem:[%s669_s3 + $0x48] sm:$0xff] %vm30_vm0, %v279_v41  ;;  %v258_v46 = vmul.f32 %v547_v14, %v235_v23 }
 0x150   :  { %v335_v24 = vpop.eup %334  ;;  %296 = vst.msk [vmem:[%s669_s3 + $0x50] sm:$0xff] %vm30_vm0, %v280_v42  ;;  %v259_v48 = vmul.f32 %v547_v14, %v236_v43 }
 0x151   :  { %v337_v17 = vpop.eup %336  ;;  %v281_v49 = vadd.f32 %v553_v26, %v258_v46  ;;  %v237_v35 = vmul.f32 %v335_v24, %v522_v21 }
 0x152   :  { %v282_v44 = vadd.f32 %v553_v26, %v259_v48  ;;  %v238_v50 = vmul.f32 %v337_v17, %v531_v47 }
 0x153   :  { %297 = vst.msk [vmem:[%s669_s3 + $0x58] sm:$0xff] %vm30_vm0, %v281_v49  ;;  %v260_v51 = vmul.f32 %v547_v14, %v237_v35 }
 0x154   :  { %v339_v37 = vpop.eup %338  ;;  %298 = vst.msk [vmem:[%s669_s3 + $0x60] sm:$0xff] %vm30_vm0, %v282_v44  ;;  %v261_v52 = vmul.f32 %v547_v14, %v238_v50 }
 0x155   :  { %v283_v21 = vadd.f32 %v553_v26, %v260_v51  ;;  %v239_v28 = vmul.f32 %v339_v37, %v534_v25 }
 0x156   :  { %v284_v47 = vadd.f32 %v553_v26, %v261_v52 }
 0x157   :  { %299 = vst.msk [vmem:[%s669_s3 + $0x68] sm:$0xff] %vm30_vm0, %v283_v21  ;;  %v262_v29 = vmul.f32 %v547_v14, %v239_v28 }
 0x158   :  { %300 = vst.msk [vmem:[%s669_s3 + $0x70] sm:$0xff] %vm30_vm0, %v284_v47 }
 0x159   :  { %v285_v53 = vadd.f32 %v553_v26, %v262_v29 }
 0x15b   :  { %301 = vst.msk [vmem:[%s669_s3 + $0x78] sm:$0xff] %vm30_vm0, %v285_v53 }

// kernel: _lambda_.34
= control target key start
LH: loop header
LB: loop body
LE: loop exit
PB: predicated region body
PF: predicated region fallthrough
CT: control target
= control target key end

     0   :  { %s586_s1 = inlined_call_operand.vmem [shape: bf16[128,128], index: 1, kind: input, shape index: {}]   ;;  %s587_s0 = inlined_call_operand.vmem [shape: bf16[128,128], index: 0, kind: input, shape index: {}]   ;;  %s588_s2 = inlined_call_operand.vmem [shape: f32[1,128], index: 2, kind: input, shape index: {}]   ;;  %s589_s3 = inlined_call_operand.vmem [shape: f32[128,128], index: 3, kind: output, shape index: {}]  }
   0x1   :  { %v451_v0 = vld [vmem:[%s586_s1] sm:$0xff]   ;;  %v452_v1 = vld [vmem:[%s586_s1 + $0x8] sm:$0xff]   ;;  %v453_v2 = vld [vmem:[%s586_s1 + $0x10] sm:$0xff]  }
   0x2   :  { %403 = vmatprep.subr.bf16.mxu0 %v451_v0  ;;  %435 = vmatprep.subr.bf16.mxu1 %v451_v0  ;;  %v454_v3 = vld [vmem:[%s586_s1 + $0x18] sm:$0xff]   ;;  %v459_v4 = vld [vmem:[%s587_s0] sm:$0xff]   ;;  %v456_v7 = vld [vmem:[%s586_s1 + $0x28] sm:$0xff]  }
   0x3   :  { %404 = vmatpush3.bf16.msra.mxu0 %v451_v0  ;;  %443 = vmatpush3.bf16.msra.mxu1 %v451_v0  ;;  %v460_v5 = vld [vmem:[%s587_s0 + $0x20] sm:$0xff]   ;;  %v457_v8 = vld [vmem:[%s586_s1 + $0x30] sm:$0xff]   ;;  %v458_v9 = vld [vmem:[%s586_s1 + $0x38] sm:$0xff]  }
   0x4   :  { %405 = vmatprep.subr.bf16.mxu0 %v452_v1  ;;  %436 = vmatprep.subr.bf16.mxu1 %v452_v1  ;;  %v455_v6 = vld [vmem:[%s586_s1 + $0x20] sm:$0xff]   ;;  %v461_v10 = vld [vmem:[%s587_s0 + $0x8] sm:$0xff]   ;;  %v463_v12 = vld [vmem:[%s587_s0 + $0x10] sm:$0xff]  }
   0x5   :  { %419 = vmatprep.mubr.bf16.mxu0 %v459_v4  ;;  %427 = vmatprep.mubr.bf16.mxu1 %v460_v5  ;;  %v462_v11 = vld [vmem:[%s587_s0 + $0x28] sm:$0xff]   ;;  %v464_v13 = vld [vmem:[%s587_s0 + $0x30] sm:$0xff]   ;;  %v465_v14 = vld [vmem:[%s587_s0 + $0x18] sm:$0xff]  }
   0x6   :  { %v466_v15 = vld [vmem:[%s587_s0 + $0x38] sm:$0xff]   ;;  %v386_v16 = vld [vmem:[%s588_s2] ss:$0 sm:$0xff] }
   0x7   :  { %406 = vmatpush3.bf16.msra.mxu0 %v452_v1  ;;  %444 = vmatpush3.bf16.msra.mxu1 %v452_v1 }
   0x8   :  { %407 = vmatprep.subr.bf16.mxu0 %v453_v2  ;;  %437 = vmatprep.subr.bf16.mxu1 %v453_v2 }
   0xb   :  { %408 = vmatpush3.bf16.msra.mxu0 %v453_v2  ;;  %445 = vmatpush3.bf16.msra.mxu1 %v453_v2 }
   0xc   :  { %409 = vmatprep.subr.bf16.mxu0 %v454_v3  ;;  %438 = vmatprep.subr.bf16.mxu1 %v454_v3 }
   0xf   :  { %410 = vmatpush3.bf16.msra.mxu0 %v454_v3  ;;  %446 = vmatpush3.bf16.msra.mxu1 %v454_v3 }
  0x10   :  { %411 = vmatprep.subr.bf16.mxu0 %v455_v6  ;;  %439 = vmatprep.subr.bf16.mxu1 %v455_v6 }
  0x13   :  { %412 = vmatpush3.bf16.msra.mxu0 %v455_v6  ;;  %447 = vmatpush3.bf16.msra.mxu1 %v455_v6 }
  0x14   :  { %413 = vmatprep.subr.bf16.mxu0 %v456_v7  ;;  %440 = vmatprep.subr.bf16.mxu1 %v456_v7 }
  0x17   :  { %414 = vmatpush3.bf16.msra.mxu0 %v456_v7  ;;  %448 = vmatpush3.bf16.msra.mxu1 %v456_v7 }
  0x18   :  { %415 = vmatprep.subr.bf16.mxu0 %v457_v8  ;;  %441 = vmatprep.subr.bf16.mxu1 %v457_v8 }
  0x1b   :  { %416 = vmatpush3.bf16.msra.mxu0 %v457_v8  ;;  %449 = vmatpush3.bf16.msra.mxu1 %v457_v8 }
  0x1c   :  { %417 = vmatprep.subr.bf16.mxu0 %v458_v9  ;;  %442 = vmatprep.subr.bf16.mxu1 %v458_v9 }
  0x1f   :  { %418 = vmatpush3.bf16.msra.mxu0 %v458_v9  ;;  %450 = vmatpush3.bf16.msra.mxu1 %v458_v9 }
  0x22   :  { %420 = vmatmul.mubr.bf16.vlgmr.msra.gmra.mrb[0].mxu0 %v461_v10  ;;  %428 = vmatmul.mubr.bf16.vlgmr.msra.gmra.mrb[0].mxu1 %v462_v11 }
  0x23   :  { %423 = vmatprep.mubr.bf16.mxu0 %v463_v12  ;;  %431 = vmatprep.mubr.bf16.mxu1 %v464_v13 }
  0x2a   :  { %424 = vmatmul.mubr.bf16.gmra.mrb[4].mxu0 %v465_v14  ;;  %432 = vmatmul.mubr.bf16.gmra.mrb[4].mxu1 %v466_v15 }
  0xf5   :  { %v421_v17 = vpop.f32.mrb[0].mxu0  ;;  %v429_v18 = vpop.f32.mrb[0].mxu1 }
  0xf6   :  { %v336_v19 = vadd.f32 %v421_v17, %v386_v16  ;;  %v344_v20 = vadd.f32 %v429_v18, %v386_v16  ;;  %v213_v21 = vpop.f32.mrb[1].mxu0  ;;  %v245_v22 = vpop.f32.mrb[1].mxu1 }
  0xf7   :  { %v334_v23 = vadd.f32 %v386_v16, %v213_v21  ;;  %v342_v24 = vadd.f32 %v386_v16, %v245_v22  ;;  %v422_v25 = vpop.f32.mrb[2].mxu0  ;;  %v430_v26 = vpop.f32.mrb[2].mxu1 }
  0xf8   :  { %352 = vst [vmem:[%s589_s3 + $0x10] sm:$0xff] %v336_v19  ;;  %360 = vst [vmem:[%s589_s3 + $0x50] sm:$0xff] %v344_v20  ;;  %v337_v27 = vadd.f32 %v422_v25, %v386_v16  ;;  %v345_v28 = vadd.f32 %v430_v26, %v386_v16  ;;  %v216_v29 = vpop.f32.mrb[3].mxu0  ;;  %v248_v30 = vpop.f32.mrb[3].mxu1 }
  0xf9   :  { %350 = vst [vmem:[%s589_s3] sm:$0xff] %v334_v23  ;;  %358 = vst [vmem:[%s589_s3 + $0x40] sm:$0xff] %v342_v24  ;;  %v335_v31 = vadd.f32 %v386_v16, %v216_v29  ;;  %v343_v32 = vadd.f32 %v386_v16, %v248_v30 }
  0xfa   :  { %353 = vst [vmem:[%s589_s3 + $0x18] sm:$0xff] %v337_v27  ;;  %361 = vst [vmem:[%s589_s3 + $0x58] sm:$0xff] %v345_v28 }
  0xfb   :  { %351 = vst [vmem:[%s589_s3 + $0x8] sm:$0xff] %v335_v31  ;;  %359 = vst [vmem:[%s589_s3 + $0x48] sm:$0xff] %v343_v32 }
  0xfd   :  { %v425_v33 = vpop.f32.mrb[4].mxu0  ;;  %v433_v34 = vpop.f32.mrb[4].mxu1 }
  0xfe   :  { %v340_v35 = vadd.f32 %v425_v33, %v386_v16  ;;  %v348_v36 = vadd.f32 %v433_v34, %v386_v16  ;;  %v229_v37 = vpop.f32.mrb[5].mxu0  ;;  %v261_v38 = vpop.f32.mrb[5].mxu1 }
  0xff   :  { %v338_v39 = vadd.f32 %v386_v16, %v229_v37  ;;  %v346_v40 = vadd.f32 %v386_v16, %v261_v38  ;;  %v426_v41 = vpop.f32.mrb[6].mxu0  ;;  %v434_v42 = vpop.f32.mrb[6].mxu1 }
 0x100   :  { %356 = vst [vmem:[%s589_s3 + $0x30] sm:$0xff] %v340_v35  ;;  %364 = vst [vmem:[%s589_s3 + $0x70] sm:$0xff] %v348_v36  ;;  %v341_v43 = vadd.f32 %v426_v41, %v386_v16  ;;  %v349_v44 = vadd.f32 %v434_v42, %v386_v16  ;;  %v232_v45 = vpop.f32.mrb[7].mxu0  ;;  %v264_v46 = vpop.f32.mrb[7].mxu1 }
 0x101   :  { %354 = vst [vmem:[%s589_s3 + $0x20] sm:$0xff] %v338_v39  ;;  %362 = vst [vmem:[%s589_s3 + $0x60] sm:$0xff] %v346_v40  ;;  %v339_v47 = vadd.f32 %v386_v16, %v232_v45  ;;  %v347_v48 = vadd.f32 %v386_v16, %v264_v46 }
 0x102   :  { %357 = vst [vmem:[%s589_s3 + $0x38] sm:$0xff] %v341_v43  ;;  %365 = vst [vmem:[%s589_s3 + $0x78] sm:$0xff] %v349_v44 }
 0x103   :  { %355 = vst [vmem:[%s589_s3 + $0x28] sm:$0xff] %v339_v47  ;;  %363 = vst [vmem:[%s589_s3 + $0x68] sm:$0xff] %v347_v48 }

// kernel: _lambda_.41
= control target key start
LH: loop header
LB: loop body
LE: loop exit
PB: predicated region body
PF: predicated region fallthrough
CT: control target
= control target key end

     0   :  { %s1386_s1 = inlined_call_operand.vmem [shape: bf16[128,128], index: 1, kind: input, shape index: {}]   ;;  %s1387_s0 = inlined_call_operand.vmem [shape: bf16[128,128], index: 0, kind: input, shape index: {}]   ;;  %s1388_s2 = inlined_call_operand.vmem [shape: f32[1,128], index: 2, kind: input, shape index: {}]   ;;  %s1389_s3 = inlined_call_operand.vmem [shape: f32[128,128], index: 3, kind: output, shape index: {}]  }
   0x1   :  { %v883_v0 = vld [vmem:[%s1386_s1] sm:$0xff]   ;;  %v884_v1 = vld [vmem:[%s1386_s1 + $0x8] sm:$0xff]   ;;  %v885_v2 = vld [vmem:[%s1386_s1 + $0x10] sm:$0xff]  }
   0x2   :  { %835 = vmatprep.subr.bf16.mxu0 %v883_v0  ;;  %867 = vmatprep.subr.bf16.mxu1 %v883_v0  ;;  %v886_v3 = vld [vmem:[%s1386_s1 + $0x18] sm:$0xff]   ;;  %v891_v4 = vld [vmem:[%s1387_s0] sm:$0xff]   ;;  %v888_v7 = vld [vmem:[%s1386_s1 + $0x28] sm:$0xff]  }
   0x3   :  { %836 = vmatpush3.bf16.msra.mxu0 %v883_v0  ;;  %875 = vmatpush3.bf16.msra.mxu1 %v883_v0  ;;  %v892_v5 = vld [vmem:[%s1387_s0 + $0x20] sm:$0xff]   ;;  %v889_v8 = vld [vmem:[%s1386_s1 + $0x30] sm:$0xff]   ;;  %v890_v9 = vld [vmem:[%s1386_s1 + $0x38] sm:$0xff]  }
   0x4   :  { %837 = vmatprep.subr.bf16.mxu0 %v884_v1  ;;  %868 = vmatprep.subr.bf16.mxu1 %v884_v1  ;;  %v887_v6 = vld [vmem:[%s1386_s1 + $0x20] sm:$0xff]   ;;  %v893_v10 = vld [vmem:[%s1387_s0 + $0x8] sm:$0xff]   ;;  %v895_v12 = vld [vmem:[%s1387_s0 + $0x10] sm:$0xff]  }
   0x5   :  { %851 = vmatprep.mubr.bf16.mxu0 %v891_v4  ;;  %859 = vmatprep.mubr.bf16.mxu1 %v892_v5  ;;  %v894_v11 = vld [vmem:[%s1387_s0 + $0x28] sm:$0xff]   ;;  %v896_v13 = vld [vmem:[%s1387_s0 + $0x30] sm:$0xff]   ;;  %v897_v14 = vld [vmem:[%s1387_s0 + $0x18] sm:$0xff]  }
   0x6   :  { %v898_v15 = vld [vmem:[%s1387_s0 + $0x38] sm:$0xff]   ;;  %v1034_v16 = vld [vmem:[%s1388_s2] ss:$0 sm:$0xff] }
   0x7   :  { %838 = vmatpush3.bf16.msra.mxu0 %v884_v1  ;;  %876 = vmatpush3.bf16.msra.mxu1 %v884_v1 }
   0x8   :  { %839 = vmatprep.subr.bf16.mxu0 %v885_v2  ;;  %869 = vmatprep.subr.bf16.mxu1 %v885_v2 }
   0xb   :  { %840 = vmatpush3.bf16.msra.mxu0 %v885_v2  ;;  %877 = vmatpush3.bf16.msra.mxu1 %v885_v2 }
   0xc   :  { %841 = vmatprep.subr.bf16.mxu0 %v886_v3  ;;  %870 = vmatprep.subr.bf16.mxu1 %v886_v3 }
   0xf   :  { %842 = vmatpush3.bf16.msra.mxu0 %v886_v3  ;;  %878 = vmatpush3.bf16.msra.mxu1 %v886_v3 }
  0x10   :  { %843 = vmatprep.subr.bf16.mxu0 %v887_v6  ;;  %871 = vmatprep.subr.bf16.mxu1 %v887_v6 }
  0x13   :  { %844 = vmatpush3.bf16.msra.mxu0 %v887_v6  ;;  %879 = vmatpush3.bf16.msra.mxu1 %v887_v6 }
  0x14   :  { %845 = vmatprep.subr.bf16.mxu0 %v888_v7  ;;  %872 = vmatprep.subr.bf16.mxu1 %v888_v7 }
  0x17   :  { %846 = vmatpush3.bf16.msra.mxu0 %v888_v7  ;;  %880 = vmatpush3.bf16.msra.mxu1 %v888_v7 }
  0x18   :  { %847 = vmatprep.subr.bf16.mxu0 %v889_v8  ;;  %873 = vmatprep.subr.bf16.mxu1 %v889_v8 }
  0x1b   :  { %848 = vmatpush3.bf16.msra.mxu0 %v889_v8  ;;  %881 = vmatpush3.bf16.msra.mxu1 %v889_v8 }
  0x1c   :  { %849 = vmatprep.subr.bf16.mxu0 %v890_v9  ;;  %874 = vmatprep.subr.bf16.mxu1 %v890_v9 }
  0x1f   :  { %850 = vmatpush3.bf16.msra.mxu0 %v890_v9  ;;  %882 = vmatpush3.bf16.msra.mxu1 %v890_v9 }
  0x22   :  { %852 = vmatmul.mubr.bf16.vlgmr.msra.gmra.mrb[0].mxu0 %v893_v10  ;;  %860 = vmatmul.mubr.bf16.vlgmr.msra.gmra.mrb[0].mxu1 %v894_v11 }
  0x23   :  { %855 = vmatprep.mubr.bf16.mxu0 %v895_v12  ;;  %863 = vmatprep.mubr.bf16.mxu1 %v896_v13 }
  0x2a   :  { %856 = vmatmul.mubr.bf16.gmra.mrb[4].mxu0 %v897_v14  ;;  %864 = vmatmul.mubr.bf16.gmra.mrb[4].mxu1 %v898_v15 }
  0xf5   :  { %v853_v17 = vpop.f32.mrb[0].mxu0  ;;  %v861_v18 = vpop.f32.mrb[0].mxu1 }
  0xf6   :  { %v336_v19 = vadd.f32 %v853_v17, %v1034_v16  ;;  %v344_v20 = vadd.f32 %v861_v18, %v1034_v16  ;;  %v213_v21 = vpop.f32.mrb[1].mxu0  ;;  %v245_v22 = vpop.f32.mrb[1].mxu1 }
  0xf7   :  { %v334_v23 = vadd.f32 %v1034_v16, %v213_v21  ;;  %v342_v24 = vadd.f32 %v1034_v16, %v245_v22  ;;  %v854_v25 = vpop.f32.mrb[2].mxu0  ;;  %v862_v26 = vpop.f32.mrb[2].mxu1 }
  0xf8   :  { %v1040_v27 = vmul.f32 0.70710677, %v336_v19  ;;  %v1042_v28 = vmul.f32 0.70710677, %v344_v20  ;;  %v216_v44 = vpop.f32.mrb[3].mxu0  ;;  %v248_v45 = vpop.f32.mrb[3].mxu1  ;;  %v337_v50 = vadd.f32 %v854_v25, %v1034_v16  ;;  %v1062_v55 = vadd.f32 %v862_v26, %v1034_v16 }
  0xf9   :  { %v1044_v29 = vmul.f32 0.70710677, %v334_v23  ;;  %v1046_v30 = vmul.f32 0.70710677, %v342_v24  ;;  %v1071_v61 = vadd.f32 %v1034_v16, %v216_v44  ;;  %v1077_v0 = vmul.f32 0.5, %v336_v19 }
  0xfa   :  { %v384_v31 = vand.u32 2147483647, %v1040_v27  ;;  %v392_v32 = vand.u32 2147483647, %v1042_v28  ;;  %v1068_v60 = vmul.f32 0.70710677, %v337_v50  ;;  %v1088_v6 = vadd.f32 %v1034_v16, %v248_v45 }
  0xfb   :  { %v382_v33 = vand.u32 2147483647, %v1044_v29  ;;  %v390_v34 = vand.u32 2147483647, %v1046_v30  ;;  %v1079_v1 = vmul.f32 0.5, %v344_v20  ;;  %v1081_v2 = vmul.f32 0.5, %v334_v23 }
  0xfc   :  { %v400_v35 = vmul.f32 0.3275911, %v384_v31  ;;  %v608_v36 = vsub.f32 0.0, %v384_v31  ;;  %v408_v37 = vmul.f32 0.3275911, %v392_v32  ;;  %v616_v38 = vsub.f32 0.0, %v392_v32 }
  0xfd   :  { %v398_v39 = vmul.f32 0.3275911, %v382_v33  ;;  %v606_v40 = vsub.f32 0.0, %v382_v33  ;;  %v406_v43 = vmul.f32 0.3275911, %v390_v34  ;;  %v1052_v46 = vpop.f32.mrb[4].mxu0 }
  0xfe   :  { %v416_v41 = vadd.f32 1.0, %v400_v35  ;;  %v424_v42 = vadd.f32 1.0, %v408_v37  ;;  %v1054_v47 = vpop.f32.mrb[4].mxu1  ;;  %v624_v48 = vmul.f32 %v608_v36, %v384_v31  ;;  %v1057_v51 = vpop.f32.mrb[5].mxu0  ;;  %v632_v53 = vmul.f32 %v616_v38, %v392_v32 }
  0xff   :  { %v414_v49 = vadd.f32 1.0, %v398_v39  ;;  %v1059_v52 = vpop.f32.mrb[5].mxu1  ;;  %v614_v54 = vsub.f32 0.0, %v390_v34  ;;  %v1064_v56 = vpop.f32.mrb[6].mxu0  ;;  %v622_v58 = vmul.f32 %v606_v40, %v382_v33  ;;  %v422_v59 = vadd.f32 1.0, %v406_v43 }
 0x100   :  { %899 = vrcp.f32 %v416_v41  ;;  %v1066_v57 = vpop.f32.mrb[6].mxu1  ;;  %v1073_v62 = vpop.f32.mrb[7].mxu0  ;;  %v1084_v3 = vmul.f32 0.70710677, %v1062_v55  ;;  %v642_v4 = vmul.f32 1.442695, %v624_v48  ;;  %v1111_v43 = vadd.f32 %v1052_v46, %v1034_v16 }
 0x101   :  { %901 = vrcp.f32 %v424_v42  ;;  %v1075_v63 = vpop.f32.mrb[7].mxu1  ;;  %v385_v5 = vand.u32 2147483647, %v1068_v60  ;;  %v658_v7 = vmul.f32 1.442695, %v632_v53  ;;  %v630_v8 = vmul.f32 %v614_v54, %v390_v34 }
 0x102   :  { %903 = vrcp.f32 %v414_v49  ;;  %v393_v9 = vand.u32 2147483647, %v1084_v3  ;;  %v1092_v10 = vmul.f32 0.70710677, %v1071_v61  ;;  %v638_v11 = vmul.f32 1.442695, %v622_v58 }
 0x103   :  { %905 = vrcp.f32 %v422_v59  ;;  %v401_v12 = vmul.f32 0.3275911, %v385_v5  ;;  %v609_v13 = vsub.f32 0.0, %v385_v5  ;;  %v1094_v14 = vmul.f32 0.5, %v342_v24 }
 0x104   :  { %v409_v15 = vmul.f32 0.3275911, %v393_v9  ;;  %v617_v17 = vsub.f32 0.0, %v393_v9  ;;  %v383_v18 = vand.u32 2147483647, %v1092_v10  ;;  %907 = vpow2.f32 %v642_v4 }
 0x105   :  { %v417_v19 = vadd.f32 1.0, %v401_v12  ;;  %v625_v20 = vmul.f32 %v609_v13, %v385_v5  ;;  %v1098_v21 = vmul.f32 0.70710677, %v1088_v6  ;;  %909 = vpow2.f32 %v658_v7 }
 0x106   :  { %v425_v22 = vadd.f32 1.0, %v409_v15  ;;  %v399_v23 = vmul.f32 0.3275911, %v383_v18  ;;  %v607_v25 = vsub.f32 0.0, %v383_v18  ;;  %v654_v31 = vmul.f32 1.442695, %v630_v8 }
 0x107   :  { %911 = vrcp.f32 %v417_v19  ;;  %v633_v24 = vmul.f32 %v617_v17, %v393_v9  ;;  %v391_v32 = vand.u32 2147483647, %v1098_v21  ;;  %v1106_v35 = vmul.f32 0.5, %v337_v50 }
 0x108   :  { %913 = vrcp.f32 %v425_v22  ;;  %v415_v36 = vadd.f32 1.0, %v399_v23  ;;  %v644_v38 = vmul.f32 1.442695, %v625_v20  ;;  %v623_v39 = vmul.f32 %v607_v25, %v383_v18 }
 0x109   :  { %v407_v40 = vmul.f32 0.3275911, %v391_v32  ;;  %915 = vpow2.f32 %v638_v11  ;;  %v615_v42 = vsub.f32 0.0, %v391_v32  ;;  %v660_v48 = vmul.f32 1.442695, %v633_v24 }
 0x10a   :  { %v1100_v26 = vpop.eup %899  ;;  %917 = vrcp.f32 %v415_v36  ;;  %v640_v54 = vmul.f32 1.442695, %v623_v39  ;;  %v1121_v46 = vmul.f32 0.70710677, %v1111_v43  ;;  %v1125_v12 = vmul.f32 0.5, %v1062_v55 }
 0x10b   :  { %v1103_v33 = vpop.eup %901  ;;  %v464_v34 = vmul.f32 1.0614054, %v1100_v26  ;;  %v423_v49 = vadd.f32 1.0, %v407_v40  ;;  %919 = vpow2.f32 %v654_v31  ;;  %v631_v4 = vmul.f32 %v615_v42, %v391_v32 }
 0x10c   :  { %v472_v37 = vmul.f32 1.0614054, %v1103_v33  ;;  %v1113_v44 = vpop.eup %903  ;;  %921 = vpow2.f32 %v644_v38  ;;  %v388_v13 = vand.u32 2147483647, %v1121_v46  ;;  %v1140_v40 = vadd.f32 %v1054_v47, %v1034_v16 }
 0x10d   :  { %v480_v41 = vadd.f32 -1.4531521, %v464_v34  ;;  %v462_v53 = vmul.f32 1.0614054, %v1113_v44  ;;  %v1117_v58 = vpop.eup %905  ;;  %923 = vrcp.f32 %v423_v49  ;;  %v656_v23 = vmul.f32 1.442695, %v631_v4 }
 0x10e   :  { %v488_v45 = vadd.f32 -1.4531521, %v472_v37  ;;  %v470_v8 = vmul.f32 1.0614054, %v1117_v58  ;;  %v908_v9 = vpop.eup %907  ;;  %925 = vpow2.f32 %v660_v48  ;;  %v404_v25 = vmul.f32 0.3275911, %v388_v13 }
 0x10f   :  { %v496_v50 = vmul.f32 %v1100_v26, %v480_v41  ;;  %v478_v7 = vadd.f32 -1.4531521, %v462_v53  ;;  %v910_v15 = vpop.eup %909  ;;  %927 = vpow2.f32 %v640_v54  ;;  %v612_v31 = vsub.f32 0.0, %v388_v13 }
 0x110   :  { %v504_v59 = vmul.f32 %v1103_v33, %v488_v45  ;;  %v486_v19 = vadd.f32 -1.4531521, %v470_v8  ;;  %v420_v39 = vadd.f32 1.0, %v404_v25  ;;  %929 = vpow2.f32 %v656_v23 }
 0x111   :  { %v512_v5 = vadd.f32 1.4214138, %v496_v50  ;;  %v494_v18 = vmul.f32 %v1113_v44, %v478_v7  ;;  %v1130_v20 = vpop.eup %911  ;;  %vm704_vm0 = vcmp.lt.f32.partialorder %v1040_v27, 0.0  ;;  %vm712_vm1 = vcmp.lt.f32.partialorder %v1042_v28, 0.0 }
 0x112   :  { %v520_v11 = vadd.f32 1.4214138, %v504_v59  ;;  %v1133_v24 = vpop.eup %913  ;;  %v502_v34 = vmul.f32 %v1117_v58, %v486_v19  ;;  %v465_v36 = vmul.f32 1.0614054, %v1130_v20  ;;  %v1147_v59 = vmul.f32 %v612_v31, %v388_v13 }
 0x113   :  { %v528_v17 = vmul.f32 %v1100_v26, %v512_v5  ;;  %v510_v32 = vadd.f32 1.4214138, %v494_v18  ;;  %v473_v38 = vmul.f32 1.0614054, %v1133_v24  ;;  %v916_v41 = vpop.eup %915  ;;  %931 = vrcp.f32 %v420_v39 }
 0x114   :  { %v536_v22 = vmul.f32 %v1103_v33, %v520_v11  ;;  %v518_v48 = vadd.f32 1.4214138, %v502_v34  ;;  %v481_v49 = vadd.f32 -1.4531521, %v465_v36  ;;  %v1144_v50 = vpop.eup %917  ;;  %vm702_vm2 = vcmp.lt.f32.partialorder %v1044_v29, 0.0 }
 0x115   :  { %v544_v55 = vadd.f32 -0.28449672, %v528_v17  ;;  %v526_v45 = vmul.f32 %v1113_v44, %v510_v32  ;;  %v489_v54 = vadd.f32 -1.4531521, %v473_v38  ;;  %v920_v4 = vpop.eup %919  ;;  %v463_v19 = vmul.f32 1.0614054, %v1144_v50 }
 0x116   :  { %v552_v37 = vadd.f32 -0.28449672, %v536_v22  ;;  %v534_v47 = vmul.f32 %v1117_v58, %v518_v48  ;;  %v497_v8 = vmul.f32 %v1130_v20, %v481_v49  ;;  %v1151_v11 = vpop.eup %921  ;;  %vm710_vm3 = vcmp.lt.f32.partialorder %v1046_v30, 0.0 }
 0x117   :  { %v560_v42 = vmul.f32 %v1100_v26, %v544_v55  ;;  %v542_v7 = vadd.f32 -0.28449672, %v526_v45  ;;  %v505_v18 = vmul.f32 %v1133_v24, %v489_v54  ;;  %v1156_v22 = vpop.eup %923  ;;  %v479_v36 = vadd.f32 -1.4531521, %v463_v19 }
 0x118   :  { %v568_v53 = vmul.f32 %v1103_v33, %v552_v37  ;;  %v550_v25 = vadd.f32 -0.28449672, %v534_v47  ;;  %v513_v31 = vadd.f32 1.4214138, %v497_v8  ;;  %v926_v55 = vpop.eup %925  ;;  %v471_v37 = vmul.f32 1.0614054, %v1156_v22 }
 0x119   :  { %v576_v5 = vadd.f32 0.2548296, %v560_v42  ;;  %v558_v23 = vmul.f32 %v1113_v44, %v542_v7  ;;  %v521_v34 = vadd.f32 1.4214138, %v505_v18  ;;  %v1163_v38 = vpop.eup %927  ;;  %vm705_vm4 = vcmp.lt.f32.partialorder %v1068_v60, 0.0 }
 0x11a   :  { %v584_v17 = vadd.f32 0.2548296, %v568_v53  ;;  %v566_v45 = vmul.f32 %v1117_v58, %v550_v25  ;;  %v495_v53 = vmul.f32 %v1144_v50, %v479_v36  ;;  %v1175_v25 = vpop.eup %929  ;;  %vm713_vm5 = vcmp.lt.f32.partialorder %v1084_v3, 0.0 }
 0x11b   :  { %v592_v13 = vmul.f32 %v1100_v26, %v576_v5  ;;  %v574_v42 = vadd.f32 0.2548296, %v558_v23  ;;  %v529_v26 = vmul.f32 %v1130_v20, %v513_v31  ;;  %v537_v49 = vmul.f32 %v1133_v24, %v521_v34 }
 0x11c   :  { %v600_v32 = vmul.f32 %v1103_v33, %v584_v17  ;;  %v487_v33 = vadd.f32 -1.4531521, %v471_v37  ;;  %v582_v7 = vadd.f32 0.2548296, %v566_v45  ;;  %v511_v17 = vadd.f32 1.4214138, %v495_v53 }
 0x11d   :  { %v672_v39 = vmul.f32 %v908_v9, %v592_v13  ;;  %v590_v5 = vmul.f32 %v1113_v44, %v574_v42  ;;  %v545_v47 = vadd.f32 -0.28449672, %v529_v26  ;;  %v553_v9 = vadd.f32 -0.28449672, %v537_v49  ;;  %v1181_v45 = vpop.eup %931 }
 0x11e   :  { %v680_v48 = vmul.f32 %v910_v15, %v600_v32  ;;  %v503_v18 = vmul.f32 %v1156_v22, %v487_v33  ;;  %v598_v13 = vmul.f32 %v1117_v58, %v582_v7  ;;  %v527_v32 = vmul.f32 %v1144_v50, %v511_v17 }
 0x11f   :  { %v688_v54 = vsub.f32 1.0, %v672_v39  ;;  %v670_v19 = vmul.f32 %v916_v41, %v590_v5  ;;  %v561_v23 = vmul.f32 %v1130_v20, %v545_v47  ;;  %v569_v44 = vmul.f32 %v1133_v24, %v553_v9 }
 0x120   :  { %v696_v8 = vsub.f32 1.0, %v680_v48  ;;  %v519_v34 = vadd.f32 1.4214138, %v503_v18  ;;  %v678_v39 = vmul.f32 %v920_v4, %v598_v13  ;;  %v543_v48 = vadd.f32 -0.28449672, %v527_v32 }
 0x121   :  { %v720_v15 = vsub.f32 0.0, %v688_v54  ;;  %v686_v37 = vsub.f32 1.0, %v670_v19  ;;  %v577_v42 = vadd.f32 0.2548296, %v561_v23  ;;  %v585_v26 = vadd.f32 0.2548296, %v569_v44 }
 0x122   :  { %v728_v31 = vsub.f32 0.0, %v696_v8  ;;  %v694_v33 = vsub.f32 1.0, %v678_v39  ;;  %v535_v28 = vmul.f32 %v1156_v22, %v519_v34  ;;  %v468_v18 = vmul.f32 1.0614054, %v1181_v45 }
 0x123   :  { %v736_v36 = vsel %vm704_vm0, %v720_v15, %v688_v54  ;;  %v718_v53 = vsub.f32 0.0, %v686_v37  ;;  %v593_v5 = vmul.f32 %v1130_v20, %v577_v42  ;;  %v601_v4 = vmul.f32 %v1133_v24, %v585_v26 }
 0x124   :  { %v752_v41 = vadd.f32 1.0, %v736_v36  ;;  %v744_v58 = vsel %vm712_vm1, %v728_v31, %v696_v8  ;;  %v559_v54 = vmul.f32 %v1144_v50, %v543_v48  ;;  %v726_v8 = vsub.f32 0.0, %v694_v33 }
 0x125   :  { %v760_v49 = vadd.f32 1.0, %v744_v58  ;;  %v734_v47 = vsel %vm702_vm2, %v718_v53, %v686_v37  ;;  %v673_v9 = vmul.f32 %v1151_v11, %v593_v5  ;;  %v551_v24 = vadd.f32 -0.28449672, %v535_v28 }
 0x126   :  { %v768_v27 = vmul.f32 %v752_v41, %v1077_v0  ;;  %v750_v20 = vadd.f32 1.0, %v734_v47  ;;  %v681_v0 = vmul.f32 %v926_v55, %v601_v4  ;;  %v575_v17 = vadd.f32 0.2548296, %v559_v54 }
 0x127   :  { %v776_v7 = vmul.f32 %v760_v49, %v1079_v1  ;;  %v742_v1 = vsel %vm710_vm3, %v726_v8, %v694_v33  ;;  %v689_v29 = vsub.f32 1.0, %v673_v9  ;;  %v1207_v11 = vadd.f32 %v1034_v16, %v1057_v51 }
 0x128   :  { %784 = vst [vmem:[%s1389_s3 + $0x10] sm:$0xff] %v768_v27  ;;  %v766_v15 = vmul.f32 %v750_v20, %v1081_v2  ;;  %v758_v19 = vadd.f32 1.0, %v742_v1  ;;  %v697_v55 = vsub.f32 1.0, %v681_v0  ;;  %v591_v13 = vmul.f32 %v1144_v50, %v575_v17 }
 0x129   :  { %792 = vst [vmem:[%s1389_s3 + $0x50] sm:$0xff] %v776_v7  ;;  %v721_v23 = vsub.f32 0.0, %v689_v29  ;;  %v567_v31 = vmul.f32 %v1156_v22, %v551_v24  ;;  %v484_v44 = vadd.f32 -1.4531521, %v468_v18  ;;  %v1213_v30 = vmul.f32 0.70710677, %v1140_v40 }
 0x12a   :  { %782 = vst [vmem:[%s1389_s3] sm:$0xff] %v766_v15  ;;  %v774_v51 = vmul.f32 %v758_v19, %v1094_v14  ;;  %v729_v32 = vsub.f32 0.0, %v697_v55  ;;  %v671_v2 = vmul.f32 %v1163_v38, %v591_v13  ;;  %v650_v34 = vmul.f32 1.442695, %v1147_v59 }
 0x12b   :  { %v737_v50 = vsel %vm705_vm4, %v721_v23, %v689_v29  ;;  %v583_v36 = vadd.f32 0.2548296, %v567_v31  ;;  %v500_v37 = vmul.f32 %v1181_v45, %v484_v44  ;;  %v396_v39 = vand.u32 2147483647, %v1213_v30 }
 0x12c   :  { %790 = vst [vmem:[%s1389_s3 + $0x40] sm:$0xff] %v774_v51  ;;  %v753_v42 = vadd.f32 1.0, %v737_v50  ;;  %v745_v14 = vsel %vm713_vm5, %v729_v32, %v697_v55  ;;  %v687_v41 = vsub.f32 1.0, %v671_v2  ;;  %vm703_vm6 = vcmp.lt.f32.partialorder %v1092_v10, 0.0 }
 0x12d   :  { %v761_v59 = vadd.f32 1.0, %v745_v14  ;;  %v599_v60 = vmul.f32 %v1156_v22, %v583_v36  ;;  %v516_v38 = vadd.f32 1.4214138, %v500_v37  ;;  %v412_v58 = vmul.f32 0.3275911, %v396_v39 }
 0x12e   :  { %v769_v26 = vmul.f32 %v753_v42, %v1106_v35  ;;  %v719_v48 = vsub.f32 0.0, %v687_v41  ;;  %933 = vpow2.f32 %v650_v34  ;;  %v1234_v49 = vmul.f32 0.70710677, %v1207_v11 }
 0x12f   :  { %v777_v53 = vmul.f32 %v761_v59, %v1125_v12  ;;  %v679_v3 = vmul.f32 %v1175_v25, %v599_v60  ;;  %v532_v33 = vmul.f32 %v1181_v45, %v516_v38  ;;  %v428_v5 = vadd.f32 1.0, %v412_v58 }
 0x130   :  { %785 = vst [vmem:[%s1389_s3 + $0x18] sm:$0xff] %v769_v26  ;;  %v351_v10 = vmul.f32 0.5, %v1071_v61  ;;  %v735_v22 = vsel %vm703_vm6, %v719_v48, %v687_v41  ;;  %v386_v35 = vand.u32 2147483647, %v1234_v49  ;;  %v1249_v54 = vadd.f32 %v1034_v16, %v1059_v52 }
 0x131   :  { %793 = vst [vmem:[%s1389_s3 + $0x58] sm:$0xff] %v777_v53  ;;  %v751_v27 = vadd.f32 1.0, %v735_v22  ;;  %v695_v12 = vsub.f32 1.0, %v679_v3  ;;  %v548_v4 = vadd.f32 -0.28449672, %v532_v33  ;;  %935 = vrcp.f32 %v428_v5 }
 0x132   :  { %v402_v25 = vmul.f32 0.3275911, %v386_v35  ;;  %v1254_v47 = vadd.f32 %v1064_v56, %v1034_v16  ;;  %vm711_vm7 = vcmp.lt.f32.partialorder %v1098_v21, 0.0  ;;  %v1261_v52 = vmul.f32 0.70710677, %v1249_v54 }
 0x133   :  { %v767_v28 = vmul.f32 %v751_v27, %v351_v10  ;;  %v727_v7 = vsub.f32 0.0, %v695_v12  ;;  %v564_v61 = vmul.f32 %v1181_v45, %v548_v4  ;;  %v359_v0 = vmul.f32 0.5, %v1088_v6 }
 0x134   :  { %v418_v8 = vadd.f32 1.0, %v402_v25  ;;  %v1265_v24 = vmul.f32 0.70710677, %v1254_v47  ;;  %v620_v21 = vsub.f32 0.0, %v396_v39  ;;  %v394_v1 = vand.u32 2147483647, %v1261_v52 }
 0x135   :  { %783 = vst [vmem:[%s1389_s3 + $0x8] sm:$0xff] %v767_v28  ;;  %v743_v9 = vsel %vm711_vm7, %v727_v7, %v695_v12  ;;  %v580_v20 = vadd.f32 0.2548296, %v564_v61  ;;  %v1271_v29 = vadd.f32 %v1066_v57, %v1034_v16  ;;  %v610_v6 = vsub.f32 0.0, %v386_v35 }
 0x136   :  { %v759_v17 = vadd.f32 1.0, %v743_v9  ;;  %937 = vrcp.f32 %v418_v8  ;;  %v389_v19 = vand.u32 2147483647, %v1265_v24  ;;  %v410_v13 = vmul.f32 0.3275911, %v394_v1 }
 0x137   :  { %v596_v56 = vmul.f32 %v1181_v45, %v580_v20  ;;  %v1278_v45 = vmul.f32 0.70710677, %v1271_v29  ;;  %v636_v57 = vmul.f32 %v620_v21, %v396_v39  ;;  %vm708_vm8 = vcmp.lt.f32.partialorder %v1121_v46, 0.0 }
 0x138   :  { %v934_v18 = vpop.eup %933  ;;  %v775_v15 = vmul.f32 %v759_v17, %v359_v0  ;;  %v405_v23 = vmul.f32 0.3275911, %v389_v19  ;;  %v426_v51 = vadd.f32 1.0, %v410_v13  ;;  %v626_v36 = vmul.f32 %v610_v6, %v386_v35 }
 0x139   :  { %v676_v55 = vmul.f32 %v934_v18, %v596_v56  ;;  %v397_v34 = vand.u32 2147483647, %v1278_v45  ;;  %v1287_v37 = vadd.f32 %v1034_v16, %v1073_v62  ;;  %v1291_v39 = vadd.f32 %v1034_v16, %v1075_v63 }
 0x13a   :  { %791 = vst [vmem:[%s1389_s3 + $0x48] sm:$0xff] %v775_v15  ;;  %v421_v2 = vadd.f32 1.0, %v405_v23  ;;  %939 = vrcp.f32 %v426_v51  ;;  %v666_v41 = vmul.f32 1.442695, %v636_v57  ;;  %v356_v60 = vmul.f32 0.5, %v1111_v43 }
 0x13b   :  { %v1280_v31 = vpop.eup %935  ;;  %v692_v44 = vsub.f32 1.0, %v676_v55  ;;  %v413_v14 = vmul.f32 0.3275911, %v397_v34  ;;  %v646_v48 = vmul.f32 1.442695, %v626_v36  ;;  %v618_v5 = vsub.f32 0.0, %v394_v1 }
 0x13c   :  { %v476_v32 = vmul.f32 1.0614054, %v1280_v31  ;;  %941 = vrcp.f32 %v421_v2  ;;  %v1299_v53 = vmul.f32 0.70710677, %v1287_v37  ;;  %v1302_v16 = vmul.f32 0.70710677, %v1291_v39 }
 0x13d   :  { %v724_v50 = vsub.f32 0.0, %v692_v44  ;;  %v429_v26 = vadd.f32 1.0, %v413_v14  ;;  %v613_v22 = vsub.f32 0.0, %v389_v19  ;;  %v621_v25 = vsub.f32 0.0, %v397_v34 }
 0x13e   :  { %v492_v42 = vadd.f32 -1.4531521, %v476_v32  ;;  %v387_v43 = vand.u32 2147483647, %v1299_v53  ;;  %v395_v35 = vand.u32 2147483647, %v1302_v16  ;;  %v634_v8 = vmul.f32 %v618_v5, %v394_v1 }
 0x13f   :  { %v740_v46 = vsel %vm708_vm8, %v724_v50, %v692_v44  ;;  %943 = vrcp.f32 %v429_v26  ;;  %v629_v56 = vmul.f32 %v613_v22, %v389_v19  ;;  %v637_v13 = vmul.f32 %v621_v25, %v397_v34 }
 0x140   :  { %v1293_v59 = vpop.eup %937  ;;  %v756_v38 = vadd.f32 1.0, %v740_v46  ;;  %v508_v58 = vmul.f32 %v1280_v31, %v492_v42  ;;  %945 = vpow2.f32 %v666_v41  ;;  %v403_v12 = vmul.f32 0.3275911, %v387_v43 }
 0x141   :  { %v466_v62 = vmul.f32 1.0614054, %v1293_v59  ;;  %v411_v28 = vmul.f32 0.3275911, %v395_v35  ;;  %947 = vpow2.f32 %v646_v48  ;;  %v662_v1 = vmul.f32 1.442695, %v634_v8 }
 0x142   :  { %v772_v3 = vmul.f32 %v756_v38, %v356_v60  ;;  %v524_v33 = vadd.f32 1.4214138, %v508_v58  ;;  %v419_v9 = vadd.f32 1.0, %v403_v12  ;;  %v652_v19 = vmul.f32 1.442695, %v629_v56 }
 0x143   :  { %v482_v63 = vadd.f32 -1.4531521, %v466_v62  ;;  %v427_v21 = vadd.f32 1.0, %v411_v28  ;;  %v611_v2 = vsub.f32 0.0, %v387_v43  ;;  %v364_v36 = vmul.f32 0.5, %v1140_v40 }
 0x144   :  { %788 = vst [vmem:[%s1389_s3 + $0x30] sm:$0xff] %v772_v3  ;;  %v540_v10 = vmul.f32 %v1280_v31, %v524_v33  ;;  %v1311_v7 = vpop.eup %939  ;;  %949 = vrcp.f32 %v419_v9  ;;  %v668_v60 = vmul.f32 1.442695, %v637_v13  ;;  %v619_v38 = vsub.f32 0.0, %v395_v35 }
 0x145   :  { %v498_v27 = vmul.f32 %v1293_v59, %v482_v63  ;;  %v474_v17 = vmul.f32 1.0614054, %v1311_v7  ;;  %951 = vrcp.f32 %v427_v21  ;;  %v627_v3 = vmul.f32 %v611_v2, %v387_v43 }
 0x146   :  { %v556_v4 = vadd.f32 -0.28449672, %v540_v10  ;;  %v1313_v20 = vpop.eup %941  ;;  %953 = vpow2.f32 %v662_v1  ;;  %v354_v33 = vmul.f32 0.5, %v1207_v11  ;;  %vm716_vm9 = vcmp.lt.f32.partialorder %v1213_v30, 0.0 }
 0x147   :  { %v514_v61 = vadd.f32 1.4214138, %v498_v27  ;;  %v469_v15 = vmul.f32 1.0614054, %v1313_v20  ;;  %v490_v6 = vadd.f32 -1.4531521, %v474_v17  ;;  %955 = vpow2.f32 %v652_v19 }
 0x148   :  { %v572_v0 = vmul.f32 %v1280_v31, %v556_v4  ;;  %957 = vpow2.f32 %v668_v60  ;;  %v635_v43 = vmul.f32 %v619_v38, %v395_v35  ;;  %v648_v9 = vmul.f32 1.442695, %v627_v3 }
 0x149   :  { %v530_v18 = vmul.f32 %v1293_v59, %v514_v61  ;;  %v485_v44 = vadd.f32 -1.4531521, %v469_v15  ;;  %v1319_v57 = vpop.eup %943  ;;  %v506_v32 = vmul.f32 %v1311_v7, %v490_v6  ;;  %vm706_vm10 = vcmp.lt.f32.partialorder %v1234_v49, 0.0 }
 0x14a   :  { %v588_v55 = vadd.f32 0.2548296, %v572_v0  ;;  %v946_v50 = vpop.eup %945  ;;  %v477_v34 = vmul.f32 1.0614054, %v1319_v57  ;;  %959 = vpow2.f32 %v648_v9  ;;  %vm714_vm11 = vcmp.lt.f32.partialorder %v1261_v52, 0.0 }
 0x14b   :  { %v546_v23 = vadd.f32 -0.28449672, %v530_v18  ;;  %v501_v14 = vmul.f32 %v1313_v20, %v485_v44  ;;  %v522_v41 = vadd.f32 1.4214138, %v506_v32  ;;  %v948_v40 = vpop.eup %947  ;;  %vm709_vm12 = vcmp.lt.f32.partialorder %v1265_v24, 0.0 }
 0x14c   :  { %v604_v51 = vmul.f32 %v1280_v31, %v588_v55  ;;  %v493_v26 = vadd.f32 -1.4531521, %v477_v34  ;;  %vm717_vm13 = vcmp.lt.f32.partialorder %v1278_v45, 0.0  ;;  %vm707_vm14 = vcmp.lt.f32.partialorder %v1299_v53, 0.0 }
 0x14d   :  { %v562_v42 = vmul.f32 %v1293_v59, %v546_v23  ;;  %v517_v31 = vadd.f32 1.4214138, %v501_v14  ;;  %v538_v48 = vmul.f32 %v1311_v7, %v522_v41  ;;  %vm715_vm15 = vcmp.lt.f32.partialorder %v1302_v16, 0.0 }
 0x14e   :  { %v684_v46 = vmul.f32 %v946_v50, %v604_v51  ;;  %v509_v10 = vmul.f32 %v1319_v57, %v493_v26  ;;  %v1333_v12 = vpop.eup %949  ;;  %v664_v50 = vmul.f32 1.442695, %v635_v43 }
 0x14f   :  { %v578_v58 = vadd.f32 0.2548296, %v562_v42  ;;  %v533_v5 = vmul.f32 %v1313_v20, %v517_v31  ;;  %v554_v27 = vadd.f32 -0.28449672, %v538_v48  ;;  %v1335_v61 = vpop.eup %951  ;;  %v467_v8 = vmul.f32 1.0614054, %v1333_v12 }
 0x150   :  { %v700_v62 = vsub.f32 1.0, %v684_v46  ;;  %v525_v28 = vadd.f32 1.4214138, %v509_v10  ;;  %v475_v15 = vmul.f32 1.0614054, %v1335_v61  ;;  %v954_v51 = vpop.eup %953  ;;  %961 = vpow2.f32 %v664_v50 }
 0x151   :  { %v594_v63 = vmul.f32 %v1293_v59, %v578_v58  ;;  %v549_v25 = vadd.f32 -0.28449672, %v533_v5  ;;  %v570_v59 = vmul.f32 %v1311_v7, %v554_v27  ;;  %v483_v18 = vadd.f32 -1.4531521, %v467_v8 }
 0x152   :  { %v732_v22 = vsub.f32 0.0, %v700_v62  ;;  %v541_v56 = vmul.f32 %v1319_v57, %v525_v28  ;;  %v491_v44 = vadd.f32 -1.4531521, %v475_v15 }
 0x153   :  { %v674_v4 = vmul.f32 %v948_v40, %v594_v63  ;;  %v565_v30 = vmul.f32 %v1313_v20, %v549_v25  ;;  %v586_v21 = vadd.f32 0.2548296, %v570_v59  ;;  %v499_v1 = vmul.f32 %v1333_v12, %v483_v18 }
 0x154   :  { %v748_v11 = vsel %vm716_vm9, %v732_v22, %v700_v62  ;;  %v557_v13 = vadd.f32 -0.28449672, %v541_v56  ;;  %v357_v25 = vmul.f32 0.5, %v1254_v47  ;;  %v365_v47 = vmul.f32 0.5, %v1271_v29 }
 0x155   :  { %v764_v0 = vadd.f32 1.0, %v748_v11  ;;  %v690_v17 = vsub.f32 1.0, %v674_v4  ;;  %v581_v6 = vadd.f32 0.2548296, %v565_v30  ;;  %v602_v23 = vmul.f32 %v1311_v7, %v586_v21 }
 0x156   :  { %v573_v2 = vmul.f32 %v1319_v57, %v557_v13  ;;  %v515_v49 = vadd.f32 1.4214138, %v499_v1  ;;  %v507_v7 = vmul.f32 %v1335_v61, %v491_v44  ;;  %v355_v29 = vmul.f32 0.5, %v1287_v37 }
 0x157   :  { %v780_v55 = vmul.f32 %v764_v0, %v364_v36  ;;  %v722_v35 = vsub.f32 0.0, %v690_v17  ;;  %v597_v19 = vmul.f32 %v1313_v20, %v581_v6  ;;  %v956_v36 = vpop.eup %955  ;;  %v682_v14 = vmul.f32 %v954_v51, %v602_v23 }
 0x158   :  { %v589_v46 = vadd.f32 0.2548296, %v573_v2  ;;  %v958_v41 = vpop.eup %957  ;;  %v531_v58 = vmul.f32 %v1333_v12, %v515_v49  ;;  %v523_v31 = vadd.f32 1.4214138, %v507_v7  ;;  %v363_v1 = vmul.f32 0.5, %v1291_v39 }
 0x159   :  { %796 = vst [vmem:[%s1389_s3 + $0x70] sm:$0xff] %v780_v55  ;;  %v738_v32 = vsel %vm706_vm10, %v722_v35, %v690_v17  ;;  %v677_v34 = vmul.f32 %v956_v36, %v597_v19  ;;  %v698_v38 = vsub.f32 1.0, %v682_v14  ;;  %v960_v0 = vpop.eup %959 }
 0x15a   :  { %v754_v42 = vadd.f32 1.0, %v738_v32  ;;  %v605_v20 = vmul.f32 %v1319_v57, %v589_v46  ;;  %v547_v48 = vadd.f32 -0.28449672, %v531_v58  ;;  %v539_v3 = vmul.f32 %v1335_v61, %v523_v31  ;;  %v962_v45 = vpop.eup %961 }
 0x15b   :  { %v693_v26 = vsub.f32 1.0, %v677_v34  ;;  %v730_v62 = vsub.f32 0.0, %v698_v38  ;;  %v362_v57 = vmul.f32 0.5, %v1249_v54 }
 0x15c   :  { %v770_v60 = vmul.f32 %v754_v42, %v354_v33  ;;  %v685_v33 = vmul.f32 %v958_v41, %v605_v20  ;;  %v563_v5 = vmul.f32 %v1333_v12, %v547_v48  ;;  %v555_v10 = vadd.f32 -0.28449672, %v539_v3 }
 0x15d   :  { %v725_v40 = vsub.f32 0.0, %v693_v26  ;;  %v746_v63 = vsel %vm714_vm11, %v730_v62, %v698_v38 }
 0x15e   :  { %786 = vst [vmem:[%s1389_s3 + $0x20] sm:$0xff] %v770_v60  ;;  %v762_v22 = vadd.f32 1.0, %v746_v63  ;;  %v701_v4 = vsub.f32 1.0, %v685_v33  ;;  %v579_v43 = vadd.f32 0.2548296, %v563_v5  ;;  %v571_v11 = vmul.f32 %v1335_v61, %v555_v10 }
 0x15f   :  { %v741_v27 = vsel %vm709_vm12, %v725_v40, %v693_v26 }
 0x160   :  { %v757_v28 = vadd.f32 1.0, %v741_v27  ;;  %v778_v52 = vmul.f32 %v762_v22, %v362_v57  ;;  %v733_v59 = vsub.f32 0.0, %v701_v4  ;;  %v595_v24 = vmul.f32 %v1333_v12, %v579_v43 }
 0x161   :  { %v587_v9 = vadd.f32 0.2548296, %v571_v11 }
 0x162   :  { %v773_v8 = vmul.f32 %v757_v28, %v357_v25  ;;  %794 = vst [vmem:[%s1389_s3 + $0x60] sm:$0xff] %v778_v52  ;;  %v749_v54 = vsel %vm717_vm13, %v733_v59, %v701_v4  ;;  %v675_v30 = vmul.f32 %v960_v0, %v595_v24 }
 0x163   :  { %v765_v17 = vadd.f32 1.0, %v749_v54  ;;  %v603_v56 = vmul.f32 %v1335_v61, %v587_v9 }
 0x164   :  { %789 = vst [vmem:[%s1389_s3 + $0x38] sm:$0xff] %v773_v8  ;;  %v691_v12 = vsub.f32 1.0, %v675_v30 }
 0x165   :  { %v781_v21 = vmul.f32 %v765_v17, %v365_v47  ;;  %v683_v18 = vmul.f32 %v962_v45, %v603_v56 }
 0x166   :  { %v723_v15 = vsub.f32 0.0, %v691_v12 }
 0x167   :  { %797 = vst [vmem:[%s1389_s3 + $0x78] sm:$0xff] %v781_v21  ;;  %v699_v55 = vsub.f32 1.0, %v683_v18 }
 0x168   :  { %v739_v35 = vsel %vm707_vm14, %v723_v15, %v691_v12 }
 0x169   :  { %v731_v6 = vsub.f32 0.0, %v699_v55  ;;  %v755_v13 = vadd.f32 1.0, %v739_v35 }
 0x16b   :  { %v747_v61 = vsel %vm715_vm15, %v731_v6, %v699_v55  ;;  %v771_v23 = vmul.f32 %v755_v13, %v355_v29 }
 0x16c   :  { %v763_v44 = vadd.f32 1.0, %v747_v61 }
 0x16d   :  { %787 = vst [vmem:[%s1389_s3 + $0x28] sm:$0xff] %v771_v23 }
 0x16e   :  { %v779_v51 = vmul.f32 %v763_v44, %v363_v1 }
 0x170   :  { %795 = vst [vmem:[%s1389_s3 + $0x68] sm:$0xff] %v779_v51 }

// kernel: _lambda_.38
= control target key start
LH: loop header
LB: loop body
LE: loop exit
PB: predicated region body
PF: predicated region fallthrough
CT: control target
= control target key end

     0   :  { %s1837_s15 = smov 0   ;;  %s2156_s0 = inlined_call_operand.vmem [shape: bf16[8,16,32], index: 0, kind: input, shape index: {}]   ;;  %s2157_s1 = inlined_call_operand.vmem [shape: bf16[8,16,32], index: 1, kind: input, shape index: {}]   ;;  %s2158_s2 = inlined_call_operand.vmem [shape: bf16[8,16,32], index: 2, kind: input, shape index: {}]   ;;  %s2159_s3 = inlined_call_operand.vmem [shape: f32[4,2,16,16], index: 3, kind: input, shape index: {}]   ;;  %s2160_s4 = inlined_call_operand.vmem [shape: bf16[8,16,32], index: 4, kind: output, shape index: {}]  }
   0x1 LB: > { %s1497_s16 = sadd.s32 4294967295, %s1806_s15   ;;  %p1501_p0 = scmp.ge.s32.totalorder %s1806_s15, 1  ;;  %s1806_s15 = sphi %s1837_s15, %s14_s15  }
   0x2   : > { %p188_p1 = scmp.lt.s32.totalorder %s1806_s15, 3 }
   0x4   : > { %p189_p2 = pnand %p1501_p0, %p188_p1 }
   0x5   : > { %s1502_s17 = sshll.u32 (!%p189_p2), %s1497_s16, 2  ;;  %v1808_v0 = vmov (!%p189_p2), 0.0   ;;  %vm1809_vm0 = vmmov (!%p189_p2), 0   ;;  %vm307_vm1 = vcmask (!%p189_p2), 130048   ;;  %v281_v14 = vld [vmem:[%s2159_s3] sm:$0xff] (!%p189_p2)  ;;  %v282_v22 = vld [vmem:[%s2159_s3 + $0x8] sm:$0xff] (!%p189_p2) }
   0x6   : > { %192 = sbr.rel (%p189_p2) target bundleno = 1568 (0x620), region = 36  ;;  %1596 = vmatprep.subr.bf16.mxu0 (!%p189_p2), %v1808_v0  ;;  %1602 = vmatprep.subr.bf16.mxu1 (!%p189_p2), %v1808_v0  ;;  %p229_p3 = scmp.lt.s32.totalorder (!%p189_p2), %s1502_s17, 7  ;;  %v285_v18 = vld [vmem:[%s2159_s3 + $0x20] sm:$0xff] (!%p189_p2)  ;;  %v286_v27 = vld [vmem:[%s2159_s3 + $0x28] sm:$0xff] (!%p189_p2)  ;;  %vm1406_vm2 = vcmask (!%p189_p2), 257024  }
   0x7   : > { %1598 = vmatprep.mubr.msk.bf16.mxu0 (!%p189_p2), %vm1809_vm0, %v1808_v0  ;;  %1604 = vmatprep.mubr.msk.bf16.mxu1 (!%p189_p2), %vm1809_vm0, %v1808_v0  ;;  %v289_v37 = vld [vmem:[%s2159_s3 + $0x40] sm:$0xff] (!%p189_p2)  ;;  %v290_v46 = vld [vmem:[%s2159_s3 + $0x48] sm:$0xff] (!%p189_p2)  ;;  %s1810_s16 = smov (!%p189_p2), 112   ;;  %s1811_s11 = smov (!%p189_p2), 16  }
   0x8   : > { %v293_v42 = vld [vmem:[%s2159_s3 + $0x60] sm:$0xff] (!%p189_p2)  ;;  %v294_v50 = vld [vmem:[%s2159_s3 + $0x68] sm:$0xff] (!%p189_p2) }
   0xd   : > { %s2162_s17 = smov (!%p229_p3, %s1502_s17), 7 }
   0xe   : > { %s1851_s18 = sshll.u32 %s2162_s17, 3 }
   0xf   : > { %s240_s21 = scalar_lea.vmem %s2157_s1, %s1851_s18  ;;  %s233_s24 = scalar_lea.vmem %s2156_s0, %s1851_s18 }
  0x10   : > { %v1857_v1 = vld [vmem:[%s240_s21] sm:$0xff]   ;;  %v1859_v2 = vld [vmem:[%s240_s21 + $0x8] sm:$0xff]   ;;  %v1870_v5 = vld [vmem:[%s240_s21 + $0x10] sm:$0xff]   ;;  %s1964_s20 = scalar_lea.vmem %s2158_s2, %s1851_s18  ;;  %s254_s14 = scalar_lea.vmem %s2160_s4, %s1851_s18 }
  0x11   : > { %v312_v3 = vsel %vm307_vm1, %v1857_v1, 0  ;;  %v369_v4 = vsel %vm307_vm1, %v1859_v2, 0  ;;  %v1873_v6 = vld [vmem:[%s240_s21 + $0x18] sm:$0xff]   ;;  %v1875_v7 = vld [vmem:[%s233_s24] sm:$0xff]   ;;  %v1877_v8 = vld [vmem:[%s233_s24 + $0x8] sm:$0xff]   ;;  %v426_v9 = vsel %vm307_vm1, %v1870_v5, 0 }
  0x12   : > { %1597 = vmatpush3.bf16.xpose.msra.mxu0 %v312_v3  ;;  %1603 = vmatpush3.bf16.xpose.msra.mxu1 %v369_v4  ;;  %v483_v10 = vsel %vm307_vm1, %v1873_v6, 0  ;;  %v1892_v11 = vld [vmem:[%s233_s24 + $0x10] sm:$0xff]   ;;  %v1895_v12 = vld [vmem:[%s233_s24 + $0x18] sm:$0xff]  }
  0x13   : > { %1608 = vmatprep.subr.bf16.mxu0 %v1808_v0  ;;  %1614 = vmatprep.subr.bf16.mxu1 %v1808_v0 }
  0x19   : > { %1599 = vmatmul.mubr.msk.bf16.vlgmr.msra.gmra.mrb[0].mxu0 %vm307_vm1, %v1875_v7  ;;  %1605 = vmatmul.mubr.msk.bf16.vlgmr.msra.gmra.mrb[0].mxu1 %vm307_vm1, %v1877_v8 }
  0x1a   : > { %1609 = vmatpush3.bf16.xpose.msra.mxu0 %v426_v9  ;;  %1615 = vmatpush3.bf16.xpose.msra.mxu1 %v483_v10 }
  0x1b   : > { %1610 = vmatprep.mubr.msk.bf16.mxu0 %vm1809_vm0, %v1808_v0  ;;  %1616 = vmatprep.mubr.msk.bf16.mxu1 %vm1809_vm0, %v1808_v0 }
  0x1c   : > { %1620 = vmatprep.subr.bf16.mxu0 %v1808_v0  ;;  %1626 = vmatprep.subr.bf16.mxu1 %v1808_v0 }
  0x21   : > { %1611 = vmatmul.mubr.msk.bf16.vlgmr.msra.gmra.mrb[4].mxu0 %vm307_vm1, %v1892_v11  ;;  %1617 = vmatmul.mubr.msk.bf16.vlgmr.msra.gmra.mrb[4].mxu1 %vm307_vm1, %v1895_v12 }
  0x22   : > { %1622 = vmatprep.mubr.msk.bf16.mxu0 %vm1809_vm0, %v1808_v0  ;;  %1628 = vmatprep.mubr.msk.bf16.mxu1 %vm1809_vm0, %v1808_v0 }
  0xec   : > { %v348_v13 = vpop.f32.mrb[0].mxu0  ;;  %v405_v16 = vpop.f32.mrb[0].mxu1 }
  0xed   : > { %v526_v15 = vmul.f32 0.25, %v348_v13  ;;  %v1600_v17 = vpop.f32.mrb[1].mxu0  ;;  %v528_v19 = vmul.f32 0.25, %v405_v16  ;;  %v1606_v21 = vpop.f32.mrb[1].mxu1 }
  0xee   : > { %v351_v20 = vpop.f32.mrb[2].mxu0  ;;  %v408_v25 = vpop.f32.mrb[2].mxu1 }
  0xef   : > { %v527_v23 = vmul.f32 0.25, %v351_v20  ;;  %v1601_v24 = vpop.f32.mrb[3].mxu0  ;;  %v534_v26 = vadd.f32 %v526_v15, %v281_v14  ;;  %v529_v28 = vmul.f32 0.25, %v408_v25  ;;  %v1607_v29 = vpop.f32.mrb[3].mxu1  ;;  %v536_v30 = vadd.f32 %v528_v19, %v285_v18 }
  0xf1   : > { %v542_v31 = vsel %vm307_vm1, %v534_v26, -inf  ;;  %v535_v32 = vadd.f32 %v527_v23, %v282_v22  ;;  %v548_v33 = vsel %vm307_vm1, %v536_v30, -inf  ;;  %v537_v34 = vadd.f32 %v529_v28, %v286_v27 }
  0xf2   : > { %543 = vmax.xlane.f32.xlu0 %v542_v31  ;;  %549 = vmax.xlane.f32.xlu1 %v548_v33 }
  0xf3   : > { %v551_v36 = vsel %vm307_vm1, %v537_v34, -inf  ;;  %v545_v40 = vsel %vm307_vm1, %v535_v32, -inf }
  0xf4   : > { %v462_v35 = vpop.f32.mrb[4].mxu0  ;;  %v519_v41 = vpop.f32.mrb[4].mxu1 }
  0xf5   : > { %v530_v38 = vmul.f32 0.25, %v462_v35  ;;  %v1612_v39 = vpop.f32.mrb[5].mxu0  ;;  %v532_v44 = vmul.f32 0.25, %v519_v41  ;;  %v1618_v45 = vpop.f32.mrb[5].mxu1 }
  0xf6   : > { %546 = vmax.xlane.f32.xlu0 %v545_v40  ;;  %v465_v43 = vpop.f32.mrb[6].mxu0  ;;  %552 = vmax.xlane.f32.xlu1 %v551_v36  ;;  %v522_v48 = vpop.f32.mrb[6].mxu1  ;;  %v1969_v36 = vld [vmem:[%s1964_s20] sm:$0xff]  }
  0xf7   : > { %v531_v47 = vmul.f32 0.25, %v465_v43  ;;  %v538_v49 = vadd.f32 %v530_v38, %v289_v37  ;;  %v1613_v51 = vpop.f32.mrb[7].mxu0  ;;  %v533_v52 = vmul.f32 0.25, %v522_v48  ;;  %v540_v53 = vadd.f32 %v532_v44, %v293_v42  ;;  %v1619_v54 = vpop.f32.mrb[7].mxu1  ;;  %1621 = vmatpush3.bf16.msra.mxu0 %v1969_v36  ;;  %v1974_v37 = vld [vmem:[%s1964_s20 + $0x8] sm:$0xff]  }
  0xf8   : > { %1632 = vmatprep.subr.bf16.mxu0 %v1808_v0  ;;  %1627 = vmatpush3.bf16.msra.mxu1 %v1974_v37  ;;  %v1995_v51 = vld [vmem:[%s1964_s20 + $0x10] sm:$0xff]   ;;  %v2001_v54 = vld [vmem:[%s1964_s20 + $0x18] sm:$0xff]  }
  0xf9   : > { %v554_v55 = vsel %vm307_vm1, %v538_v49, -inf  ;;  %v1934_v56 = vadd.f32 %v531_v47, %v290_v46  ;;  %v1936_v57 = vadd.f32 %v533_v52, %v294_v50  ;;  %v560_v59 = vsel %vm307_vm1, %v540_v53, -inf  ;;  %1638 = vmatprep.subr.bf16.mxu1 %v1808_v0 }
  0xfa   : > { %555 = vmax.xlane.f32.xlu0 %v554_v55 }
  0xfb   : > { %v557_v58 = vsel %vm307_vm1, %v1934_v56, -inf  ;;  %v563_v60 = vsel %vm307_vm1, %v1936_v57, -inf }
  0xfc   : > { %558 = vmax.xlane.f32.xlu1 %v557_v58 }
  0xfe   : > { %561 = vmax.xlane.f32.xlu0 %v560_v59 }
 0x100   : > { %564 = vmax.xlane.f32.xlu1 %v563_v60 }
 0x17f   : > { %v544_v61 = vpop.xlane.xlu0 %543  ;;  %v550_v62 = vpop.xlane.xlu1 %549 }
 0x180   : > { %v566_v63 = vsub.f32 %v534_v26, %v544_v61  ;;  %v568_v3 = vsub.f32 %v536_v30, %v550_v62 }
 0x182   : > { %v574_v4 = vmul.f32 1.442695, %v566_v63  ;;  %v578_v9 = vmul.f32 1.442695, %v568_v3 }
 0x183   : > { %v547_v10 = vpop.xlane.xlu0 %546  ;;  %v553_v13 = vpop.xlane.xlu1 %552 }
 0x184   : > { %1736 = vpow2.f32 %v574_v4  ;;  %v567_v14 = vsub.f32 %v535_v32, %v547_v10  ;;  %v569_v15 = vsub.f32 %v537_v34, %v553_v13 }
 0x185   : > { %1738 = vpow2.f32 %v578_v9 }
 0x186   : > { %v576_v16 = vmul.f32 1.442695, %v567_v14  ;;  %v580_v17 = vmul.f32 1.442695, %v569_v15 }
 0x187   : > { %v556_v18 = vpop.xlane.xlu0 %555 }
 0x188   : > { %1740 = vpow2.f32 %v576_v16  ;;  %v570_v19 = vsub.f32 %v538_v49, %v556_v18 }
 0x189   : > { %1742 = vpow2.f32 %v580_v17 }
 0x18a   : > { %v582_v20 = vmul.f32 1.442695, %v570_v19 }
 0x18b   : > { %v562_v21 = vpop.xlane.xlu0 %561 }
 0x18c   : > { %1744 = vpow2.f32 %v582_v20  ;;  %v572_v22 = vsub.f32 %v540_v53, %v562_v21 }
 0x18e   : > { %v1737_v23 = vpop.eup %1736  ;;  %v586_v24 = vmul.f32 1.442695, %v572_v22 }
 0x18f   : > { %v590_v25 = vsel %vm307_vm1, %v1737_v23, 0.0  ;;  %v1944_v26 = vpop.eup %1738 }
 0x190   : > { %1746 = vpow2.f32 %v586_v24  ;;  %591 = vadd.xlane.f32.xlu0 %v590_v25  ;;  %v596_v28 = vsel %vm307_vm1, %v1944_v26, 0.0 }
 0x192   : > { %v1741_v27 = vpop.eup %1740 }
 0x193   : > { %v593_v29 = vsel %vm307_vm1, %v1741_v27, 0.0  ;;  %v1743_v30 = vpop.eup %1742 }
 0x194   : > { %597 = vadd.xlane.f32.xlu0 %v596_v28  ;;  %594 = vadd.xlane.f32.xlu1 %v593_v29  ;;  %v599_v33 = vsel %vm307_vm1, %v1743_v30, 0.0 }
 0x196   : > { %v1949_v31 = vpop.eup %1744 }
 0x197   : > { %v602_v32 = vsel %vm307_vm1, %v1949_v31, 0.0 }
 0x198   : > { %603 = vadd.xlane.f32.xlu0 %v602_v32  ;;  %600 = vadd.xlane.f32.xlu1 %v599_v33 }
 0x19a   : > { %v1954_v34 = vpop.eup %1746 }
 0x19b   : > { %v608_v35 = vsel %vm307_vm1, %v1954_v34, 0.0 }
 0x19c   : > { %609 = vadd.xlane.f32.xlu0 %v608_v35 }
 0x1a9   : > { %887 = vrot.lane.b32.xlu1 %v1859_v2, %s1810_s16  ;;  %v559_v2 = vpop.xlane.xlu1 %558 }
 0x1ad   : > { %834 = vrot.lane.b32.xlu1 %v1875_v7, %s1810_s16  ;;  %v571_v7 = vsub.f32 %v1934_v56, %v559_v2  ;;  %v565_v38 = vpop.xlane.xlu1 %564 }
 0x1ae   : > { %v573_v40 = vsub.f32 %v1936_v57, %v565_v38 }
 0x1af   : > { %v584_v39 = vmul.f32 1.442695, %v571_v7 }
 0x1b0   : > { %v588_v41 = vmul.f32 1.442695, %v573_v40 }
 0x1b1   : > { %1748 = vpow2.f32 %v584_v39 }
 0x1b2   : > { %836 = vrot.lane.b32.xlu0 %v1857_v1, %s1810_s16  ;;  %1750 = vpow2.f32 %v588_v41 }
 0x1b6   : > { %885 = vrot.lane.b32.xlu0 %v1877_v8, %s1810_s16 }
 0x1ba   : > { %936 = vrot.lane.b32.xlu0 %v1892_v11, %s1810_s16 }
 0x1bb   : > { %v1749_v1 = vpop.eup %1748 }
 0x1bc   : > { %v605_v42 = vsel %vm307_vm1, %v1749_v1, 0.0  ;;  %v1751_v43 = vpop.eup %1750 }
 0x1bd   : > { %v611_v44 = vsel %vm307_vm1, %v1751_v43, 0.0 }
 0x1d1   : > { %606 = vadd.xlane.f32.xlu1 %v605_v42 }
 0x1d5   : > { %612 = vadd.xlane.f32.xlu1 %v611_v44 }
 0x1e6   : > { %938 = vrot.lane.b32.xlu1 %v1870_v5, %s1810_s16 }
 0x1ea   : > { %989 = vrot.lane.b32.xlu1 %v1873_v6, %s1810_s16 }
 0x1ee   : > { %987 = vrot.lane.b32.xlu1 %v1895_v12, %s1810_s16 }
 0x21d   : > { %v592_v8 = vpop.xlane.xlu0 %591 }
 0x21e   : > { %1752 = vrcp.f32 %v592_v8 }
 0x221   : > { %v595_v11 = vpop.xlane.xlu1 %594  ;;  %v598_v45 = vpop.xlane.xlu0 %597 }
 0x222   : > { %1754 = vrcp.f32 %v595_v11 }
 0x223   : > { %1756 = vrcp.f32 %v598_v45  ;;  %v284_v45 = vld [vmem:[%s2159_s3 + $0x18] sm:$0xff] }
 0x225   : > { %v601_v46 = vpop.xlane.xlu1 %600  ;;  %v604_v57 = vpop.xlane.xlu0 %603 }
 0x226   : > { %1758 = vrcp.f32 %v601_v46 }
 0x227   : > { %1760 = vrcp.f32 %v604_v57 }
 0x228   : > { %v1753_v47 = vpop.eup %1752 }
 0x229   : > { %v622_v49 = vmul.f32 %v1753_v47, %v1737_v23  ;;  %v888_v56 = vpop.permute.xlu1 %887  ;;  %v610_v59 = vpop.xlane.xlu0 %609 }
 0x22a   : > { %v893_v20 = vsel %vm307_vm1, %v888_v56, 0 }
 0x22c   : > { %v1755_v48 = vpop.eup %1754 }
 0x22d   : > { %v623_v5 = vmul.f32 %v1755_v48, %v1741_v27  ;;  %v1757_v50 = vpop.eup %1756  ;;  %v835_v58 = vpop.permute.xlu1 %834 }
 0x22e   : > { %v624_v12 = vmul.f32 %v1757_v50, %v1944_v26  ;;  %v837_v3 = vpop.permute.xlu0 %836 }
 0x22f   : > { %v630_v6 = vpack.c.bf16 %v623_v5, %v622_v49  ;;  %v842_v13 = vsel %vm307_vm1, %v837_v3, 0  ;;  %v287_v5 = vld [vmem:[%s2159_s3 + $0x30] sm:$0xff] }
 0x230   : > { %v1759_v52 = vpop.eup %1758 }
 0x231   : > { %v625_v53 = vmul.f32 %v1759_v52, %v1743_v30  ;;  %1623 = vmatmul.mubr.msk.bf16.vlgmr.msra.gmra.mrb[8].mxu0 %vm307_vm1, %v630_v6  ;;  %v1761_v62 = vpop.eup %1760 }
 0x232   : > { %1633 = vmatpush3.bf16.msra.mxu0 %v1995_v51  ;;  %1634 = vmatprep.mubr.msk.bf16.mxu0 %vm1809_vm0, %v1808_v0  ;;  %v626_v4 = vmul.f32 %v1761_v62, %v1949_v31  ;;  %v886_v22 = vpop.permute.xlu0 %885 }
 0x233   : > { %v631_v55 = vpack.c.bf16 %v625_v53, %v624_v12  ;;  %1644 = vmatprep.subr.bf16.mxu0 %v1808_v0 }
 0x235   : > { %1629 = vmatmul.mubr.msk.bf16.vlgmr.msra.gmra.mrb[8].mxu1 %vm307_vm1, %v631_v55  ;;  %v288_v55 = vld [vmem:[%s2159_s3 + $0x38] sm:$0xff] }
 0x236   : > { %1639 = vmatpush3.bf16.msra.mxu1 %v2001_v54  ;;  %1640 = vmatprep.mubr.msk.bf16.mxu1 %vm1809_vm0, %v1808_v0  ;;  %v937_v25 = vpop.permute.xlu0 %936 }
 0x237   : > { %1650 = vmatprep.subr.bf16.mxu1 %v1808_v0 }
 0x25e   : > { %v607_v60 = vpop.xlane.xlu1 %606 }
 0x25f   : > { %1762 = vrcp.f32 %v607_v60 }
 0x260   : > { %1764 = vrcp.f32 %v610_v59 }
 0x262   : > { %v613_v61 = vpop.xlane.xlu1 %612 }
 0x263   : > { %1766 = vrcp.f32 %v613_v61  ;;  %v291_v61 = vld [vmem:[%s2159_s3 + $0x50] sm:$0xff] }
 0x266   : > { %v939_v18 = vpop.permute.xlu1 %938 }
 0x267   : > { %v944_v21 = vsel %vm307_vm1, %v939_v18, 0 }
 0x269   : > { %v1763_v63 = vpop.eup %1762 }
 0x26a   : > { %v627_v9 = vmul.f32 %v1763_v63, %v1749_v1  ;;  %v1765_v10 = vpop.eup %1764  ;;  %v990_v23 = vpop.permute.xlu1 %989 }
 0x26b   : > { %v628_v16 = vmul.f32 %v1765_v10, %v1954_v34  ;;  %v995_v24 = vsel %vm307_vm1, %v990_v23, 0  ;;  %v292_v10 = vld [vmem:[%s2159_s3 + $0x58] sm:$0xff] }
 0x26c   : > { %v632_v14 = vpack.c.bf16 %v627_v9, %v626_v4  ;;  %v296_v23 = vld [vmem:[%s2159_s3 + $0x78] sm:$0xff] }
 0x26d   : > { %v1767_v15 = vpop.eup %1766 }
 0x26e   : > { %v629_v17 = vmul.f32 %v1767_v15, %v1751_v43  ;;  %1635 = vmatmul.mubr.msk.bf16.vlgmr.msra.gmra.mrb[12].mxu0 %vm307_vm1, %v632_v14  ;;  %v988_v26 = vpop.permute.xlu1 %987  ;;  %v283_v43 = vld [vmem:[%s2159_s3 + $0x10] sm:$0xff] }
 0x26f   : > { %1645 = vmatpush3.bf16.xpose.msra.mxu0 %v842_v13  ;;  %1646 = vmatprep.mubr.msk.bf16.mxu0 %vm1809_vm0, %v1808_v0 }
 0x270   : > { %v633_v19 = vpack.c.bf16 %v629_v17, %v628_v16  ;;  %1656 = vmatprep.subr.bf16.mxu0 %v1808_v0  ;;  %v295_v17 = vld [vmem:[%s2159_s3 + $0x70] sm:$0xff] }
 0x272   : > { %1641 = vmatmul.mubr.msk.bf16.vlgmr.msra.gmra.mrb[12].mxu1 %vm307_vm1, %v633_v19 }
 0x273   : > { %1651 = vmatpush3.bf16.xpose.msra.mxu1 %v893_v20  ;;  %1652 = vmatprep.mubr.msk.bf16.mxu1 %vm1809_vm0, %v1808_v0 }
 0x274   : > { %1662 = vmatprep.subr.bf16.mxu1 %v1808_v0 }
 0x276   : > { %1647 = vmatmul.mubr.msk.bf16.vlgmr.msra.gmra.mrb[16].mxu0 %vm307_vm1, %v835_v58 }
 0x277   : > { %1657 = vmatpush3.bf16.xpose.msra.mxu0 %v944_v21  ;;  %1658 = vmatprep.mubr.msk.bf16.mxu0 %vm1809_vm0, %v1808_v0 }
 0x278   : > { %1668 = vmatprep.subr.bf16.mxu0 %v1808_v0 }
 0x27a   : > { %1653 = vmatmul.mubr.msk.bf16.vlgmr.msra.gmra.mrb[16].mxu1 %vm307_vm1, %v886_v22 }
 0x27b   : > { %1663 = vmatpush3.bf16.xpose.msra.mxu1 %v995_v24  ;;  %1664 = vmatprep.mubr.msk.bf16.mxu1 %vm1809_vm0, %v1808_v0 }
 0x27c   : > { %1674 = vmatprep.subr.bf16.mxu1 %v1808_v0 }
 0x27e   : > { %1659 = vmatmul.mubr.msk.bf16.vlgmr.msra.gmra.mrb[20].mxu0 %vm307_vm1, %v937_v25 }
 0x27f   : > { %1670 = vmatprep.mubr.msk.bf16.mxu0 %vm1809_vm0, %v1808_v0 }
 0x282   : > { %1665 = vmatmul.mubr.msk.bf16.vlgmr.msra.gmra.mrb[20].mxu1 %vm307_vm1, %v988_v26 }
 0x283   : > { %1676 = vmatprep.mubr.msk.bf16.mxu1 %vm1809_vm0, %v1808_v0 }
 0x304   : > { %v2039_v27 = vpop.f32.mrb[8].mxu0 }
 0x305   : > { %v1624_v28 = vpop.f32.mrb[9].mxu0 }
 0x306   : > { %v2041_v29 = vpop.f32.mrb[10].mxu0 }
 0x307   : > { %v1625_v30 = vpop.f32.mrb[11].mxu0 }
 0x308   : > { %v2043_v31 = vpop.f32.mrb[8].mxu1 }
 0x309   : > { %v1630_v32 = vpop.f32.mrb[9].mxu1 }
 0x30a   : > { %v2045_v33 = vpop.f32.mrb[10].mxu1 }
 0x30b   : > { %v1631_v34 = vpop.f32.mrb[11].mxu1 }
 0x341   : > { %v2047_v35 = vpop.f32.mrb[12].mxu0 }
 0x342   : > { %v1636_v2 = vpop.f32.mrb[13].mxu0 }
 0x343   : > { %v2049_v7 = vpop.f32.mrb[14].mxu0 }
 0x344   : > { %v1637_v38 = vpop.f32.mrb[15].mxu0 }
 0x345   : > { %v2051_v39 = vpop.f32.mrb[12].mxu1 }
 0x346   : > { %v1642_v40 = vpop.f32.mrb[13].mxu1 }
 0x347   : > { %v2053_v41 = vpop.f32.mrb[14].mxu1 }
 0x348   : > { %v1643_v1 = vpop.f32.mrb[15].mxu1 }
 0x349   : > { %v878_v42 = vpop.f32.mrb[16].mxu0 }
 0x34a   : > { %v1038_v44 = vmul.f32 0.25, %v878_v42  ;;  %v1648_v8 = vpop.f32.mrb[17].mxu0 }
 0x34b   : > { %v881_v11 = vpop.f32.mrb[18].mxu0 }
 0x34c   : > { %v1039_v46 = vmul.f32 0.25, %v881_v11  ;;  %v1649_v47 = vpop.f32.mrb[19].mxu0  ;;  %v1046_v48 = vadd.f32 %v1038_v44, %v283_v43 }
 0x34d   : > { %v929_v49 = vpop.f32.mrb[16].mxu1 }
 0x34e   : > { %v1040_v50 = vmul.f32 0.25, %v929_v49  ;;  %v1654_v6 = vpop.f32.mrb[17].mxu1  ;;  %v1054_v52 = vsel %vm307_vm1, %v1046_v48, -inf  ;;  %v1047_v12 = vadd.f32 %v1039_v46, %v284_v45 }
 0x34f   : > { %v932_v53 = vpop.f32.mrb[18].mxu1  ;;  %1055 = vmax.xlane.f32.xlu0 %v1054_v52 }
 0x350   : > { %v1041_v56 = vmul.f32 0.25, %v932_v53  ;;  %v1655_v57 = vpop.f32.mrb[19].mxu1  ;;  %v1057_v58 = vsel %vm307_vm1, %v1047_v12, -inf  ;;  %v1048_v59 = vadd.f32 %v1040_v50, %v287_v5 }
 0x351   : > { %1058 = vmax.xlane.f32.xlu1 %v1057_v58  ;;  %v980_v60 = vpop.f32.mrb[20].mxu0 }
 0x352   : > { %v1042_v62 = vmul.f32 0.25, %v980_v60  ;;  %v1660_v63 = vpop.f32.mrb[21].mxu0  ;;  %v1060_v3 = vsel %vm307_vm1, %v1048_v59, -inf  ;;  %v1049_v4 = vadd.f32 %v1041_v56, %v288_v55 }
 0x353   : > { %1061 = vmax.xlane.f32.xlu0 %v1060_v3  ;;  %v983_v9 = vpop.f32.mrb[22].mxu0 }
 0x354   : > { %v1043_v13 = vmul.f32 0.25, %v983_v9  ;;  %v1050_v14 = vadd.f32 %v1042_v62, %v291_v61  ;;  %v1661_v15 = vpop.f32.mrb[23].mxu0  ;;  %v1063_v20 = vsel %vm307_vm1, %v1049_v4, -inf }
 0x355   : > { %v1031_v16 = vpop.f32.mrb[20].mxu1 }
 0x356   : > { %v1044_v18 = vmul.f32 0.25, %v1031_v16  ;;  %v1666_v19 = vpop.f32.mrb[21].mxu1  ;;  %v2080_v21 = vadd.f32 %v1043_v13, %v292_v10  ;;  %v1066_v26 = vsel %vm307_vm1, %v1050_v14, -inf }
 0x357   : > { %v1034_v22 = vpop.f32.mrb[22].mxu1  ;;  %1064 = vmax.xlane.f32.xlu0 %v1063_v20 }
 0x358   : > { %v1045_v24 = vmul.f32 0.25, %v1034_v22  ;;  %v1069_v25 = vsel %vm307_vm1, %v2080_v21, -inf  ;;  %v1052_v28 = vadd.f32 %v1044_v18, %v295_v17  ;;  %v1667_v30 = vpop.f32.mrb[23].mxu1 }
 0x359   : > { %1070 = vmax.xlane.f32.xlu1 %v1069_v25 }
 0x35a   : > { %v1053_v32 = vadd.f32 %v1045_v24, %v296_v23  ;;  %v1072_v2 = vsel %vm307_vm1, %v1052_v28, -inf }
 0x35b   : > { %1067 = vmax.xlane.f32.xlu0 %v1066_v26 }
 0x35c   : > { %v1075_v34 = vsel %vm307_vm1, %v1053_v32, -inf }
 0x35d   : > { %1076 = vmax.xlane.f32.xlu1 %v1075_v34 }
 0x35f   : > { %1073 = vmax.xlane.f32.xlu0 %v1072_v2 }
 0x3dc   : > { %v1056_v38 = vpop.xlane.xlu0 %1055 }
 0x3dd   : > { %v1078_v40 = vsub.f32 %v1046_v48, %v1056_v38 }
 0x3de   : > { %v1059_v1 = vpop.xlane.xlu1 %1058 }
 0x3df   : > { %v1086_v42 = vmul.f32 1.442695, %v1078_v40  ;;  %v1079_v43 = vsub.f32 %v1047_v12, %v1059_v1 }
 0x3e0   : > { %v1062_v44 = vpop.xlane.xlu0 %1061 }
 0x3e1   : > { %1768 = vpow2.f32 %v1086_v42  ;;  %v1088_v8 = vmul.f32 1.442695, %v1079_v43  ;;  %v1080_v11 = vsub.f32 %v1048_v59, %v1062_v44 }
 0x3e3   : > { %1770 = vpow2.f32 %v1088_v8  ;;  %v1090_v45 = vmul.f32 1.442695, %v1080_v11 }
 0x3e4   : > { %v1065_v46 = vpop.xlane.xlu0 %1064 }
 0x3e5   : > { %1772 = vpow2.f32 %v1090_v45  ;;  %v1081_v47 = vsub.f32 %v1049_v4, %v1065_v46 }
 0x3e6   : > { %v1071_v9 = vpop.xlane.xlu1 %1070 }
 0x3e7   : > { %v1092_v49 = vmul.f32 1.442695, %v1081_v47  ;;  %v1083_v10 = vsub.f32 %v2080_v21, %v1071_v9 }
 0x3e8   : > { %v1068_v5 = vpop.xlane.xlu0 %1067 }
 0x3e9   : > { %1774 = vpow2.f32 %v1092_v49  ;;  %v1082_v50 = vsub.f32 %v1050_v14, %v1068_v5  ;;  %v1096_v14 = vmul.f32 1.442695, %v1083_v10 }
 0x3ea   : > { %v1077_v13 = vpop.xlane.xlu1 %1076 }
 0x3eb   : > { %v1769_v6 = vpop.eup %1768  ;;  %v1094_v52 = vmul.f32 1.442695, %v1082_v50  ;;  %v1085_v15 = vsub.f32 %v1053_v32, %v1077_v13 }
 0x3ec   : > { %v1074_v53 = vpop.xlane.xlu0 %1073  ;;  %v1102_v48 = vsel %vm307_vm1, %v1769_v6, 0.0 }
 0x3ed   : > { %v1771_v55 = vpop.eup %1770  ;;  %1776 = vpow2.f32 %v1094_v52  ;;  %v1084_v12 = vsub.f32 %v1052_v28, %v1074_v53  ;;  %1103 = vadd.xlane.f32.xlu0 %v1102_v48  ;;  %v1100_v16 = vmul.f32 1.442695, %v1085_v15 }
 0x3ee   : > { %v1105_v56 = vsel %vm307_vm1, %v1771_v55, 0.0 }
 0x3ef   : > { %v1773_v57 = vpop.eup %1772  ;;  %v1098_v58 = vmul.f32 1.442695, %v1084_v12  ;;  %1106 = vadd.xlane.f32.xlu1 %v1105_v56 }
 0x3f0   : > { %v1108_v59 = vsel %vm307_vm1, %v1773_v57, 0.0 }
 0x3f1   : > { %1778 = vpow2.f32 %v1098_v58  ;;  %1109 = vadd.xlane.f32.xlu0 %v1108_v59 }
 0x3f2   : > { %1780 = vpow2.f32 %v1096_v14 }
 0x3f3   : > { %v1775_v60 = vpop.eup %1774  ;;  %1782 = vpow2.f32 %v1100_v16 }
 0x3f4   : > { %v1111_v61 = vsel %vm307_vm1, %v1775_v60, 0.0 }
 0x3f5   : > { %1112 = vadd.xlane.f32.xlu1 %v1111_v61 }
 0x3f7   : > { %v2094_v62 = vpop.eup %1776 }
 0x3f8   : > { %v1114_v63 = vsel %vm307_vm1, %v2094_v62, 0.0 }
 0x3f9   : > { %1115 = vadd.xlane.f32.xlu0 %v1114_v63 }
 0x3fb   : > { %v2098_v3 = vpop.eup %1778 }
 0x3fc   : > { %v1120_v4 = vsel %vm307_vm1, %v2098_v3, 0.0  ;;  %v1781_v17 = vpop.eup %1780 }
 0x3fd   : > { %1121 = vadd.xlane.f32.xlu0 %v1120_v4  ;;  %v1117_v18 = vsel %vm307_vm1, %v1781_v17, 0.0  ;;  %v1783_v19 = vpop.eup %1782 }
 0x406   : > { %1193 = vrot.lane.b32.xlu1 %v1974_v37, %s1810_s16  ;;  %v1123_v37 = vsel %vm307_vm1, %v1783_v19, 0.0 }
 0x40a   : > { %1240 = vrot.lane.b32.xlu1 %v1995_v51, %s1810_s16 }
 0x413   : > { %1146 = vrot.lane.b32.xlu0 %v1969_v36, %s1810_s16 }
 0x42e   : > { %1118 = vadd.xlane.f32.xlu1 %v1117_v18 }
 0x432   : > { %1124 = vadd.xlane.f32.xlu1 %v1123_v37 }
 0x443   : > { %1287 = vrot.lane.b32.xlu1 %v2001_v54, %s1810_s16 }
 0x47a   : > { %v1104_v36 = vpop.xlane.xlu0 %1103 }
 0x47c   : > { %v1107_v51 = vpop.xlane.xlu1 %1106 }
 0x47d   : > { %1784 = vrcp.f32 %v1107_v51 }
 0x47e   : > { %v1110_v20 = vpop.xlane.xlu0 %1109  ;;  %1786 = vrcp.f32 %v1104_v36 }
 0x47f   : > { %1788 = vrcp.f32 %v1110_v20 }
 0x482   : > { %v1113_v21 = vpop.xlane.xlu1 %1112 }
 0x483   : > { %1790 = vrcp.f32 %v1113_v21 }
 0x486   : > { %v1116_v22 = vpop.xlane.xlu0 %1115  ;;  %v1194_v23 = vpop.permute.xlu1 %1193 }
 0x487   : > { %1675 = vmatpush3.bf16.msra.mxu1 %v1194_v23  ;;  %v1785_v24 = vpop.eup %1784  ;;  %1792 = vrcp.f32 %v1116_v22 }
 0x488   : > { %1686 = vmatprep.subr.bf16.mxu1 %v1808_v0  ;;  %v1787_v25 = vpop.eup %1786  ;;  %v1135_v30 = vmul.f32 %v1785_v24, %v1771_v55 }
 0x489   : > { %v1789_v28 = vpop.eup %1788  ;;  %v1134_v54 = vmul.f32 %v1787_v25, %v1769_v6 }
 0x48a   : > { %v1122_v26 = vpop.xlane.xlu0 %1121  ;;  %v1136_v34 = vmul.f32 %v1789_v28, %v1773_v57  ;;  %v1241_v42 = vpop.permute.xlu1 %1240 }
 0x48b   : > { %v1142_v40 = vpack.c.bf16 %v1135_v30, %v1134_v54 }
 0x48d   : > { %v1791_v32 = vpop.eup %1790 }
 0x48e   : > { %v1137_v2 = vmul.f32 %v1791_v32, %v1775_v60  ;;  %v1147_v38 = vpop.permute.xlu0 %1146 }
 0x48f   : > { %1669 = vmatpush3.bf16.msra.mxu0 %v1147_v38 }
 0x490   : > { %v1143_v1 = vpack.c.bf16 %v1137_v2, %v1136_v34  ;;  %1680 = vmatprep.subr.bf16.mxu0 %v1808_v0 }
 0x491   : > { %v1793_v11 = vpop.eup %1792 }
 0x492   : > { %1671 = vmatmul.mubr.msk.bf16.vlgmr.msra.gmra.mrb[24].mxu0 %vm307_vm1, %v1142_v40  ;;  %1677 = vmatmul.mubr.msk.bf16.vlgmr.msra.gmra.mrb[24].mxu1 %vm307_vm1, %v1143_v1  ;;  %v1138_v46 = vmul.f32 %v1793_v11, %v2094_v62 }
 0x493   : > { %1681 = vmatpush3.bf16.msra.mxu0 %v1241_v42  ;;  %1682 = vmatprep.mubr.msk.bf16.mxu0 %vm1809_vm0, %v1808_v0 }
 0x494   : > { %1688 = vmatprep.mubr.msk.bf16.mxu1 %vm1809_vm0, %v1808_v0 }
 0x4bb   : > { %v1119_v43 = vpop.xlane.xlu1 %1118 }
 0x4bc   : > { %1794 = vrcp.f32 %v1119_v43 }
 0x4bd   : > { %1796 = vrcp.f32 %v1122_v26 }
 0x4bf   : > { %v1125_v44 = vpop.xlane.xlu1 %1124 }
 0x4c0   : > { %1798 = vrcp.f32 %v1125_v44 }
 0x4c3   : > { %v1288_v8 = vpop.permute.xlu1 %1287 }
 0x4c4   : > { %1687 = vmatpush3.bf16.msra.mxu1 %v1288_v8 }
 0x4c6   : > { %v1795_v45 = vpop.eup %1794 }
 0x4c7   : > { %v1139_v47 = vmul.f32 %v1795_v45, %v1781_v17  ;;  %v1797_v49 = vpop.eup %1796 }
 0x4c8   : > { %v1140_v6 = vmul.f32 %v1797_v49, %v2098_v3 }
 0x4c9   : > { %v1144_v5 = vpack.c.bf16 %v1139_v47, %v1138_v46 }
 0x4ca   : > { %v1799_v50 = vpop.eup %1798 }
 0x4cb   : > { %v1141_v52 = vmul.f32 %v1799_v50, %v1783_v19  ;;  %1683 = vmatmul.mubr.msk.bf16.vlgmr.msra.gmra.mrb[28].mxu0 %vm307_vm1, %v1144_v5 }
 0x4cd   : > { %v1145_v0 = vpack.c.bf16 %v1141_v52, %v1140_v6 }
 0x4cf   : > { %1689 = vmatmul.mubr.msk.bf16.vlgmr.msra.gmra.mrb[28].mxu1 %vm307_vm1, %v1145_v0 }
 0x565   : > { %v1186_v53 = vpop.f32.mrb[24].mxu0  ;;  %v1233_v48 = vpop.f32.mrb[24].mxu1 }
 0x566   : > { %v1672_v55 = vpop.f32.mrb[25].mxu0  ;;  %v1678_v12 = vpop.f32.mrb[25].mxu1 }
 0x567   : > { %v1189_v56 = vpop.f32.mrb[26].mxu0  ;;  %v1236_v57 = vpop.f32.mrb[26].mxu1 }
 0x568   : > { %v1704_v58 = vpack.i.bf16 %v1189_v56, %v1186_v53  ;;  %v1709_v59 = vpack.i.bf16 %v1236_v57, %v1233_v48  ;;  %v1673_v60 = vpop.f32.mrb[27].mxu0  ;;  %v1679_v61 = vpop.f32.mrb[27].mxu1 }
 0x56a   : > { %1710 = vrot.lane.b32.xlu1 %v1709_v59, %s1811_s11  ;;  %1705 = vrot.lane.b32.xlu0 %v1704_v58, %s1811_s11 }
 0x59e   : > { %v1280_v62 = vpop.f32.mrb[28].mxu0 }
 0x59f   : > { %v1684_v63 = vpop.f32.mrb[29].mxu0 }
 0x5a0   : > { %v1283_v3 = vpop.f32.mrb[30].mxu0 }
 0x5a1   : > { %v1714_v4 = vpack.i.bf16 %v1283_v3, %v1280_v62  ;;  %v1685_v9 = vpop.f32.mrb[31].mxu0 }
 0x5a2   : > { %v1327_v10 = vpop.f32.mrb[28].mxu1 }
 0x5a3   : > { %v1690_v13 = vpop.f32.mrb[29].mxu1  ;;  %1715 = vrot.lane.b32.xlu0 %v1714_v4, %s1811_s11 }
 0x5a4   : > { %v1330_v14 = vpop.f32.mrb[30].mxu1 }
 0x5a5   : > { %v1719_v15 = vpack.i.bf16 %v1330_v14, %v1327_v10  ;;  %v1691_v16 = vpop.f32.mrb[31].mxu1 }
 0x5a7   : > { %1720 = vrot.lane.b32.xlu1 %v1719_v15, %s1811_s11 }
 0x5dc   : > { %v1711_v17 = vpop.permute.xlu1 %1710  ;;  %v1706_v18 = vpop.permute.xlu0 %1705 }
 0x5dd   : > { %v1713_v19 = vunpack.i.h.bf16 %v1711_v17  ;;  %v1712_v37 = vunpack.i.l.bf16 %v1711_v17  ;;  %v1708_v36 = vunpack.i.h.bf16 %v1706_v18  ;;  %v1707_v51 = vunpack.i.l.bf16 %v1706_v18 }
 0x5df   : > { %v1369_v20 = vsel %vm307_vm1, %v2045_v33, %v1713_v19  ;;  %v1368_v21 = vsel %vm307_vm1, %v2043_v31, %v1712_v37  ;;  %v1367_v22 = vsel %vm307_vm1, %v2041_v29, %v1708_v36  ;;  %v1366_v23 = vsel %vm307_vm1, %v2039_v27, %v1707_v51 }
 0x5e0   : > { %v1559_v24 = vpack.c.bf16 %v1369_v20, %v1369_v20  ;;  %v1558_v25 = vpack.c.bf16 %v1368_v21, %v1368_v21  ;;  %v1557_v26 = vpack.c.bf16 %v1367_v22, %v1367_v22  ;;  %v1556_v28 = vpack.c.bf16 %v1366_v23, %v1366_v23 }
 0x5e2   : > { %1408 = vst.msk [vmem:[%s254_s14 + $0x4] sm:$0xf] %vm1406_vm2, %v1557_v26  ;;  %1407 = vst.msk [vmem:[%s254_s14] sm:$0xf] %vm1406_vm2, %v1556_v28 }
 0x5e3   : > { %1410 = vst.msk [vmem:[%s254_s14 + $0xc] sm:$0xf] %vm1406_vm2, %v1559_v24  ;;  %1409 = vst.msk [vmem:[%s254_s14 + $0x8] sm:$0xf] %vm1406_vm2, %v1558_v25 }
 0x615   : > { %v1716_v31 = vpop.permute.xlu0 %1715 }
 0x616   : > { %v1718_v33 = vunpack.i.h.bf16 %v1716_v31  ;;  %v1717_v30 = vunpack.i.l.bf16 %v1716_v31 }
 0x618   : > { %v1371_v29 = vsel %vm307_vm1, %v2049_v7, %v1718_v33  ;;  %v1370_v27 = vsel %vm307_vm1, %v2047_v35, %v1717_v30 }
 0x619   : > { %v1561_v32 = vpack.c.bf16 %v1371_v29, %v1371_v29  ;;  %v1560_v54 = vpack.c.bf16 %v1370_v27, %v1370_v27  ;;  %v1721_v34 = vpop.permute.xlu1 %1720 }
 0x61a   : > { %v1723_v2 = vunpack.i.h.bf16 %v1721_v34  ;;  %v1722_v38 = vunpack.i.l.bf16 %v1721_v34 }
 0x61b   : > { %1412 = vst.msk [vmem:[%s254_s14 + $0x14] sm:$0xf] %vm1406_vm2, %v1561_v32  ;;  %1411 = vst.msk [vmem:[%s254_s14 + $0x10] sm:$0xf] %vm1406_vm2, %v1560_v54 }
 0x61c   : > { %v1373_v40 = vsel %vm307_vm1, %v2053_v41, %v1723_v2  ;;  %v1372_v1 = vsel %vm307_vm1, %v2051_v39, %v1722_v38 }
 0x61d   : > { %v1563_v42 = vpack.c.bf16 %v1373_v40, %v1373_v40  ;;  %v1562_v7 = vpack.c.bf16 %v1372_v1, %v1372_v1 }
 0x61f   : > { %1413 = vst.msk [vmem:[%s254_s14 + $0x18] sm:$0xf] %vm1406_vm2, %v1562_v7  ;;  %1414 = vst.msk [vmem:[%s254_s14 + $0x1c] sm:$0xf] %vm1406_vm2, %v1563_v42 }
 0x620 PF: > { %s14_s15 = sadd.s32 1, %s1806_s15  }
 0x621   : > { %p11_p4 = scmp.ge.s32.totalorder %s14_s15, 4  }
 0x623   :  { %13 = sbr.rel (!%p11_p4) target bundleno = 1 (0x1), region = 72 }

// kernel: _lambda_.42
= control target key start
LH: loop header
LB: loop body
LE: loop exit
PB: predicated region body
PF: predicated region fallthrough
CT: control target
= control target key end

     0   :  { %s692_s1 = inlined_call_operand.vmem [shape: bf16[128,128], index: 1, kind: input, shape index: {}]   ;;  %s693_s0 = inlined_call_operand.vmem [shape: bf16[128,128], index: 0, kind: input, shape index: {}]   ;;  %s694_s2 = inlined_call_operand.vmem [shape: f32[1,128], index: 2, kind: input, shape index: {}]   ;;  %s695_s3 = inlined_call_operand.vmem [shape: f32[128,128], index: 3, kind: input, shape index: {}]   ;;  %s696_s4 = inlined_call_operand.vmem [shape: f32[128,128], index: 4, kind: output, shape index: {}]  }
   0x1   :  { %v486_v0 = vld [vmem:[%s692_s1] sm:$0xff]   ;;  %v487_v1 = vld [vmem:[%s692_s1 + $0x8] sm:$0xff]   ;;  %v488_v2 = vld [vmem:[%s692_s1 + $0x10] sm:$0xff]  }
   0x2   :  { %438 = vmatprep.subr.bf16.mxu0 %v486_v0  ;;  %470 = vmatprep.subr.bf16.mxu1 %v486_v0  ;;  %v489_v3 = vld [vmem:[%s692_s1 + $0x18] sm:$0xff]   ;;  %v494_v4 = vld [vmem:[%s693_s0] sm:$0xff]   ;;  %v491_v7 = vld [vmem:[%s692_s1 + $0x28] sm:$0xff]  }
   0x3   :  { %439 = vmatpush3.bf16.msra.mxu0 %v486_v0  ;;  %478 = vmatpush3.bf16.msra.mxu1 %v486_v0  ;;  %v495_v5 = vld [vmem:[%s693_s0 + $0x20] sm:$0xff]   ;;  %v492_v8 = vld [vmem:[%s692_s1 + $0x30] sm:$0xff]   ;;  %v493_v9 = vld [vmem:[%s692_s1 + $0x38] sm:$0xff]  }
   0x4   :  { %440 = vmatprep.subr.bf16.mxu0 %v487_v1  ;;  %471 = vmatprep.subr.bf16.mxu1 %v487_v1  ;;  %v490_v6 = vld [vmem:[%s692_s1 + $0x20] sm:$0xff]   ;;  %v496_v10 = vld [vmem:[%s693_s0 + $0x8] sm:$0xff]   ;;  %v498_v12 = vld [vmem:[%s693_s0 + $0x10] sm:$0xff]  }
   0x5   :  { %454 = vmatprep.mubr.bf16.mxu0 %v494_v4  ;;  %462 = vmatprep.mubr.bf16.mxu1 %v495_v5  ;;  %v497_v11 = vld [vmem:[%s693_s0 + $0x28] sm:$0xff]   ;;  %v499_v13 = vld [vmem:[%s693_s0 + $0x30] sm:$0xff]   ;;  %v500_v14 = vld [vmem:[%s693_s0 + $0x18] sm:$0xff]  }
   0x6   :  { %v501_v15 = vld [vmem:[%s693_s0 + $0x38] sm:$0xff]   ;;  %v578_v16 = vld [vmem:[%s694_s2] ss:$0 sm:$0xff]  ;;  %v355_v18 = vld [vmem:[%s695_s3 + $0x10] sm:$0xff] }
   0x7   :  { %441 = vmatpush3.bf16.msra.mxu0 %v487_v1  ;;  %479 = vmatpush3.bf16.msra.mxu1 %v487_v1  ;;  %v363_v20 = vld [vmem:[%s695_s3 + $0x50] sm:$0xff]  ;;  %v353_v24 = vld [vmem:[%s695_s3] sm:$0xff]  ;;  %v356_v30 = vld [vmem:[%s695_s3 + $0x18] sm:$0xff] }
   0x8   :  { %442 = vmatprep.subr.bf16.mxu0 %v488_v2  ;;  %472 = vmatprep.subr.bf16.mxu1 %v488_v2  ;;  %v361_v26 = vld [vmem:[%s695_s3 + $0x40] sm:$0xff]  ;;  %v364_v32 = vld [vmem:[%s695_s3 + $0x58] sm:$0xff]  ;;  %v354_v38 = vld [vmem:[%s695_s3 + $0x8] sm:$0xff] }
   0x9   :  { %v362_v40 = vld [vmem:[%s695_s3 + $0x48] sm:$0xff]  ;;  %v359_v50 = vld [vmem:[%s695_s3 + $0x30] sm:$0xff]  ;;  %v357_v56 = vld [vmem:[%s695_s3 + $0x20] sm:$0xff] }
   0xa   :  { %v367_v52 = vld [vmem:[%s695_s3 + $0x70] sm:$0xff]  ;;  %v365_v58 = vld [vmem:[%s695_s3 + $0x60] sm:$0xff]  ;;  %v360_v62 = vld [vmem:[%s695_s3 + $0x38] sm:$0xff] }
   0xb   :  { %443 = vmatpush3.bf16.msra.mxu0 %v488_v2  ;;  %480 = vmatpush3.bf16.msra.mxu1 %v488_v2  ;;  %v368_v0 = vld [vmem:[%s695_s3 + $0x78] sm:$0xff] }
   0xc   :  { %444 = vmatprep.subr.bf16.mxu0 %v489_v3  ;;  %473 = vmatprep.subr.bf16.mxu1 %v489_v3 }
   0xf   :  { %445 = vmatpush3.bf16.msra.mxu0 %v489_v3  ;;  %481 = vmatpush3.bf16.msra.mxu1 %v489_v3 }
  0x10   :  { %446 = vmatprep.subr.bf16.mxu0 %v490_v6  ;;  %474 = vmatprep.subr.bf16.mxu1 %v490_v6 }
  0x13   :  { %447 = vmatpush3.bf16.msra.mxu0 %v490_v6  ;;  %482 = vmatpush3.bf16.msra.mxu1 %v490_v6  ;;  %v358_v6 = vld [vmem:[%s695_s3 + $0x28] sm:$0xff] }
  0x14   :  { %448 = vmatprep.subr.bf16.mxu0 %v491_v7  ;;  %475 = vmatprep.subr.bf16.mxu1 %v491_v7 }
  0x17   :  { %449 = vmatpush3.bf16.msra.mxu0 %v491_v7  ;;  %483 = vmatpush3.bf16.msra.mxu1 %v491_v7 }
  0x18   :  { %450 = vmatprep.subr.bf16.mxu0 %v492_v8  ;;  %476 = vmatprep.subr.bf16.mxu1 %v492_v8 }
  0x1b   :  { %451 = vmatpush3.bf16.msra.mxu0 %v492_v8  ;;  %484 = vmatpush3.bf16.msra.mxu1 %v492_v8  ;;  %v366_v8 = vld [vmem:[%s695_s3 + $0x68] sm:$0xff] }
  0x1c   :  { %452 = vmatprep.subr.bf16.mxu0 %v493_v9  ;;  %477 = vmatprep.subr.bf16.mxu1 %v493_v9 }
  0x1f   :  { %453 = vmatpush3.bf16.msra.mxu0 %v493_v9  ;;  %485 = vmatpush3.bf16.msra.mxu1 %v493_v9 }
  0x22   :  { %455 = vmatmul.mubr.bf16.vlgmr.msra.gmra.mrb[0].mxu0 %v496_v10  ;;  %463 = vmatmul.mubr.bf16.vlgmr.msra.gmra.mrb[0].mxu1 %v497_v11 }
  0x23   :  { %458 = vmatprep.mubr.bf16.mxu0 %v498_v12  ;;  %466 = vmatprep.mubr.bf16.mxu1 %v499_v13 }
  0x2a   :  { %459 = vmatmul.mubr.bf16.gmra.mrb[4].mxu0 %v500_v14  ;;  %467 = vmatmul.mubr.bf16.gmra.mrb[4].mxu1 %v501_v15 }
  0xf5   :  { %v456_v17 = vpop.f32.mrb[0].mxu0  ;;  %v464_v19 = vpop.f32.mrb[0].mxu1 }
  0xf6   :  { %v339_v21 = vadd.f32 %v456_v17, %v578_v16  ;;  %v347_v22 = vadd.f32 %v464_v19, %v578_v16  ;;  %v216_v23 = vpop.f32.mrb[1].mxu0  ;;  %v248_v25 = vpop.f32.mrb[1].mxu1 }
  0xf7   :  { %v337_v27 = vadd.f32 %v578_v16, %v216_v23  ;;  %v345_v28 = vadd.f32 %v578_v16, %v248_v25  ;;  %v457_v29 = vpop.f32.mrb[2].mxu0  ;;  %v465_v31 = vpop.f32.mrb[2].mxu1 }
  0xf8   :  { %v371_v33 = vadd.f32 %v355_v18, %v339_v21  ;;  %v379_v34 = vadd.f32 %v363_v20, %v347_v22  ;;  %v340_v35 = vadd.f32 %v457_v29, %v578_v16  ;;  %v348_v36 = vadd.f32 %v465_v31, %v578_v16  ;;  %v219_v37 = vpop.f32.mrb[3].mxu0  ;;  %v251_v39 = vpop.f32.mrb[3].mxu1 }
  0xf9   :  { %v369_v41 = vadd.f32 %v353_v24, %v337_v27  ;;  %v377_v42 = vadd.f32 %v361_v26, %v345_v28  ;;  %v338_v43 = vadd.f32 %v578_v16, %v219_v37  ;;  %v346_v44 = vadd.f32 %v578_v16, %v251_v39 }
  0xfa   :  { %387 = vst [vmem:[%s696_s4 + $0x10] sm:$0xff] %v371_v33  ;;  %395 = vst [vmem:[%s696_s4 + $0x50] sm:$0xff] %v379_v34  ;;  %v372_v45 = vadd.f32 %v356_v30, %v340_v35  ;;  %v380_v46 = vadd.f32 %v364_v32, %v348_v36 }
  0xfb   :  { %385 = vst [vmem:[%s696_s4] sm:$0xff] %v369_v41  ;;  %393 = vst [vmem:[%s696_s4 + $0x40] sm:$0xff] %v377_v42  ;;  %v370_v47 = vadd.f32 %v354_v38, %v338_v43  ;;  %v378_v48 = vadd.f32 %v362_v40, %v346_v44 }
  0xfc   :  { %388 = vst [vmem:[%s696_s4 + $0x18] sm:$0xff] %v372_v45  ;;  %396 = vst [vmem:[%s696_s4 + $0x58] sm:$0xff] %v380_v46 }
  0xfd   :  { %386 = vst [vmem:[%s696_s4 + $0x8] sm:$0xff] %v370_v47  ;;  %394 = vst [vmem:[%s696_s4 + $0x48] sm:$0xff] %v378_v48  ;;  %v460_v49 = vpop.f32.mrb[4].mxu0  ;;  %v468_v51 = vpop.f32.mrb[4].mxu1 }
  0xfe   :  { %v343_v53 = vadd.f32 %v460_v49, %v578_v16  ;;  %v351_v54 = vadd.f32 %v468_v51, %v578_v16  ;;  %v232_v55 = vpop.f32.mrb[5].mxu0  ;;  %v264_v57 = vpop.f32.mrb[5].mxu1 }
  0xff   :  { %v341_v59 = vadd.f32 %v578_v16, %v232_v55  ;;  %v349_v60 = vadd.f32 %v578_v16, %v264_v57  ;;  %v461_v61 = vpop.f32.mrb[6].mxu0  ;;  %v469_v63 = vpop.f32.mrb[6].mxu1 }
 0x100   :  { %v375_v1 = vadd.f32 %v359_v50, %v343_v53  ;;  %v383_v2 = vadd.f32 %v367_v52, %v351_v54  ;;  %v344_v3 = vadd.f32 %v461_v61, %v578_v16  ;;  %v352_v4 = vadd.f32 %v469_v63, %v578_v16  ;;  %v235_v5 = vpop.f32.mrb[7].mxu0  ;;  %v267_v7 = vpop.f32.mrb[7].mxu1 }
 0x101   :  { %v373_v9 = vadd.f32 %v357_v56, %v341_v59  ;;  %v381_v10 = vadd.f32 %v365_v58, %v349_v60  ;;  %v342_v11 = vadd.f32 %v578_v16, %v235_v5  ;;  %v350_v12 = vadd.f32 %v578_v16, %v267_v7 }
 0x102   :  { %391 = vst [vmem:[%s696_s4 + $0x30] sm:$0xff] %v375_v1  ;;  %399 = vst [vmem:[%s696_s4 + $0x70] sm:$0xff] %v383_v2  ;;  %v376_v13 = vadd.f32 %v360_v62, %v344_v3  ;;  %v384_v14 = vadd.f32 %v368_v0, %v352_v4 }
 0x103   :  { %389 = vst [vmem:[%s696_s4 + $0x20] sm:$0xff] %v373_v9  ;;  %397 = vst [vmem:[%s696_s4 + $0x60] sm:$0xff] %v381_v10  ;;  %v374_v15 = vadd.f32 %v358_v6, %v342_v11  ;;  %v382_v16 = vadd.f32 %v366_v8, %v350_v12 }
 0x104   :  { %392 = vst [vmem:[%s696_s4 + $0x38] sm:$0xff] %v376_v13  ;;  %400 = vst [vmem:[%s696_s4 + $0x78] sm:$0xff] %v384_v14 }
 0x105   :  { %390 = vst [vmem:[%s696_s4 + $0x28] sm:$0xff] %v374_v15  ;;  %398 = vst [vmem:[%s696_s4 + $0x68] sm:$0xff] %v382_v16 }

// kernel: _lambda_.50
= control target key start
LH: loop header
LB: loop body
LE: loop exit
PB: predicated region body
PF: predicated region fallthrough
CT: control target
= control target key end

     0   :  { %s153_s0 = inlined_call_operand.vmem [shape: f32[32,128], index: 0, kind: input, shape index: {}]   ;;  %s154_s1 = inlined_call_operand.vmem [shape: f32[1,128], index: 1, kind: input, shape index: {}]   ;;  %s155_s2 = inlined_call_operand.vmem [shape: f32[1,128], index: 2, kind: input, shape index: {}]   ;;  %s156_s3 = inlined_call_operand.vmem [shape: f32[32,128], index: 3, kind: output, shape index: {}]  }
   0x1   :  { %v14_v0 = vld [vmem:[%s153_s0] sm:$0xff]  ;;  %v16_v1 = vld [vmem:[%s153_s0 + $0x10] sm:$0xff]  ;;  %v15_v2 = vld [vmem:[%s153_s0 + $0x8] sm:$0xff] }
   0x2   :  { %18 = vadd.xlane.f32.xlu0 %v14_v0  ;;  %22 = vadd.xlane.f32.xlu1 %v16_v1  ;;  %v17_v3 = vld [vmem:[%s153_s0 + $0x18] sm:$0xff]  ;;  %v93_v33 = vld [vmem:[%s154_s1] ss:$0 sm:$0xff] }
   0x3   :  { %v94_v35 = vld [vmem:[%s155_s2] ss:$0 sm:$0xff] }
   0x6   :  { %20 = vadd.xlane.f32.xlu0 %v15_v2  ;;  %24 = vadd.xlane.f32.xlu1 %v17_v3 }
  0x8f   :  { %v19_v4 = vpop.xlane.xlu0 %18  ;;  %v23_v5 = vpop.xlane.xlu1 %22 }
  0x90   :  { %v27_v6 = vmul.f32 0.0078125, %v19_v4  ;;  %v29_v7 = vmul.f32 0.0078125, %v23_v5 }
  0x92   :  { %v31_v8 = vsub.f32 %v14_v0, %v27_v6  ;;  %v33_v9 = vsub.f32 %v16_v1, %v29_v7 }
  0x93   :  { %v21_v10 = vpop.xlane.xlu0 %20  ;;  %v25_v11 = vpop.xlane.xlu1 %24 }
  0x94   :  { %v28_v12 = vmul.f32 0.0078125, %v21_v10  ;;  %v35_v13 = vmul.f32 %v31_v8, %v31_v8  ;;  %v30_v14 = vmul.f32 0.0078125, %v25_v11  ;;  %v37_v17 = vmul.f32 %v33_v9, %v33_v9 }
  0x96   :  { %v32_v15 = vsub.f32 %v15_v2, %v28_v12  ;;  %39 = vadd.xlane.f32.xlu0 %v35_v13  ;;  %v34_v16 = vsub.f32 %v17_v3, %v30_v14 }
  0x98   :  { %v36_v18 = vmul.f32 %v32_v15, %v32_v15  ;;  %v38_v19 = vmul.f32 %v34_v16, %v34_v16 }
  0x9a   :  { %43 = vadd.xlane.f32.xlu0 %v37_v17  ;;  %41 = vadd.xlane.f32.xlu1 %v36_v18 }
  0x9e   :  { %45 = vadd.xlane.f32.xlu1 %v38_v19 }
 0x123   :  { %v40_v20 = vpop.xlane.xlu0 %39 }
 0x124   :  { %v47_v21 = vmul.f32 0.0078125, %v40_v20 }
 0x126   :  { %v51_v22 = vadd.f32 1e-05, %v47_v21 }
 0x127   :  { %v42_v23 = vpop.xlane.xlu1 %41  ;;  %v44_v24 = vpop.xlane.xlu0 %43 }
 0x128   :  { %95 = vrsqrt.f32 %v51_v22  ;;  %v48_v25 = vmul.f32 0.0078125, %v42_v23  ;;  %v49_v26 = vmul.f32 0.0078125, %v44_v24 }
 0x12a   :  { %v52_v27 = vadd.f32 1e-05, %v48_v25  ;;  %v53_v28 = vadd.f32 1e-05, %v49_v26 }
 0x12b   :  { %v46_v29 = vpop.xlane.xlu1 %45 }
 0x12c   :  { %97 = vrsqrt.f32 %v52_v27  ;;  %v50_v30 = vmul.f32 0.0078125, %v46_v29 }
 0x12d   :  { %99 = vrsqrt.f32 %v53_v28 }
 0x12e   :  { %v54_v31 = vadd.f32 1e-05, %v50_v30 }
 0x130   :  { %101 = vrsqrt.f32 %v54_v31 }
 0x132   :  { %v96_v32 = vpop.eup %95 }
 0x133   :  { %v59_v34 = vmul.f32 %v96_v32, %v31_v8 }
 0x135   :  { %v70_v36 = vmul.f32 %v93_v33, %v59_v34 }
 0x136   :  { %v98_v37 = vpop.eup %97 }
 0x137   :  { %v100_v38 = vpop.eup %99  ;;  %v81_v39 = vadd.f32 %v94_v35, %v70_v36  ;;  %v60_v40 = vmul.f32 %v98_v37, %v32_v15 }
 0x138   :  { %v61_v41 = vmul.f32 %v100_v38, %v33_v9 }
 0x139   :  { %85 = vst [vmem:[%s156_s3] sm:$0xff] %v81_v39  ;;  %v71_v42 = vmul.f32 %v93_v33, %v60_v40 }
 0x13a   :  { %v102_v43 = vpop.eup %101  ;;  %v72_v44 = vmul.f32 %v93_v33, %v61_v41 }
 0x13b   :  { %v82_v45 = vadd.f32 %v94_v35, %v71_v42  ;;  %v62_v46 = vmul.f32 %v102_v43, %v34_v16 }
 0x13c   :  { %v83_v47 = vadd.f32 %v94_v35, %v72_v44 }
 0x13d   :  { %86 = vst [vmem:[%s156_s3 + $0x8] sm:$0xff] %v82_v45  ;;  %v73_v48 = vmul.f32 %v93_v33, %v62_v46 }
 0x13e   :  { %87 = vst [vmem:[%s156_s3 + $0x10] sm:$0xff] %v83_v47 }
 0x13f   :  { %v84_v49 = vadd.f32 %v94_v35, %v73_v48 }
 0x141   :  { %88 = vst [vmem:[%s156_s3 + $0x18] sm:$0xff] %v84_v49 }

// kernel: _lambda_.51
= control target key start
LH: loop header
LB: loop body
LE: loop exit
PB: predicated region body
PF: predicated region fallthrough
CT: control target
= control target key end

     0   :  { %s306_s1 = inlined_call_operand.vmem [shape: bf16[128,128], index: 1, kind: input, shape index: {}]   ;;  %s307_s0 = inlined_call_operand.vmem [shape: bf16[32,128], index: 0, kind: input, shape index: {}]   ;;  %s308_s2 = inlined_call_operand.vmem [shape: f32[1,128], index: 2, kind: input, shape index: {}]   ;;  %s309_s3 = inlined_call_operand.vmem [shape: f32[32,128], index: 3, kind: output, shape index: {}]  }
   0x1   :  { %v231_v0 = vld [vmem:[%s306_s1] sm:$0xff]   ;;  %v232_v1 = vld [vmem:[%s306_s1 + $0x8] sm:$0xff]   ;;  %v233_v2 = vld [vmem:[%s306_s1 + $0x10] sm:$0xff]  }
   0x2   :  { %211 = vmatprep.subr.bf16.mxu0 %v231_v0  ;;  %v234_v3 = vld [vmem:[%s306_s1 + $0x18] sm:$0xff]   ;;  %v239_v4 = vld [vmem:[%s307_s0] sm:$0xff]   ;;  %v236_v6 = vld [vmem:[%s306_s1 + $0x28] sm:$0xff]  }
   0x3   :  { %212 = vmatpush3.bf16.msra.mxu0 %v231_v0  ;;  %227 = vmatprep.mubr.bf16.mxu0 %v239_v4  ;;  %v235_v5 = vld [vmem:[%s306_s1 + $0x20] sm:$0xff]   ;;  %v237_v7 = vld [vmem:[%s306_s1 + $0x30] sm:$0xff]   ;;  %v238_v8 = vld [vmem:[%s306_s1 + $0x38] sm:$0xff]  }
   0x4   :  { %213 = vmatprep.subr.bf16.mxu0 %v232_v1  ;;  %v240_v9 = vld [vmem:[%s307_s0 + $0x8] sm:$0xff]   ;;  %v200_v10 = vld [vmem:[%s308_s2] ss:$0 sm:$0xff] }
   0x7   :  { %214 = vmatpush3.bf16.msra.mxu0 %v232_v1 }
   0x8   :  { %215 = vmatprep.subr.bf16.mxu0 %v233_v2 }
   0xb   :  { %216 = vmatpush3.bf16.msra.mxu0 %v233_v2 }
   0xc   :  { %217 = vmatprep.subr.bf16.mxu0 %v234_v3 }
   0xf   :  { %218 = vmatpush3.bf16.msra.mxu0 %v234_v3 }
  0x10   :  { %219 = vmatprep.subr.bf16.mxu0 %v235_v5 }
  0x13   :  { %220 = vmatpush3.bf16.msra.mxu0 %v235_v5 }
  0x14   :  { %221 = vmatprep.subr.bf16.mxu0 %v236_v6 }
  0x17   :  { %222 = vmatpush3.bf16.msra.mxu0 %v236_v6 }
  0x18   :  { %223 = vmatprep.subr.bf16.mxu0 %v237_v7 }
  0x1b   :  { %224 = vmatpush3.bf16.msra.mxu0 %v237_v7 }
  0x1c   :  { %225 = vmatprep.subr.bf16.mxu0 %v238_v8 }
  0x1f   :  { %226 = vmatpush3.bf16.msra.mxu0 %v238_v8 }
  0x22   :  { %228 = vmatmul.mubr.bf16.vlgmr.msra.gmra.mrb[0].mxu0 %v240_v9 }
  0xf5   :  { %v229_v11 = vpop.f32.mrb[0].mxu0 }
  0xf6   :  { %v180_v12 = vadd.f32 %v229_v11, %v200_v10  ;;  %v141_v13 = vpop.f32.mrb[1].mxu0 }
  0xf7   :  { %v178_v14 = vadd.f32 %v200_v10, %v141_v13  ;;  %v230_v15 = vpop.f32.mrb[2].mxu0 }
  0xf8   :  { %184 = vst [vmem:[%s309_s3 + $0x10] sm:$0xff] %v180_v12  ;;  %v181_v16 = vadd.f32 %v230_v15, %v200_v10  ;;  %v144_v17 = vpop.f32.mrb[3].mxu0 }
  0xf9   :  { %182 = vst [vmem:[%s309_s3] sm:$0xff] %v178_v14  ;;  %v179_v18 = vadd.f32 %v200_v10, %v144_v17 }
  0xfa   :  { %185 = vst [vmem:[%s309_s3 + $0x18] sm:$0xff] %v181_v16 }
  0xfb   :  { %183 = vst [vmem:[%s309_s3 + $0x8] sm:$0xff] %v179_v18 }

// kernel: _lambda_.52
= control target key start
LH: loop header
LB: loop body
LE: loop exit
PB: predicated region body
PF: predicated region fallthrough
CT: control target
= control target key end

     0   :  { %vm18_vm0 = vcmask 523264   ;;  %s174_s0 = inlined_call_operand.vmem [shape: f32[32,64], index: 0, kind: input, shape index: {}]   ;;  %s175_s1 = inlined_call_operand.vmem [shape: f32[1,64], index: 1, kind: input, shape index: {}]   ;;  %s176_s2 = inlined_call_operand.vmem [shape: f32[1,64], index: 2, kind: input, shape index: {}]   ;;  %s177_s3 = inlined_call_operand.vmem [shape: f32[32,64], index: 3, kind: output, shape index: {}]  }
   0x1   :  { %v14_v0 = vld [vmem:[%s174_s0] sm:$0xff]  ;;  %v16_v1 = vld [vmem:[%s174_s0 + $0x10] sm:$0xff]  ;;  %v15_v2 = vld [vmem:[%s174_s0 + $0x8] sm:$0xff] }
   0x2   :  { %v19_v3 = vsel %vm18_vm0, %v14_v0, 0.0  ;;  %v25_v4 = vsel %vm18_vm0, %v16_v1, 0.0  ;;  %v17_v5 = vld [vmem:[%s174_s0 + $0x18] sm:$0xff]  ;;  %v22_v6 = vsel %vm18_vm0, %v15_v2, 0.0  ;;  %v102_v41 = vld [vmem:[%s175_s1] ss:$0 sm:$0xff] }
   0x3   :  { %20 = vadd.xlane.f32.xlu0 %v19_v3  ;;  %26 = vadd.xlane.f32.xlu1 %v25_v4  ;;  %v28_v7 = vsel %vm18_vm0, %v17_v5, 0.0  ;;  %v103_v43 = vld [vmem:[%s176_s2] ss:$0 sm:$0xff] }
   0x7   :  { %23 = vadd.xlane.f32.xlu0 %v22_v6  ;;  %29 = vadd.xlane.f32.xlu1 %v28_v7 }
  0x90   :  { %v21_v8 = vpop.xlane.xlu0 %20  ;;  %v27_v9 = vpop.xlane.xlu1 %26 }
  0x91   :  { %v32_v10 = vmul.f32 0.015625, %v21_v8  ;;  %v34_v11 = vmul.f32 0.015625, %v27_v9 }
  0x93   :  { %v36_v12 = vsub.f32 %v14_v0, %v32_v10  ;;  %v38_v13 = vsub.f32 %v16_v1, %v34_v11 }
  0x94   :  { %v24_v14 = vpop.xlane.xlu0 %23  ;;  %v30_v15 = vpop.xlane.xlu1 %29 }
  0x95   :  { %v33_v16 = vmul.f32 0.015625, %v24_v14  ;;  %v35_v17 = vmul.f32 0.015625, %v30_v15  ;;  %v40_v18 = vmul.f32 %v36_v12, %v36_v12  ;;  %v42_v19 = vmul.f32 %v38_v13, %v38_v13 }
  0x97   :  { %v37_v20 = vsub.f32 %v15_v2, %v33_v16  ;;  %v39_v21 = vsub.f32 %v17_v5, %v35_v17  ;;  %v44_v22 = vsel %vm18_vm0, %v40_v18, 0.0  ;;  %v50_v23 = vsel %vm18_vm0, %v42_v19, 0.0 }
  0x98   :  { %45 = vadd.xlane.f32.xlu0 %v44_v22 }
  0x99   :  { %v41_v24 = vmul.f32 %v37_v20, %v37_v20  ;;  %v43_v25 = vmul.f32 %v39_v21, %v39_v21 }
  0x9b   :  { %v47_v26 = vsel %vm18_vm0, %v41_v24, 0.0  ;;  %v53_v27 = vsel %vm18_vm0, %v43_v25, 0.0 }
  0x9c   :  { %51 = vadd.xlane.f32.xlu0 %v50_v23  ;;  %48 = vadd.xlane.f32.xlu1 %v47_v26 }
  0xa0   :  { %54 = vadd.xlane.f32.xlu1 %v53_v27 }
 0x125   :  { %v46_v28 = vpop.xlane.xlu0 %45 }
 0x126   :  { %v56_v29 = vmul.f32 0.015625, %v46_v28 }
 0x128   :  { %v60_v30 = vadd.f32 1e-05, %v56_v29 }
 0x129   :  { %v49_v31 = vpop.xlane.xlu1 %48  ;;  %v52_v32 = vpop.xlane.xlu0 %51 }
 0x12a   :  { %104 = vrsqrt.f32 %v60_v30  ;;  %v57_v33 = vmul.f32 0.015625, %v49_v31  ;;  %v58_v34 = vmul.f32 0.015625, %v52_v32 }
 0x12c   :  { %v61_v35 = vadd.f32 1e-05, %v57_v33  ;;  %v62_v36 = vadd.f32 1e-05, %v58_v34 }
 0x12d   :  { %v55_v37 = vpop.xlane.xlu1 %54 }
 0x12e   :  { %106 = vrsqrt.f32 %v61_v35  ;;  %v59_v38 = vmul.f32 0.015625, %v55_v37 }
 0x12f   :  { %108 = vrsqrt.f32 %v62_v36 }
 0x130   :  { %v63_v39 = vadd.f32 1e-05, %v59_v38 }
 0x132   :  { %110 = vrsqrt.f32 %v63_v39 }
 0x134   :  { %v105_v40 = vpop.eup %104 }
 0x135   :  { %v68_v42 = vmul.f32 %v105_v40, %v36_v12 }
 0x137   :  { %v79_v44 = vmul.f32 %v102_v41, %v68_v42 }
 0x138   :  { %v107_v45 = vpop.eup %106 }
 0x139   :  { %v109_v46 = vpop.eup %108  ;;  %v90_v47 = vadd.f32 %v103_v43, %v79_v44  ;;  %v69_v48 = vmul.f32 %v107_v45, %v37_v20 }
 0x13a   :  { %v70_v49 = vmul.f32 %v109_v46, %v38_v13 }
 0x13b   :  { %94 = vst.msk [vmem:[%s177_s3] sm:$0xff] %vm18_vm0, %v90_v47  ;;  %v80_v50 = vmul.f32 %v102_v41, %v69_v48 }
 0x13c   :  { %v111_v51 = vpop.eup %110  ;;  %v81_v52 = vmul.f32 %v102_v41, %v70_v49 }
 0x13d   :  { %v91_v53 = vadd.f32 %v103_v43, %v80_v50  ;;  %v71_v54 = vmul.f32 %v111_v51, %v39_v21 }
 0x13e   :  { %v92_v55 = vadd.f32 %v103_v43, %v81_v52 }
 0x13f   :  { %95 = vst.msk [vmem:[%s177_s3 + $0x8] sm:$0xff] %vm18_vm0, %v91_v53  ;;  %v82_v56 = vmul.f32 %v102_v41, %v71_v54 }
 0x140   :  { %96 = vst.msk [vmem:[%s177_s3 + $0x10] sm:$0xff] %vm18_vm0, %v92_v55 }
 0x141   :  { %v93_v57 = vadd.f32 %v103_v43, %v82_v56 }
 0x143   :  { %97 = vst.msk [vmem:[%s177_s3 + $0x18] sm:$0xff] %vm18_vm0, %v93_v57 }

// kernel: _lambda_.53
= control target key start
LH: loop header
LB: loop body
LE: loop exit
PB: predicated region body
PF: predicated region fallthrough
CT: control target
= control target key end

     0   :  { %v320_v1 = vmov 0   ;;  %v229_v19 = vlaneseq  ;;  %s422_s1 = inlined_call_operand.vmem [shape: bf16[128,256], index: 1, kind: input, shape index: {}]   ;;  %s423_s0 = inlined_call_operand.vmem [shape: bf16[32,128], index: 0, kind: input, shape index: {}]   ;;  %s424_s2 = inlined_call_operand.vmem [shape: f32[1,256], index: 2, kind: input, shape index: {}]   ;;  %s425_s3 = inlined_call_operand.vmem [shape: f32[32,256], index: 3, kind: output, shape index: {}]  }
   0x1   :  { %v294_v0 = vld [vmem:[%s422_s1 + $0x4] ss:$8 sps:$4 sm:$0xff]   ;;  %179 = vmatprep.mubr.bf16.mxu0 %v320_v1  ;;  %189 = vmatprep.mubr.bf16.mxu1 %v320_v1  ;;  %v296_v2 = vld [vmem:[%s422_s1] ss:$8 sps:$4 sm:$0xff]   ;;  %v297_v3 = vld [vmem:[%s422_s1 + $0x14] ss:$8 sps:$4 sm:$0xff]  }
   0x2   :  { %147 = vmatprep.subr.bf16.mxu0 %v294_v0  ;;  %277 = vmatprep.subr.bf16.mxu1 %v294_v0  ;;  %v299_v4 = vld [vmem:[%s422_s1 + $0x10] ss:$8 sps:$4 sm:$0xff]   ;;  %v300_v5 = vld [vmem:[%s422_s1 + $0x24] ss:$8 sps:$4 sm:$0xff]   ;;  %v302_v6 = vld [vmem:[%s422_s1 + $0x20] ss:$8 sps:$4 sm:$0xff]  }
   0x3   :  { %148 = vmatpush1.bf16.msra.mxu0 %v296_v2  ;;  %285 = vmatpush1.bf16.msra.mxu1 %v296_v2  ;;  %v303_v7 = vld [vmem:[%s422_s1 + $0x34] ss:$8 sps:$4 sm:$0xff]   ;;  %v305_v8 = vld [vmem:[%s422_s1 + $0x30] ss:$8 sps:$4 sm:$0xff]   ;;  %v306_v9 = vld [vmem:[%s422_s1 + $0x44] ss:$8 sps:$4 sm:$0xff]  }
   0x4   :  { %149 = vmatprep.subr.bf16.mxu0 %v297_v3  ;;  %278 = vmatprep.subr.bf16.mxu1 %v297_v3  ;;  %v308_v10 = vld [vmem:[%s422_s1 + $0x40] ss:$8 sps:$4 sm:$0xff]   ;;  %v309_v11 = vld [vmem:[%s422_s1 + $0x54] ss:$8 sps:$4 sm:$0xff]   ;;  %v311_v12 = vld [vmem:[%s422_s1 + $0x50] ss:$8 sps:$4 sm:$0xff]  }
   0x5   :  { %v312_v13 = vld [vmem:[%s422_s1 + $0x64] ss:$8 sps:$4 sm:$0xff]   ;;  %v314_v14 = vld [vmem:[%s422_s1 + $0x60] ss:$8 sps:$4 sm:$0xff]   ;;  %v315_v15 = vld [vmem:[%s422_s1 + $0x74] ss:$8 sps:$4 sm:$0xff]  }
   0x6   :  { %v317_v16 = vld [vmem:[%s422_s1 + $0x70] ss:$8 sps:$4 sm:$0xff]   ;;  %v318_v17 = vld [vmem:[%s423_s0] sm:$0xff]   ;;  %v319_v18 = vld [vmem:[%s423_s0 + $0x8] sm:$0xff]   ;;  %v230_v20 = vshrl.u32 %v229_v19, 7 }
   0x7   :  { %150 = vmatpush1.bf16.msra.mxu0 %v299_v4  ;;  %286 = vmatpush1.bf16.msra.mxu1 %v299_v4  ;;  %v227_v22 = vld [vmem:[%s424_s2] sm:$0x3] }
   0x8   :  { %151 = vmatprep.subr.bf16.mxu0 %v300_v5  ;;  %279 = vmatprep.subr.bf16.mxu1 %v300_v5  ;;  %v231_v21 = vsub.s32 0, %v230_v20  ;;  %v235_v23 = vsub.s32 1, %v230_v20 }
   0xa   :  { %v232_v24 = vrot.slane %v227_v22, %v231_v21  ;;  %v236_v25 = vrot.slane %v227_v22, %v235_v23 }
   0xb   :  { %152 = vmatpush1.bf16.msra.mxu0 %v302_v6  ;;  %287 = vmatpush1.bf16.msra.mxu1 %v302_v6 }
   0xc   :  { %153 = vmatprep.subr.bf16.mxu0 %v303_v7  ;;  %280 = vmatprep.subr.bf16.mxu1 %v303_v7 }
   0xf   :  { %154 = vmatpush1.bf16.msra.mxu0 %v305_v8  ;;  %288 = vmatpush1.bf16.msra.mxu1 %v305_v8 }
  0x10   :  { %155 = vmatprep.subr.bf16.mxu0 %v306_v9  ;;  %281 = vmatprep.subr.bf16.mxu1 %v306_v9 }
  0x13   :  { %156 = vmatpush1.bf16.msra.mxu0 %v308_v10  ;;  %289 = vmatpush1.bf16.msra.mxu1 %v308_v10 }
  0x14   :  { %157 = vmatprep.subr.bf16.mxu0 %v309_v11  ;;  %282 = vmatprep.subr.bf16.mxu1 %v309_v11 }
  0x17   :  { %158 = vmatpush1.bf16.msra.mxu0 %v311_v12  ;;  %290 = vmatpush1.bf16.msra.mxu1 %v311_v12 }
  0x18   :  { %159 = vmatprep.subr.bf16.mxu0 %v312_v13  ;;  %283 = vmatprep.subr.bf16.mxu1 %v312_v13 }
  0x1b   :  { %160 = vmatpush1.bf16.msra.mxu0 %v314_v14  ;;  %291 = vmatpush1.bf16.msra.mxu1 %v314_v14 }
  0x1c   :  { %161 = vmatprep.subr.bf16.mxu0 %v315_v15  ;;  %284 = vmatprep.subr.bf16.mxu1 %v315_v15 }
  0x1f   :  { %162 = vmatpush1.bf16.msra.mxu0 %v317_v16  ;;  %292 = vmatpush1.bf16.msra.mxu1 %v317_v16 }
  0x22   :  { %180 = vmatmul.mubr.bf16.vlgmr.msra.gmra.mrb[0].mxu0 %v318_v17  ;;  %190 = vmatmul.mubr.bf16.vlgmr.msra.gmra.mrb[0].mxu1 %v319_v18 }
  0xf5   :  { %v181_v26 = vpop.f32.mrb[0].mxu0  ;;  %v191_v27 = vpop.f32.mrb[0].mxu1 }
  0xf6   :  { %v239_v28 = vadd.f32 %v232_v24, %v181_v26  ;;  %v243_v29 = vadd.f32 %v232_v24, %v191_v27  ;;  %v183_v30 = vpop.f32.mrb[1].mxu0  ;;  %v193_v31 = vpop.f32.mrb[1].mxu1 }
  0xf7   :  { %v240_v32 = vadd.f32 %v236_v25, %v183_v30  ;;  %v244_v33 = vadd.f32 %v236_v25, %v193_v31  ;;  %v185_v34 = vpop.f32.mrb[2].mxu0  ;;  %v195_v35 = vpop.f32.mrb[2].mxu1 }
  0xf8   :  { %247 = vst [vmem:[%s425_s3] sm:$0xff] %v239_v28  ;;  %251 = vst [vmem:[%s425_s3 + $0x20] sm:$0xff] %v243_v29  ;;  %v241_v36 = vadd.f32 %v232_v24, %v185_v34  ;;  %v245_v37 = vadd.f32 %v232_v24, %v195_v35  ;;  %v187_v38 = vpop.f32.mrb[3].mxu0  ;;  %v197_v39 = vpop.f32.mrb[3].mxu1 }
  0xf9   :  { %248 = vst [vmem:[%s425_s3 + $0x8] sm:$0xff] %v240_v32  ;;  %252 = vst [vmem:[%s425_s3 + $0x28] sm:$0xff] %v244_v33  ;;  %v242_v40 = vadd.f32 %v236_v25, %v187_v38  ;;  %v246_v41 = vadd.f32 %v236_v25, %v197_v39 }
  0xfa   :  { %249 = vst [vmem:[%s425_s3 + $0x10] sm:$0xff] %v241_v36  ;;  %253 = vst [vmem:[%s425_s3 + $0x30] sm:$0xff] %v245_v37 }
  0xfb   :  { %250 = vst [vmem:[%s425_s3 + $0x18] sm:$0xff] %v242_v40  ;;  %254 = vst [vmem:[%s425_s3 + $0x38] sm:$0xff] %v246_v41 }

// kernel: _lambda_.54
= control target key start
LH: loop header
LB: loop body
LE: loop exit
PB: predicated region body
PF: predicated region fallthrough
CT: control target
= control target key end

     0   :  { %s1090_s15 = smov 0   ;;  %s1218_s0 = inlined_call_operand.vmem [shape: bf16[2,16,64], index: 0, kind: input, shape index: {}]   ;;  %s1219_s1 = inlined_call_operand.vmem [shape: bf16[2,16,64], index: 1, kind: input, shape index: {}]   ;;  %s1220_s2 = inlined_call_operand.vmem [shape: bf16[2,16,64], index: 2, kind: input, shape index: {}]   ;;  %s1221_s3 = inlined_call_operand.vmem [shape: f32[1,4,16,16], index: 3, kind: input, shape index: {}]   ;;  %s1222_s4 = inlined_call_operand.vmem [shape: bf16[2,16,64], index: 4, kind: output, shape index: {}]  }
   0x1 LB: > { %s885_s16 = sadd.s32 4294967295, %s1055_s15   ;;  %p889_p0 = scmp.ge.s32.totalorder %s1055_s15, 1  ;;  %s1055_s15 = sphi %s1090_s15, %s14_s15  }
   0x2   : > { %p182_p1 = scmp.lt.s32.totalorder %s1055_s15, 3 }
   0x4   : > { %p183_p2 = pnand %p889_p0, %p182_p1 }
   0x5   : > { %p218_p3 = scmp.lt.s32.totalorder (!%p183_p2), %s885_s16, 1  ;;  %v1057_v0 = vmov (!%p183_p2), 0.0   ;;  %vm1058_vm0 = vmmov (!%p183_p2), 0   ;;  %vm263_vm1 = vcmask (!%p183_p2), 130048   ;;  %v245_v5 = vld [vmem:[%s1221_s3] sm:$0xff] (!%p183_p2)  ;;  %v246_v9 = vld [vmem:[%s1221_s3 + $0x8] sm:$0xff] (!%p183_p2) }
   0x6   : > { %186 = sbr.rel (%p183_p2) target bundleno = 1503 (0x5df), region = 36  ;;  %935 = vmatprep.subr.bf16.mxu0 (!%p183_p2), %v1057_v0  ;;  %937 = vmatprep.mubr.msk.bf16.mxu0 (!%p183_p2), %vm1058_vm0, %v1057_v0  ;;  %s1059_s28 = smov (!%p183_p2), 112   ;;  %v247_v48 = vld [vmem:[%s1221_s3 + $0x10] sm:$0xff] (!%p183_p2)  ;;  %v248_v52 = vld [vmem:[%s1221_s3 + $0x18] sm:$0xff] (!%p183_p2)  ;;  %v249_v60 = vld [vmem:[%s1221_s3 + $0x20] sm:$0xff] (!%p183_p2)  ;;  %vm789_vm2 = vcmask (!%p183_p2), 261120  }
   0x7   : > { %941 = vmatprep.subr.bf16.mxu1 (!%p183_p2), %v1057_v0  ;;  %943 = vmatprep.mubr.msk.bf16.mxu1 (!%p183_p2), %vm1058_vm0, %v1057_v0  ;;  %s1060_s29 = smov (!%p183_p2), 80   ;;  %s1061_s7 = smov (!%p183_p2), 96   ;;  %vm792_vm3 = vcmask (!%p183_p2), 392192   ;;  %vm803_vm4 = vcmask (!%p183_p2), 519168  }
   0x8   : > { %s1062_s22 = smov (!%p183_p2), 16   ;;  %s1064_s24 = smov (!%p183_p2), 48  }
   0xd   : > { %s1224_s16 = smov (!%p218_p3, %s885_s16), 1 }
   0xe   : > { %s1104_s17 = sshll.u32 %s1224_s16, 3 }
   0xf   : > { %s227_s20 = scalar_lea.vmem %s1219_s1, %s1104_s17  ;;  %s222_s23 = scalar_lea.vmem %s1218_s0, %s1104_s17 }
  0x10   : > { %v1014_v1 = vld [vmem:[%s227_s20] sm:$0xff]   ;;  %s232_s6 = scalar_lea.vmem %s1220_s2, %s1104_s17  ;;  %s237_s27 = scalar_lea.vmem %s1222_s4, %s1104_s17 }
  0x11   : > { %v268_v2 = vsel %vm263_vm1, %v1014_v1, 0  ;;  %v1015_v3 = vld [vmem:[%s222_s23] sm:$0xff]   ;;  %s1063_s23 = smov 32  }
  0x12   : > { %936 = vmatpush3.bf16.xpose.msra.mxu0 %v268_v2  ;;  %v1135_v26 = vld [vmem:[%s232_s6] sm:$0xff]  }
  0x13   : > { %953 = vmatprep.subr.bf16.mxu0 %v1057_v0  ;;  %942 = vmatpush3.bf16.msra.mxu1 %v1135_v26 }
  0x14   : > { %947 = vmatprep.subr.bf16.mxu1 %v1057_v0 }
  0x19   : > { %938 = vmatmul.mubr.msk.bf16.vlgmr.msra.gmra.mrb[0].mxu0 %vm263_vm1, %v1015_v3 }
  0x1a   : > { %955 = vmatprep.mubr.msk.bf16.mxu0 %vm1058_vm0, %v1057_v0 }
  0xec   : > { %v304_v4 = vpop.f32.mrb[0].mxu0 }
  0xed   : > { %v311_v6 = vmul.f32 0.25, %v304_v4  ;;  %v939_v7 = vpop.f32.mrb[1].mxu0 }
  0xee   : > { %v307_v8 = vpop.f32.mrb[2].mxu0 }
  0xef   : > { %v312_v10 = vmul.f32 0.25, %v307_v8  ;;  %v940_v11 = vpop.f32.mrb[3].mxu0  ;;  %v313_v12 = vadd.f32 %v311_v6, %v245_v5  ;;  %v251_v8 = vld [vmem:[%s1221_s3 + $0x30] sm:$0xff] }
  0xf1   : > { %v315_v13 = vsel %vm263_vm1, %v313_v12, -inf  ;;  %v314_v14 = vadd.f32 %v312_v10, %v246_v9 }
  0xf2   : > { %316 = vmax.xlane.f32.xlu0 %v315_v13  ;;  %v252_v13 = vld [vmem:[%s1221_s3 + $0x38] sm:$0xff] }
  0xf3   : > { %v318_v15 = vsel %vm263_vm1, %v314_v14, -inf }
  0xf6   : > { %319 = vmax.xlane.f32.xlu0 %v318_v15 }
 0x10c   : > { %390 = vrot.lane.b32.xlu0 %v1014_v1, %s1059_s28 }
 0x110   : > { %640 = vrot.lane.b32.xlu0 %v1014_v1, %s1060_s29 }
 0x17f   : > { %v317_v16 = vpop.xlane.xlu0 %316 }
 0x180   : > { %v321_v17 = vsub.f32 %v313_v12, %v317_v16 }
 0x182   : > { %v323_v18 = vmul.f32 1.442695, %v321_v17 }
 0x183   : > { %v320_v19 = vpop.xlane.xlu0 %319 }
 0x184   : > { %1017 = vpow2.f32 %v323_v18  ;;  %v322_v20 = vsub.f32 %v314_v14, %v320_v19 }
 0x186   : > { %v325_v21 = vmul.f32 1.442695, %v322_v20 }
 0x187   : > { %v391_v31 = vpop.permute.xlu0 %390 }
 0x188   : > { %1019 = vpow2.f32 %v325_v21  ;;  %v396_v35 = vsel %vm263_vm1, %v391_v31, 0 }
 0x18b   : > { %v641_v39 = vpop.permute.xlu0 %640 }
 0x18c   : > { %v646_v41 = vsel %vm263_vm1, %v641_v39, 0 }
 0x18e   : > { %v1018_v22 = vpop.eup %1017 }
 0x18f   : > { %v327_v23 = vsel %vm263_vm1, %v1018_v22, 0.0 }
 0x190   : > { %328 = vadd.xlane.f32.xlu1 %v327_v23 }
 0x192   : > { %v1020_v24 = vpop.eup %1019 }
 0x193   : > { %v330_v25 = vsel %vm263_vm1, %v1020_v24, 0.0 }
 0x194   : > { %331 = vadd.xlane.f32.xlu1 %v330_v25 }
 0x1a5   : > { %388 = vrot.lane.b32.xlu1 %v1015_v3, %s1059_s28 }
 0x1a9   : > { %515 = vrot.lane.b32.xlu1 %v1014_v1, %s1061_s7  ;;  %v250_v1 = vld [vmem:[%s1221_s3 + $0x28] sm:$0xff] }
 0x1ad   : > { %513 = vrot.lane.b32.xlu1 %v1015_v3, %s1061_s7 }
 0x1b1   : > { %638 = vrot.lane.b32.xlu1 %v1015_v3, %s1060_s29 }
 0x21d   : > { %v329_v27 = vpop.xlane.xlu1 %328 }
 0x21e   : > { %1021 = vrcp.f32 %v329_v27 }
 0x221   : > { %v332_v28 = vpop.xlane.xlu1 %331 }
 0x222   : > { %1023 = vrcp.f32 %v332_v28 }
 0x225   : > { %v389_v34 = vpop.permute.xlu1 %388 }
 0x228   : > { %v1022_v29 = vpop.eup %1021 }
 0x229   : > { %v335_v32 = vmul.f32 %v1022_v29, %v1018_v22  ;;  %v516_v37 = vpop.permute.xlu1 %515 }
 0x22a   : > { %v521_v38 = vsel %vm263_vm1, %v516_v37, 0 }
 0x22c   : > { %v1024_v30 = vpop.eup %1023 }
 0x22d   : > { %v336_v33 = vmul.f32 %v1024_v30, %v1020_v24  ;;  %v514_v40 = vpop.permute.xlu1 %513 }
 0x22f   : > { %v337_v36 = vpack.c.bf16 %v336_v33, %v335_v32 }
 0x231   : > { %944 = vmatmul.mubr.msk.bf16.vlgmr.msra.gmra.mrb[0].mxu1 %vm263_vm1, %v337_v36  ;;  %v639_v42 = vpop.permute.xlu1 %638 }
 0x232   : > { %948 = vmatpush3.bf16.xpose.msra.mxu1 %v396_v35  ;;  %949 = vmatprep.mubr.msk.bf16.mxu1 %vm1058_vm0, %v1057_v0 }
 0x233   : > { %959 = vmatprep.subr.bf16.mxu1 %v1057_v0 }
 0x239   : > { %950 = vmatmul.mubr.msk.bf16.vlgmr.msra.gmra.mrb[4].mxu1 %vm263_vm1, %v389_v34 }
 0x23a   : > { %960 = vmatpush3.bf16.xpose.msra.mxu1 %v521_v38  ;;  %961 = vmatprep.mubr.msk.bf16.mxu1 %vm1058_vm0, %v1057_v0 }
 0x23b   : > { %971 = vmatprep.subr.bf16.mxu1 %v1057_v0 }
 0x241   : > { %962 = vmatmul.mubr.msk.bf16.vlgmr.msra.gmra.mrb[8].mxu1 %vm263_vm1, %v514_v40 }
 0x242   : > { %972 = vmatpush3.bf16.xpose.msra.mxu1 %v646_v41  ;;  %973 = vmatprep.mubr.msk.bf16.mxu1 %vm1058_vm0, %v1057_v0 }
 0x249   : > { %974 = vmatmul.mubr.msk.bf16.vlgmr.msra.gmra.mrb[12].mxu1 %vm263_vm1, %v639_v42 }
 0x304   : > { %v1158_v43 = vpop.f32.mrb[0].mxu1 }
 0x305   : > { %v945_v44 = vpop.f32.mrb[1].mxu1 }
 0x306   : > { %v1160_v45 = vpop.f32.mrb[2].mxu1 }
 0x307   : > { %v946_v46 = vpop.f32.mrb[3].mxu1 }
 0x30c   : > { %v432_v47 = vpop.f32.mrb[4].mxu1 }
 0x30d   : > { %v439_v49 = vmul.f32 0.25, %v432_v47  ;;  %v951_v50 = vpop.f32.mrb[5].mxu1 }
 0x30e   : > { %v435_v51 = vpop.f32.mrb[6].mxu1 }
 0x30f   : > { %v440_v53 = vmul.f32 0.25, %v435_v51  ;;  %v952_v54 = vpop.f32.mrb[7].mxu1  ;;  %v441_v55 = vadd.f32 %v439_v49, %v247_v48 }
 0x311   : > { %v443_v56 = vsel %vm263_vm1, %v441_v55, -inf  ;;  %v442_v57 = vadd.f32 %v440_v53, %v248_v52 }
 0x312   : > { %444 = vmax.xlane.f32.xlu0 %v443_v56 }
 0x313   : > { %v446_v58 = vsel %vm263_vm1, %v442_v57, -inf }
 0x314   : > { %447 = vmax.xlane.f32.xlu1 %v446_v58  ;;  %v557_v59 = vpop.f32.mrb[8].mxu1 }
 0x315   : > { %v564_v61 = vmul.f32 0.25, %v557_v59  ;;  %v963_v62 = vpop.f32.mrb[9].mxu1 }
 0x316   : > { %v560_v63 = vpop.f32.mrb[10].mxu1 }
 0x317   : > { %v565_v2 = vmul.f32 0.25, %v560_v63  ;;  %v964_v3 = vpop.f32.mrb[11].mxu1  ;;  %v566_v4 = vadd.f32 %v564_v61, %v249_v60 }
 0x319   : > { %v568_v5 = vsel %vm263_vm1, %v566_v4, -inf  ;;  %v567_v6 = vadd.f32 %v565_v2, %v250_v1 }
 0x31a   : > { %569 = vmax.xlane.f32.xlu0 %v568_v5 }
 0x31b   : > { %v571_v11 = vsel %vm263_vm1, %v567_v6, -inf }
 0x31c   : > { %v682_v7 = vpop.f32.mrb[12].mxu1 }
 0x31d   : > { %v689_v9 = vmul.f32 0.25, %v682_v7  ;;  %v975_v10 = vpop.f32.mrb[13].mxu1 }
 0x31e   : > { %572 = vmax.xlane.f32.xlu0 %v571_v11  ;;  %v685_v12 = vpop.f32.mrb[14].mxu1 }
 0x31f   : > { %v690_v14 = vmul.f32 0.25, %v685_v12  ;;  %v691_v15 = vadd.f32 %v689_v9, %v251_v8  ;;  %v976_v16 = vpop.f32.mrb[15].mxu1 }
 0x321   : > { %v693_v17 = vsel %vm263_vm1, %v691_v15, -inf  ;;  %v692_v18 = vadd.f32 %v690_v14, %v252_v13 }
 0x322   : > { %694 = vmax.xlane.f32.xlu0 %v693_v17 }
 0x323   : > { %v696_v19 = vsel %vm263_vm1, %v692_v18, -inf }
 0x324   : > { %697 = vmax.xlane.f32.xlu1 %v696_v19 }
 0x39f   : > { %v445_v20 = vpop.xlane.xlu0 %444 }
 0x3a0   : > { %v449_v21 = vsub.f32 %v441_v55, %v445_v20 }
 0x3a1   : > { %v448_v22 = vpop.xlane.xlu1 %447 }
 0x3a2   : > { %v451_v23 = vmul.f32 1.442695, %v449_v21  ;;  %v450_v24 = vsub.f32 %v442_v57, %v448_v22 }
 0x3a4   : > { %1025 = vpow2.f32 %v451_v23  ;;  %v453_v25 = vmul.f32 1.442695, %v450_v24 }
 0x3a6   : > { %1027 = vpow2.f32 %v453_v25 }
 0x3a7   : > { %v570_v27 = vpop.xlane.xlu0 %569 }
 0x3a8   : > { %v574_v28 = vsub.f32 %v566_v4, %v570_v27 }
 0x3aa   : > { %v576_v29 = vmul.f32 1.442695, %v574_v28 }
 0x3ab   : > { %v573_v30 = vpop.xlane.xlu0 %572 }
 0x3ac   : > { %1029 = vpow2.f32 %v576_v29  ;;  %v575_v31 = vsub.f32 %v567_v6, %v573_v30 }
 0x3ae   : > { %v1026_v32 = vpop.eup %1025  ;;  %v578_v33 = vmul.f32 1.442695, %v575_v31 }
 0x3af   : > { %v695_v34 = vpop.xlane.xlu0 %694  ;;  %v455_v35 = vsel %vm263_vm1, %v1026_v32, 0.0 }
 0x3b0   : > { %v1028_v36 = vpop.eup %1027  ;;  %1031 = vpow2.f32 %v578_v33  ;;  %v699_v37 = vsub.f32 %v691_v15, %v695_v34  ;;  %456 = vadd.xlane.f32.xlu0 %v455_v35 }
 0x3b1   : > { %v458_v38 = vsel %vm263_vm1, %v1028_v36, 0.0  ;;  %v698_v48 = vpop.xlane.xlu1 %697 }
 0x3b2   : > { %v701_v39 = vmul.f32 1.442695, %v699_v37  ;;  %459 = vadd.xlane.f32.xlu1 %v458_v38  ;;  %v700_v49 = vsub.f32 %v692_v18, %v698_v48 }
 0x3b4   : > { %1033 = vpow2.f32 %v701_v39  ;;  %v703_v50 = vmul.f32 1.442695, %v700_v49 }
 0x3b6   : > { %v1030_v40 = vpop.eup %1029  ;;  %1035 = vpow2.f32 %v703_v50 }
 0x3b7   : > { %v580_v41 = vsel %vm263_vm1, %v1030_v40, 0.0 }
 0x3b8   : > { %581 = vadd.xlane.f32.xlu0 %v580_v41 }
 0x3ba   : > { %v1032_v42 = vpop.eup %1031 }
 0x3bb   : > { %v583_v44 = vsel %vm263_vm1, %v1032_v42, 0.0 }
 0x3bc   : > { %584 = vadd.xlane.f32.xlu1 %v583_v44 }
 0x3be   : > { %v1034_v46 = vpop.eup %1033 }
 0x3bf   : > { %v705_v47 = vsel %vm263_vm1, %v1034_v46, 0.0 }
 0x3c0   : > { %706 = vadd.xlane.f32.xlu0 %v705_v47  ;;  %v1036_v51 = vpop.eup %1035 }
 0x3c1   : > { %v708_v52 = vsel %vm263_vm1, %v1036_v51, 0.0 }
 0x3cd   : > { %591 = vrot.lane.b32.xlu1 %v1135_v26, %s1061_s7 }
 0x3d6   : > { %466 = vrot.lane.b32.xlu0 %v1135_v26, %s1059_s28 }
 0x3f1   : > { %709 = vadd.xlane.f32.xlu1 %v708_v52 }
 0x402   : > { %716 = vrot.lane.b32.xlu1 %v1135_v26, %s1060_s29 }
 0x43d   : > { %v457_v54 = vpop.xlane.xlu0 %456 }
 0x43f   : > { %v460_v53 = vpop.xlane.xlu1 %459 }
 0x440   : > { %1037 = vrcp.f32 %v460_v53 }
 0x441   : > { %1039 = vrcp.f32 %v457_v54 }
 0x445   : > { %v582_v55 = vpop.xlane.xlu0 %581 }
 0x449   : > { %v585_v56 = vpop.xlane.xlu1 %584 }
 0x44a   : > { %1041 = vrcp.f32 %v585_v56  ;;  %v1038_v57 = vpop.eup %1037 }
 0x44b   : > { %1043 = vrcp.f32 %v582_v55  ;;  %v1040_v59 = vpop.eup %1039  ;;  %v464_v60 = vmul.f32 %v1038_v57, %v1028_v36 }
 0x44c   : > { %v463_v61 = vmul.f32 %v1040_v59, %v1026_v32 }
 0x44d   : > { %v707_v58 = vpop.xlane.xlu0 %706  ;;  %v592_v26 = vpop.permute.xlu1 %591 }
 0x44e   : > { %v465_v63 = vpack.c.bf16 %v464_v60, %v463_v61  ;;  %1045 = vrcp.f32 %v707_v58 }
 0x451   : > { %v467_v62 = vpop.permute.xlu0 %466 }
 0x452   : > { %954 = vmatpush3.bf16.msra.mxu0 %v467_v62 }
 0x453   : > { %965 = vmatprep.subr.bf16.mxu0 %v1057_v0 }
 0x454   : > { %v1042_v1 = vpop.eup %1041 }
 0x455   : > { %956 = vmatmul.mubr.msk.bf16.vlgmr.msra.gmra.mrb[4].mxu0 %vm263_vm1, %v465_v63  ;;  %v1044_v2 = vpop.eup %1043  ;;  %v589_v3 = vmul.f32 %v1042_v1, %v1032_v42 }
 0x456   : > { %966 = vmatpush3.bf16.msra.mxu0 %v592_v26  ;;  %967 = vmatprep.mubr.msk.bf16.mxu0 %vm1058_vm0, %v1057_v0  ;;  %v588_v4 = vmul.f32 %v1044_v2, %v1030_v40 }
 0x457   : > { %977 = vmatprep.subr.bf16.mxu0 %v1057_v0 }
 0x458   : > { %v590_v5 = vpack.c.bf16 %v589_v3, %v588_v4  ;;  %v1046_v8 = vpop.eup %1045 }
 0x459   : > { %v713_v10 = vmul.f32 %v1046_v8, %v1034_v46 }
 0x45d   : > { %968 = vmatmul.mubr.msk.bf16.vlgmr.msra.gmra.mrb[8].mxu0 %vm263_vm1, %v590_v5 }
 0x45e   : > { %979 = vmatprep.mubr.msk.bf16.mxu0 %vm1058_vm0, %v1057_v0 }
 0x47e   : > { %v710_v6 = vpop.xlane.xlu1 %709 }
 0x47f   : > { %1047 = vrcp.f32 %v710_v6 }
 0x482   : > { %v717_v7 = vpop.permute.xlu1 %716 }
 0x483   : > { %978 = vmatpush3.bf16.msra.mxu0 %v717_v7 }
 0x489   : > { %v1048_v9 = vpop.eup %1047 }
 0x48a   : > { %v714_v11 = vmul.f32 %v1048_v9, %v1036_v51 }
 0x48c   : > { %v715_v12 = vpack.c.bf16 %v714_v11, %v713_v10 }
 0x48e   : > { %980 = vmatmul.mubr.msk.bf16.vlgmr.msra.gmra.mrb[12].mxu0 %vm263_vm1, %v715_v12 }
 0x528   : > { %v506_v13 = vpop.f32.mrb[4].mxu0 }
 0x529   : > { %v957_v14 = vpop.f32.mrb[5].mxu0 }
 0x52a   : > { %v509_v15 = vpop.f32.mrb[6].mxu0 }
 0x52b   : > { %v999_v16 = vpack.i.bf16 %v509_v15, %v506_v13  ;;  %v958_v17 = vpop.f32.mrb[7].mxu0 }
 0x52d   : > { %1000 = vrot.lane.b32.xlu1 %v999_v16, %s1062_s22 }
 0x530   : > { %v631_v0 = vpop.f32.mrb[8].mxu0 }
 0x531   : > { %v969_v18 = vpop.f32.mrb[9].mxu0 }
 0x532   : > { %v634_v19 = vpop.f32.mrb[10].mxu0 }
 0x533   : > { %v1004_v20 = vpack.i.bf16 %v634_v19, %v631_v0  ;;  %v970_v21 = vpop.f32.mrb[11].mxu0 }
 0x535   : > { %1005 = vrot.lane.b32.xlu0 %v1004_v20, %s1063_s23 }
 0x561   : > { %v756_v22 = vpop.f32.mrb[12].mxu0 }
 0x562   : > { %v981_v23 = vpop.f32.mrb[13].mxu0 }
 0x563   : > { %v759_v24 = vpop.f32.mrb[14].mxu0 }
 0x564   : > { %v1009_v25 = vpack.i.bf16 %v759_v24, %v756_v22  ;;  %v982_v27 = vpop.f32.mrb[15].mxu0 }
 0x566   : > { %1010 = vrot.lane.b32.xlu1 %v1009_v25, %s1064_s24 }
 0x59f   : > { %v1001_v28 = vpop.permute.xlu1 %1000 }
 0x5a0   : > { %v1003_v30 = vunpack.i.h.bf16 %v1001_v28  ;;  %v1002_v31 = vunpack.i.l.bf16 %v1001_v28 }
 0x5a2   : > { %v788_v35 = vsel %vm263_vm1, %v1160_v45, %v1003_v30  ;;  %v787_v36 = vsel %vm263_vm1, %v1158_v43, %v1002_v31 }
 0x5a7   : > { %v1006_v29 = vpop.permute.xlu0 %1005 }
 0x5a8   : > { %v1008_v32 = vunpack.i.h.bf16 %v1006_v29  ;;  %v1007_v33 = vunpack.i.l.bf16 %v1006_v29 }
 0x5aa   : > { %v791_v39 = vsel %vm789_vm2, %v788_v35, %v1008_v32  ;;  %v790_v40 = vsel %vm789_vm2, %v787_v36, %v1007_v33 }
 0x5d8   : > { %v1011_v34 = vpop.permute.xlu1 %1010 }
 0x5d9   : > { %v1013_v37 = vunpack.i.h.bf16 %v1011_v34  ;;  %v1012_v38 = vunpack.i.l.bf16 %v1011_v34 }
 0x5db   : > { %v794_v41 = vsel %vm792_vm3, %v791_v39, %v1013_v37  ;;  %v793_v42 = vsel %vm792_vm3, %v790_v40, %v1012_v38 }
 0x5dc   : > { %v918_v44 = vpack.c.bf16 %v794_v41, %v794_v41  ;;  %v917_v46 = vpack.c.bf16 %v793_v42, %v793_v42 }
 0x5de   : > { %805 = vst.msk [vmem:[%s237_s27 + $0x4] sm:$0xf] %vm803_vm4, %v918_v44  ;;  %804 = vst.msk [vmem:[%s237_s27] sm:$0xf] %vm803_vm4, %v917_v46 }
 0x5df PF: > { %s14_s15 = sadd.s32 1, %s1055_s15  }
 0x5e0   : > { %p11_p4 = scmp.ge.s32.totalorder %s14_s15, 4  }
 0x5e2   :  { %13 = sbr.rel (!%p11_p4) target bundleno = 1 (0x1), region = 72 }

// kernel: _lambda_.57
= control target key start
LH: loop header
LB: loop body
LE: loop exit
PB: predicated region body
PF: predicated region fallthrough
CT: control target
= control target key end

     0   :  { %v568_v1 = vmov 0   ;;  %v229_v19 = vlaneseq  ;;  %s807_s1 = inlined_call_operand.vmem [shape: bf16[128,256], index: 1, kind: input, shape index: {}]   ;;  %s808_s0 = inlined_call_operand.vmem [shape: bf16[32,128], index: 0, kind: input, shape index: {}]   ;;  %s809_s2 = inlined_call_operand.vmem [shape: f32[1,256], index: 2, kind: input, shape index: {}]   ;;  %s810_s3 = inlined_call_operand.vmem [shape: f32[32,256], index: 3, kind: output, shape index: {}]  }
   0x1   :  { %v510_v0 = vld [vmem:[%s807_s1 + $0x4] ss:$8 sps:$4 sm:$0xff]   ;;  %179 = vmatprep.mubr.bf16.mxu0 %v568_v1  ;;  %189 = vmatprep.mubr.bf16.mxu1 %v568_v1  ;;  %v512_v2 = vld [vmem:[%s807_s1] ss:$8 sps:$4 sm:$0xff]   ;;  %v513_v3 = vld [vmem:[%s807_s1 + $0x14] ss:$8 sps:$4 sm:$0xff]  }
   0x2   :  { %147 = vmatprep.subr.bf16.mxu0 %v510_v0  ;;  %493 = vmatprep.subr.bf16.mxu1 %v510_v0  ;;  %v515_v4 = vld [vmem:[%s807_s1 + $0x10] ss:$8 sps:$4 sm:$0xff]   ;;  %v516_v5 = vld [vmem:[%s807_s1 + $0x24] ss:$8 sps:$4 sm:$0xff]   ;;  %v518_v6 = vld [vmem:[%s807_s1 + $0x20] ss:$8 sps:$4 sm:$0xff]  }
   0x3   :  { %148 = vmatpush1.bf16.msra.mxu0 %v512_v2  ;;  %501 = vmatpush1.bf16.msra.mxu1 %v512_v2  ;;  %v519_v7 = vld [vmem:[%s807_s1 + $0x34] ss:$8 sps:$4 sm:$0xff]   ;;  %v521_v8 = vld [vmem:[%s807_s1 + $0x30] ss:$8 sps:$4 sm:$0xff]   ;;  %v522_v9 = vld [vmem:[%s807_s1 + $0x44] ss:$8 sps:$4 sm:$0xff]  }
   0x4   :  { %149 = vmatprep.subr.bf16.mxu0 %v513_v3  ;;  %494 = vmatprep.subr.bf16.mxu1 %v513_v3  ;;  %v524_v10 = vld [vmem:[%s807_s1 + $0x40] ss:$8 sps:$4 sm:$0xff]   ;;  %v525_v11 = vld [vmem:[%s807_s1 + $0x54] ss:$8 sps:$4 sm:$0xff]   ;;  %v527_v12 = vld [vmem:[%s807_s1 + $0x50] ss:$8 sps:$4 sm:$0xff]  }
   0x5   :  { %v528_v13 = vld [vmem:[%s807_s1 + $0x64] ss:$8 sps:$4 sm:$0xff]   ;;  %v530_v14 = vld [vmem:[%s807_s1 + $0x60] ss:$8 sps:$4 sm:$0xff]   ;;  %v531_v15 = vld [vmem:[%s807_s1 + $0x74] ss:$8 sps:$4 sm:$0xff]  }
   0x6   :  { %v533_v16 = vld [vmem:[%s807_s1 + $0x70] ss:$8 sps:$4 sm:$0xff]   ;;  %v534_v17 = vld [vmem:[%s808_s0] sm:$0xff]   ;;  %v535_v18 = vld [vmem:[%s808_s0 + $0x8] sm:$0xff]   ;;  %v230_v20 = vshrl.u32 %v229_v19, 7 }
   0x7   :  { %150 = vmatpush1.bf16.msra.mxu0 %v515_v4  ;;  %502 = vmatpush1.bf16.msra.mxu1 %v515_v4  ;;  %v227_v22 = vld [vmem:[%s809_s2] sm:$0x3] }
   0x8   :  { %151 = vmatprep.subr.bf16.mxu0 %v516_v5  ;;  %495 = vmatprep.subr.bf16.mxu1 %v516_v5  ;;  %v231_v21 = vsub.s32 0, %v230_v20  ;;  %v235_v23 = vsub.s32 1, %v230_v20 }
   0xa   :  { %v232_v24 = vrot.slane %v227_v22, %v231_v21  ;;  %v236_v25 = vrot.slane %v227_v22, %v235_v23 }
   0xb   :  { %152 = vmatpush1.bf16.msra.mxu0 %v518_v6  ;;  %503 = vmatpush1.bf16.msra.mxu1 %v518_v6 }
   0xc   :  { %153 = vmatprep.subr.bf16.mxu0 %v519_v7  ;;  %496 = vmatprep.subr.bf16.mxu1 %v519_v7 }
   0xf   :  { %154 = vmatpush1.bf16.msra.mxu0 %v521_v8  ;;  %504 = vmatpush1.bf16.msra.mxu1 %v521_v8 }
  0x10   :  { %155 = vmatprep.subr.bf16.mxu0 %v522_v9  ;;  %497 = vmatprep.subr.bf16.mxu1 %v522_v9 }
  0x13   :  { %156 = vmatpush1.bf16.msra.mxu0 %v524_v10  ;;  %505 = vmatpush1.bf16.msra.mxu1 %v524_v10 }
  0x14   :  { %157 = vmatprep.subr.bf16.mxu0 %v525_v11  ;;  %498 = vmatprep.subr.bf16.mxu1 %v525_v11 }
  0x17   :  { %158 = vmatpush1.bf16.msra.mxu0 %v527_v12  ;;  %506 = vmatpush1.bf16.msra.mxu1 %v527_v12 }
  0x18   :  { %159 = vmatprep.subr.bf16.mxu0 %v528_v13  ;;  %499 = vmatprep.subr.bf16.mxu1 %v528_v13 }
  0x1b   :  { %160 = vmatpush1.bf16.msra.mxu0 %v530_v14  ;;  %507 = vmatpush1.bf16.msra.mxu1 %v530_v14 }
  0x1c   :  { %161 = vmatprep.subr.bf16.mxu0 %v531_v15  ;;  %500 = vmatprep.subr.bf16.mxu1 %v531_v15 }
  0x1f   :  { %162 = vmatpush1.bf16.msra.mxu0 %v533_v16  ;;  %508 = vmatpush1.bf16.msra.mxu1 %v533_v16 }
  0x22   :  { %180 = vmatmul.mubr.bf16.vlgmr.msra.gmra.mrb[0].mxu0 %v534_v17  ;;  %190 = vmatmul.mubr.bf16.vlgmr.msra.gmra.mrb[0].mxu1 %v535_v18 }
  0xf5   :  { %v181_v26 = vpop.f32.mrb[0].mxu0  ;;  %v191_v27 = vpop.f32.mrb[0].mxu1 }
  0xf6   :  { %v646_v28 = vadd.f32 %v232_v24, %v181_v26  ;;  %v648_v29 = vadd.f32 %v232_v24, %v191_v27  ;;  %v183_v30 = vpop.f32.mrb[1].mxu0  ;;  %v193_v31 = vpop.f32.mrb[1].mxu1 }
  0xf7   :  { %v650_v32 = vadd.f32 %v236_v25, %v183_v30  ;;  %v652_v33 = vadd.f32 %v236_v25, %v193_v31  ;;  %v185_v34 = vpop.f32.mrb[2].mxu0  ;;  %v195_v35 = vpop.f32.mrb[2].mxu1 }
  0xf8   :  { %v655_v36 = vmul.f32 0.70710677, %v646_v28  ;;  %v658_v37 = vmul.f32 0.70710677, %v648_v29  ;;  %v187_v50 = vpop.f32.mrb[3].mxu0  ;;  %v197_v51 = vpop.f32.mrb[3].mxu1  ;;  %v670_v53 = vadd.f32 %v232_v24, %v185_v34  ;;  %v672_v54 = vadd.f32 %v232_v24, %v195_v35 }
  0xf9   :  { %v661_v38 = vmul.f32 0.70710677, %v650_v32  ;;  %v664_v39 = vmul.f32 0.70710677, %v652_v33  ;;  %v677_v58 = vadd.f32 %v236_v25, %v187_v50  ;;  %v683_v62 = vadd.f32 %v236_v25, %v197_v51 }
  0xfa   :  { %v263_v40 = vand.u32 2147483647, %v655_v36  ;;  %v267_v41 = vand.u32 2147483647, %v658_v37  ;;  %v675_v57 = vmul.f32 0.70710677, %v670_v53 }
  0xfb   :  { %v264_v42 = vand.u32 2147483647, %v661_v38  ;;  %v268_v43 = vand.u32 2147483647, %v664_v39  ;;  %v680_v60 = vmul.f32 0.70710677, %v672_v54 }
  0xfc   :  { %v271_v44 = vmul.f32 0.3275911, %v263_v40  ;;  %v275_v45 = vmul.f32 0.3275911, %v267_v41  ;;  %v375_v55 = vsub.f32 0.0, %v263_v40  ;;  %v379_v59 = vsub.f32 0.0, %v267_v41 }
  0xfd   :  { %v272_v46 = vmul.f32 0.3275911, %v264_v42  ;;  %v276_v49 = vmul.f32 0.3275911, %v268_v43  ;;  %v265_v61 = vand.u32 2147483647, %v675_v57 }
  0xfe   :  { %v279_v47 = vadd.f32 1.0, %v271_v44  ;;  %v283_v48 = vadd.f32 1.0, %v275_v45  ;;  %v376_v63 = vsub.f32 0.0, %v264_v42  ;;  %v269_v0 = vand.u32 2147483647, %v680_v60 }
  0xff   :  { %v280_v52 = vadd.f32 1.0, %v272_v46  ;;  %v284_v56 = vadd.f32 1.0, %v276_v49  ;;  %v687_v1 = vmul.f32 0.70710677, %v677_v58  ;;  %v383_v2 = vmul.f32 %v375_v55, %v263_v40 }
 0x100   :  { %536 = vrcp.f32 %v279_v47  ;;  %v380_v3 = vsub.f32 0.0, %v268_v43  ;;  %v273_v4 = vmul.f32 0.3275911, %v265_v61  ;;  %v387_v5 = vmul.f32 %v379_v59, %v267_v41 }
 0x101   :  { %538 = vrcp.f32 %v283_v48  ;;  %v277_v6 = vmul.f32 0.3275911, %v269_v0  ;;  %v266_v7 = vand.u32 2147483647, %v687_v1  ;;  %v377_v9 = vsub.f32 0.0, %v265_v61 }
 0x102   :  { %540 = vrcp.f32 %v280_v52  ;;  %v281_v8 = vadd.f32 1.0, %v273_v4  ;;  %v691_v10 = vmul.f32 0.70710677, %v683_v62  ;;  %v384_v11 = vmul.f32 %v376_v63, %v264_v42 }
 0x103   :  { %542 = vrcp.f32 %v284_v56  ;;  %v285_v12 = vadd.f32 1.0, %v277_v6  ;;  %v381_v13 = vsub.f32 0.0, %v269_v0  ;;  %v274_v14 = vmul.f32 0.3275911, %v266_v7 }
 0x104   :  { %v391_v16 = vmul.f32 1.442695, %v383_v2  ;;  %v388_v17 = vmul.f32 %v380_v3, %v268_v43  ;;  %544 = vrcp.f32 %v281_v8  ;;  %v270_v18 = vand.u32 2147483647, %v691_v10 }
 0x105   :  { %v399_v21 = vmul.f32 1.442695, %v387_v5  ;;  %546 = vrcp.f32 %v285_v12  ;;  %v282_v22 = vadd.f32 1.0, %v274_v14  ;;  %v385_v24 = vmul.f32 %v377_v9, %v265_v61 }
 0x106   :  { %v378_v25 = vsub.f32 0.0, %v266_v7  ;;  %v278_v26 = vmul.f32 0.3275911, %v270_v18  ;;  %v701_v27 = vmul.f32 0.5, %v646_v28  ;;  %v393_v31 = vmul.f32 1.442695, %v384_v11 }
 0x107   :  { %v389_v34 = vmul.f32 %v381_v13, %v269_v0  ;;  %548 = vrcp.f32 %v282_v22  ;;  %v382_v42 = vsub.f32 0.0, %v270_v18  ;;  %v401_v45 = vmul.f32 1.442695, %v388_v17 }
 0x108   :  { %v286_v41 = vadd.f32 1.0, %v278_v26  ;;  %550 = vpow2.f32 %v391_v16  ;;  %v395_v47 = vmul.f32 1.442695, %v385_v24  ;;  %v386_v48 = vmul.f32 %v378_v25, %v266_v7 }
 0x109   :  { %552 = vpow2.f32 %v399_v21  ;;  %v403_v55 = vmul.f32 1.442695, %v389_v34  ;;  %v390_v56 = vmul.f32 %v382_v42, %v270_v18  ;;  %v716_v2 = vmul.f32 0.5, %v648_v29 }
 0x10a   :  { %v693_v15 = vpop.eup %536  ;;  %554 = vrcp.f32 %v286_v41  ;;  %v397_v4 = vmul.f32 1.442695, %v386_v48  ;;  %v730_v21 = vmul.f32 0.5, %v650_v32  ;;  %vm423_vm0 = vcmp.lt.f32.partialorder %v655_v36, 0.0 }
 0x10b   :  { %v696_v19 = vpop.eup %538  ;;  %v303_v20 = vmul.f32 1.0614054, %v693_v15  ;;  %556 = vpow2.f32 %v393_v31  ;;  %v405_v13 = vmul.f32 1.442695, %v390_v56  ;;  %vm427_vm1 = vcmp.lt.f32.partialorder %v658_v37, 0.0 }
 0x10c   :  { %v307_v23 = vmul.f32 1.0614054, %v696_v19  ;;  %v703_v35 = vpop.eup %540  ;;  %558 = vpow2.f32 %v401_v45  ;;  %vm424_vm2 = vcmp.lt.f32.partialorder %v661_v38, 0.0  ;;  %vm428_vm3 = vcmp.lt.f32.partialorder %v664_v39, 0.0 }
 0x10d   :  { %v311_v30 = vadd.f32 -1.4531521, %v303_v20  ;;  %v304_v44 = vmul.f32 1.0614054, %v703_v35  ;;  %v707_v46 = vpop.eup %542  ;;  %560 = vpow2.f32 %v395_v47  ;;  %vm425_vm4 = vcmp.lt.f32.partialorder %v675_v57, 0.0 }
 0x10e   :  { %v315_v40 = vadd.f32 -1.4531521, %v307_v23  ;;  %v308_v51 = vmul.f32 1.0614054, %v707_v46  ;;  %v713_v0 = vpop.eup %544  ;;  %562 = vpow2.f32 %v403_v55  ;;  %vm429_vm5 = vcmp.lt.f32.partialorder %v680_v60, 0.0 }
 0x10f   :  { %v319_v43 = vmul.f32 %v693_v15, %v311_v30  ;;  %v312_v50 = vadd.f32 -1.4531521, %v304_v44  ;;  %v719_v5 = vpop.eup %546  ;;  %v305_v9 = vmul.f32 1.0614054, %v713_v0  ;;  %564 = vpow2.f32 %v397_v4 }
 0x110   :  { %v323_v28 = vmul.f32 %v696_v19, %v315_v40  ;;  %v316_v63 = vadd.f32 -1.4531521, %v308_v51  ;;  %v309_v12 = vmul.f32 1.0614054, %v719_v5  ;;  %566 = vpow2.f32 %v405_v13 }
 0x111   :  { %v327_v49 = vadd.f32 1.4214138, %v319_v43  ;;  %v320_v61 = vmul.f32 %v703_v35, %v312_v50  ;;  %v313_v17 = vadd.f32 -1.4531521, %v305_v9  ;;  %v726_v18 = vpop.eup %548  ;;  %vm426_vm6 = vcmp.lt.f32.partialorder %v687_v1, 0.0 }
 0x112   :  { %v331_v52 = vadd.f32 1.4214138, %v323_v28  ;;  %v324_v8 = vmul.f32 %v707_v46, %v316_v63  ;;  %v317_v22 = vadd.f32 -1.4531521, %v309_v12  ;;  %v551_v23 = vpop.eup %550  ;;  %v306_v41 = vmul.f32 1.0614054, %v726_v18 }
 0x113   :  { %v335_v59 = vmul.f32 %v693_v15, %v327_v49  ;;  %v328_v7 = vadd.f32 1.4214138, %v320_v61  ;;  %v321_v30 = vmul.f32 %v713_v0, %v313_v17  ;;  %v553_v31 = vpop.eup %552  ;;  %vm430_vm7 = vcmp.lt.f32.partialorder %v691_v10, 0.0 }
 0x114   :  { %v339_v3 = vmul.f32 %v696_v19, %v331_v52  ;;  %v332_v16 = vadd.f32 1.4214138, %v324_v8  ;;  %v325_v40 = vmul.f32 %v719_v5, %v317_v22  ;;  %v737_v32 = vpop.eup %554  ;;  %v314_v49 = vadd.f32 -1.4531521, %v306_v41 }
 0x115   :  { %v343_v6 = vadd.f32 -0.28449672, %v335_v59  ;;  %v336_v14 = vmul.f32 %v703_v35, %v328_v7  ;;  %v329_v45 = vadd.f32 1.4214138, %v321_v30  ;;  %v557_v28 = vpop.eup %556  ;;  %v310_v50 = vmul.f32 1.0614054, %v737_v32 }
 0x116   :  { %v347_v11 = vadd.f32 -0.28449672, %v339_v3  ;;  %v340_v26 = vmul.f32 %v707_v46, %v332_v16  ;;  %v333_v48 = vadd.f32 1.4214138, %v325_v40  ;;  %v559_v51 = vpop.eup %558  ;;  %v322_v3 = vmul.f32 %v726_v18, %v314_v49 }
 0x117   :  { %v351_v29 = vmul.f32 %v693_v15, %v343_v6  ;;  %v344_v25 = vadd.f32 -0.28449672, %v336_v14  ;;  %v561_v59 = vpop.eup %560 }
 0x118   :  { %v355_v20 = vmul.f32 %v696_v19, %v347_v11  ;;  %v348_v44 = vadd.f32 -0.28449672, %v340_v26  ;;  %v341_v63 = vmul.f32 %v719_v5, %v333_v48  ;;  %v563_v9 = vpop.eup %562  ;;  %v330_v13 = vadd.f32 1.4214138, %v322_v3 }
 0x119   :  { %v359_v24 = vadd.f32 0.2548296, %v351_v29  ;;  %v352_v43 = vmul.f32 %v703_v35, %v344_v25  ;;  %v565_v22 = vpop.eup %564 }
 0x11a   :  { %v363_v34 = vadd.f32 0.2548296, %v355_v20  ;;  %v356_v56 = vmul.f32 %v707_v46, %v348_v44  ;;  %v349_v12 = vadd.f32 -0.28449672, %v341_v63  ;;  %v567_v40 = vpop.eup %566 }
 0x11b   :  { %v367_v42 = vmul.f32 %v693_v15, %v359_v24  ;;  %v360_v55 = vadd.f32 0.2548296, %v352_v43  ;;  %v337_v15 = vmul.f32 %v713_v0, %v329_v45  ;;  %v338_v24 = vmul.f32 %v726_v18, %v330_v13 }
 0x11c   :  { %v371_v47 = vmul.f32 %v696_v19, %v363_v34  ;;  %v318_v19 = vadd.f32 -1.4531521, %v310_v50  ;;  %v364_v7 = vadd.f32 0.2548296, %v356_v56 }
 0x11d   :  { %v407_v52 = vmul.f32 %v551_v23, %v367_v42  ;;  %v368_v6 = vmul.f32 %v703_v35, %v360_v55  ;;  %v345_v8 = vadd.f32 -0.28449672, %v337_v15  ;;  %v357_v35 = vmul.f32 %v719_v5, %v349_v12 }
 0x11e   :  { %v411_v61 = vmul.f32 %v553_v31, %v371_v47  ;;  %v326_v29 = vmul.f32 %v737_v32, %v318_v19  ;;  %v372_v17 = vmul.f32 %v707_v46, %v364_v7  ;;  %v346_v43 = vadd.f32 -0.28449672, %v338_v24 }
 0x11f   :  { %v415_v4 = vsub.f32 1.0, %v407_v52  ;;  %v408_v16 = vmul.f32 %v557_v28, %v368_v6  ;;  %v353_v20 = vmul.f32 %v713_v0, %v345_v8  ;;  %v365_v42 = vadd.f32 0.2548296, %v357_v35 }
 0x120   :  { %v419_v11 = vsub.f32 1.0, %v411_v61  ;;  %v334_v25 = vadd.f32 1.4214138, %v326_v29  ;;  %v412_v31 = vmul.f32 %v559_v51, %v372_v17  ;;  %v354_v49 = vmul.f32 %v726_v18, %v346_v43 }
 0x121   :  { %v431_v14 = vsub.f32 0.0, %v415_v4  ;;  %v416_v30 = vsub.f32 1.0, %v408_v16  ;;  %v361_v34 = vadd.f32 0.2548296, %v353_v20  ;;  %v373_v36 = vmul.f32 %v719_v5, %v365_v42 }
 0x122   :  { %v435_v23 = vsub.f32 0.0, %v419_v11  ;;  %v420_v28 = vsub.f32 1.0, %v412_v31  ;;  %v342_v50 = vmul.f32 %v737_v32, %v334_v25  ;;  %v252_v5 = vmul.f32 0.5, %v652_v33 }
 0x123   :  { %v439_v26 = vsel %vm423_vm0, %v431_v14, %v415_v4  ;;  %v432_v45 = vsub.f32 0.0, %v416_v30  ;;  %v369_v47 = vmul.f32 %v713_v0, %v361_v34  ;;  %v413_v56 = vmul.f32 %v563_v9, %v373_v36 }
 0x124   :  { %v447_v41 = vadd.f32 1.0, %v439_v26  ;;  %v443_v46 = vsel %vm427_vm1, %v435_v23, %v419_v11  ;;  %v436_v52 = vsub.f32 0.0, %v420_v28  ;;  %v350_v15 = vadd.f32 -0.28449672, %v342_v50 }
 0x125   :  { %v451_v44 = vadd.f32 1.0, %v443_v46  ;;  %v440_v37 = vsel %vm424_vm2, %v432_v45, %v416_v30  ;;  %v409_v55 = vmul.f32 %v561_v59, %v369_v47  ;;  %v421_v63 = vsub.f32 1.0, %v413_v56 }
 0x126   :  { %v455_v48 = vmul.f32 %v447_v41, %v701_v27  ;;  %v448_v0 = vadd.f32 1.0, %v440_v37  ;;  %v362_v27 = vadd.f32 0.2548296, %v354_v49  ;;  %v444_v38 = vsel %vm428_vm3, %v436_v52, %v420_v28 }
 0x127   :  { %v459_v51 = vmul.f32 %v451_v44, %v716_v2  ;;  %v417_v2 = vsub.f32 1.0, %v409_v55  ;;  %v452_v61 = vadd.f32 1.0, %v444_v38  ;;  %v358_v4 = vmul.f32 %v737_v32, %v350_v15 }
 0x128   :  { %463 = vst [vmem:[%s810_s3] sm:$0xff] %v455_v48  ;;  %v456_v59 = vmul.f32 %v448_v0, %v730_v21  ;;  %v370_v3 = vmul.f32 %v726_v18, %v362_v27  ;;  %v437_v33 = vsub.f32 0.0, %v421_v63  ;;  %v249_v18 = vmul.f32 0.5, %v670_v53 }
 0x129   :  { %467 = vst [vmem:[%s810_s3 + $0x20] sm:$0xff] %v459_v51  ;;  %v433_v19 = vsub.f32 0.0, %v417_v2  ;;  %v460_v6 = vmul.f32 %v452_v61, %v252_v5  ;;  %v366_v21 = vadd.f32 0.2548296, %v358_v4  ;;  %v253_v12 = vmul.f32 0.5, %v672_v54 }
 0x12a   :  { %464 = vst [vmem:[%s810_s3 + $0x8] sm:$0xff] %v456_v59  ;;  %v410_v39 = vmul.f32 %v565_v22, %v370_v3  ;;  %v445_v9 = vsel %vm429_vm5, %v437_v33, %v421_v63  ;;  %v250_v53 = vmul.f32 0.5, %v677_v58  ;;  %v254_v23 = vmul.f32 0.5, %v683_v62 }
 0x12b   :  { %v441_v7 = vsel %vm425_vm4, %v433_v19, %v417_v2  ;;  %468 = vst [vmem:[%s810_s3 + $0x28] sm:$0xff] %v460_v6  ;;  %v453_v13 = vadd.f32 1.0, %v445_v9  ;;  %v374_v57 = vmul.f32 %v737_v32, %v366_v21 }
 0x12c   :  { %v449_v8 = vadd.f32 1.0, %v441_v7  ;;  %v418_v11 = vsub.f32 1.0, %v410_v39 }
 0x12d   :  { %v461_v16 = vmul.f32 %v453_v13, %v253_v12  ;;  %v414_v60 = vmul.f32 %v567_v40, %v374_v57 }
 0x12e   :  { %v457_v29 = vmul.f32 %v449_v8, %v249_v18  ;;  %v434_v14 = vsub.f32 0.0, %v418_v11 }
 0x12f   :  { %469 = vst [vmem:[%s810_s3 + $0x30] sm:$0xff] %v461_v16  ;;  %v422_v20 = vsub.f32 1.0, %v414_v60 }
 0x130   :  { %465 = vst [vmem:[%s810_s3 + $0x10] sm:$0xff] %v457_v29  ;;  %v442_v17 = vsel %vm426_vm6, %v434_v14, %v418_v11 }
 0x131   :  { %v450_v54 = vadd.f32 1.0, %v442_v17  ;;  %v438_v22 = vsub.f32 0.0, %v422_v20 }
 0x133   :  { %v458_v32 = vmul.f32 %v450_v54, %v250_v53  ;;  %v446_v1 = vsel %vm430_vm7, %v438_v22, %v422_v20 }
 0x134   :  { %v454_v35 = vadd.f32 1.0, %v446_v1 }
 0x135   :  { %466 = vst [vmem:[%s810_s3 + $0x18] sm:$0xff] %v458_v32 }
 0x136   :  { %v462_v24 = vmul.f32 %v454_v35, %v254_v23 }
 0x138   :  { %470 = vst [vmem:[%s810_s3 + $0x38] sm:$0xff] %v462_v24 }

// kernel: _lambda_.58
= control target key start
LH: loop header
LB: loop body
LE: loop exit
PB: predicated region body
PF: predicated region fallthrough
CT: control target
= control target key end

     0   :  { %s472_s1 = inlined_call_operand.vmem [shape: bf16[256,128], index: 1, kind: input, shape index: {}]   ;;  %s473_s0 = inlined_call_operand.vmem [shape: bf16[32,256], index: 0, kind: input, shape index: {}]   ;;  %s474_s2 = inlined_call_operand.vmem [shape: f32[1,128], index: 2, kind: input, shape index: {}]   ;;  %s475_s3 = inlined_call_operand.vmem [shape: f32[32,128], index: 3, kind: input, shape index: {}]   ;;  %s476_s4 = inlined_call_operand.vmem [shape: f32[32,128], index: 4, kind: output, shape index: {}]  }
   0x1   :  { %v338_v0 = vld [vmem:[%s472_s1 + $0x40] sm:$0xff]   ;;  %v340_v2 = vld [vmem:[%s472_s1 + $0x48] sm:$0xff]   ;;  %v342_v4 = vld [vmem:[%s472_s1 + $0x50] sm:$0xff]  }
   0x2   :  { %v339_v1 = vld [vmem:[%s472_s1] sm:$0xff]   ;;  %294 = vmatprep.subr.bf16.mxu0 %v338_v0  ;;  %322 = vmatprep.subr.bf16.mxu1 %v338_v0  ;;  %v341_v3 = vld [vmem:[%s472_s1 + $0x8] sm:$0xff]   ;;  %v343_v5 = vld [vmem:[%s472_s1 + $0x10] sm:$0xff]  }
   0x3   :  { %295 = vmatpush3.bf16.msra.mxu0 %v339_v1  ;;  %330 = vmatpush3.bf16.msra.mxu1 %v339_v1  ;;  %v344_v6 = vld [vmem:[%s472_s1 + $0x58] sm:$0xff]   ;;  %v346_v8 = vld [vmem:[%s472_s1 + $0x60] sm:$0xff]   ;;  %v348_v10 = vld [vmem:[%s472_s1 + $0x68] sm:$0xff]  }
   0x4   :  { %296 = vmatprep.subr.bf16.mxu0 %v340_v2  ;;  %323 = vmatprep.subr.bf16.mxu1 %v340_v2  ;;  %v345_v7 = vld [vmem:[%s472_s1 + $0x18] sm:$0xff]   ;;  %v347_v9 = vld [vmem:[%s472_s1 + $0x20] sm:$0xff]   ;;  %v349_v13 = vld [vmem:[%s472_s1 + $0x28] sm:$0xff]  }
   0x5   :  { %v356_v11 = vld [vmem:[%s473_s0 + $0x4] ss:$8 sps:$4 sm:$0xff]   ;;  %v359_v12 = vld [vmem:[%s473_s0 + $0x14] ss:$8 sps:$4 sm:$0xff]   ;;  %v354_v18 = vld [vmem:[%s473_s0] ss:$8 sps:$4 sm:$0xff]  }
   0x6   :  { %v350_v14 = vld [vmem:[%s472_s1 + $0x70] sm:$0xff]   ;;  %214 = vmatprep.mubr.bf16.mxu0 %v356_v11  ;;  %222 = vmatprep.mubr.bf16.mxu1 %v359_v12  ;;  %v352_v16 = vld [vmem:[%s472_s1 + $0x78] sm:$0xff]   ;;  %v293_v23 = vld [vmem:[%s474_s2] ss:$0 sm:$0xff] }
   0x7   :  { %297 = vmatpush3.bf16.msra.mxu0 %v341_v3  ;;  %331 = vmatpush3.bf16.msra.mxu1 %v341_v3  ;;  %v351_v15 = vld [vmem:[%s472_s1 + $0x30] sm:$0xff]   ;;  %v353_v17 = vld [vmem:[%s472_s1 + $0x38] sm:$0xff]   ;;  %v257_v29 = vld [vmem:[%s475_s3] sm:$0xff] }
   0x8   :  { %298 = vmatprep.subr.bf16.mxu0 %v342_v4  ;;  %324 = vmatprep.subr.bf16.mxu1 %v342_v4  ;;  %v357_v19 = vld [vmem:[%s473_s0 + $0x10] ss:$8 sps:$4 sm:$0xff]   ;;  %v258_v37 = vld [vmem:[%s475_s3 + $0x8] sm:$0xff] }
   0x9   :  { %v259_v30 = vld [vmem:[%s475_s3 + $0x10] sm:$0xff]  ;;  %v260_v38 = vld [vmem:[%s475_s3 + $0x18] sm:$0xff] }
   0xb   :  { %299 = vmatpush3.bf16.msra.mxu0 %v343_v5  ;;  %332 = vmatpush3.bf16.msra.mxu1 %v343_v5 }
   0xc   :  { %300 = vmatprep.subr.bf16.mxu0 %v344_v6  ;;  %325 = vmatprep.subr.bf16.mxu1 %v344_v6 }
   0xf   :  { %301 = vmatpush3.bf16.msra.mxu0 %v345_v7  ;;  %333 = vmatpush3.bf16.msra.mxu1 %v345_v7 }
  0x10   :  { %302 = vmatprep.subr.bf16.mxu0 %v346_v8  ;;  %326 = vmatprep.subr.bf16.mxu1 %v346_v8 }
  0x13   :  { %303 = vmatpush3.bf16.msra.mxu0 %v347_v9  ;;  %334 = vmatpush3.bf16.msra.mxu1 %v347_v9 }
  0x14   :  { %304 = vmatprep.subr.bf16.mxu0 %v348_v10  ;;  %327 = vmatprep.subr.bf16.mxu1 %v348_v10 }
  0x17   :  { %305 = vmatpush3.bf16.msra.mxu0 %v349_v13  ;;  %335 = vmatpush3.bf16.msra.mxu1 %v349_v13 }
  0x18   :  { %306 = vmatprep.subr.bf16.mxu0 %v350_v14  ;;  %328 = vmatprep.subr.bf16.mxu1 %v350_v14 }
  0x1b   :  { %307 = vmatpush3.bf16.msra.mxu0 %v351_v15  ;;  %336 = vmatpush3.bf16.msra.mxu1 %v351_v15 }
  0x1c   :  { %308 = vmatprep.subr.bf16.mxu0 %v352_v16  ;;  %329 = vmatprep.subr.bf16.mxu1 %v352_v16 }
  0x1f   :  { %309 = vmatpush3.bf16.msra.mxu0 %v353_v17  ;;  %337 = vmatpush3.bf16.msra.mxu1 %v353_v17 }
  0x22   :  { %215 = vmatmul.mubr.bf16.vlgmr.msra.gmra.mrb[0].mxu0 %v354_v18  ;;  %223 = vmatmul.mubr.bf16.vlgmr.msra.gmra.mrb[0].mxu1 %v357_v19 }
  0xf5   :  { %v310_v20 = vpop.f32.mrb[0].mxu0  ;;  %v316_v21 = vpop.f32.mrb[0].mxu1 }
  0xf6   :  { %v311_v22 = vpop.f32.mrb[1].mxu0  ;;  %v317_v24 = vpop.f32.mrb[1].mxu1 }
  0xf7   :  { %v312_v25 = vadd.f32 %v311_v22, %v310_v20  ;;  %v318_v26 = vadd.f32 %v317_v24, %v316_v21  ;;  %v313_v27 = vpop.f32.mrb[2].mxu0  ;;  %v319_v28 = vpop.f32.mrb[2].mxu1 }
  0xf8   :  { %v314_v31 = vpop.f32.mrb[3].mxu0  ;;  %v320_v32 = vpop.f32.mrb[3].mxu1 }
  0xf9   :  { %v253_v33 = vadd.f32 %v312_v25, %v293_v23  ;;  %v255_v34 = vadd.f32 %v318_v26, %v293_v23  ;;  %v315_v35 = vadd.f32 %v314_v31, %v313_v27  ;;  %v321_v36 = vadd.f32 %v320_v32, %v319_v28 }
  0xfb   :  { %v261_v39 = vadd.f32 %v257_v29, %v253_v33  ;;  %v263_v40 = vadd.f32 %v259_v30, %v255_v34  ;;  %v254_v41 = vadd.f32 %v315_v35, %v293_v23  ;;  %v256_v42 = vadd.f32 %v321_v36, %v293_v23 }
  0xfd   :  { %265 = vst [vmem:[%s476_s4] sm:$0xff] %v261_v39  ;;  %267 = vst [vmem:[%s476_s4 + $0x10] sm:$0xff] %v263_v40  ;;  %v262_v43 = vadd.f32 %v258_v37, %v254_v41  ;;  %v264_v44 = vadd.f32 %v260_v38, %v256_v42 }
  0xff   :  { %266 = vst [vmem:[%s476_s4 + $0x8] sm:$0xff] %v262_v43  ;;  %268 = vst [vmem:[%s476_s4 + $0x18] sm:$0xff] %v264_v44 }

// kernel: _lambda_.67
= control target key start
LH: loop header
LB: loop body
LE: loop exit
PB: predicated region body
PF: predicated region fallthrough
CT: control target
= control target key end

     0   :  { %v193_v0 = vmov 0.0   ;;  %vm194_vm0 = vmmov 0   ;;  %s248_s1 = inlined_call_operand.vmem [shape: bf16[128,128], index: 1, kind: input, shape index: {}]   ;;  %s249_s0 = inlined_call_operand.vmem [shape: bf16[8,128], index: 0, kind: input, shape index: {}]   ;;  %s250_s2 = inlined_call_operand.vmem [shape: f32[1,128], index: 2, kind: input, shape index: {}]   ;;  %s251_s3 = inlined_call_operand.vmem [shape: f32[8,128], index: 3, kind: output, shape index: {}]  }
   0x1   :  { %163 = vmatprep.subr.bf16.mxu0 %v193_v0  ;;  %v185_v1 = vld [vmem:[%s248_s1] sm:$0xff]   ;;  %179 = vmatprep.mubr.msk.bf16.mxu0 %vm194_vm0, %v193_v0  ;;  %v186_v2 = vld [vmem:[%s248_s1 + $0x8] sm:$0xff]   ;;  %v187_v3 = vld [vmem:[%s248_s1 + $0x10] sm:$0xff]  }
   0x2   :  { %164 = vmatpush3.bf16.msra.mxu0 %v185_v1  ;;  %v188_v4 = vld [vmem:[%s248_s1 + $0x18] sm:$0xff]   ;;  %v189_v5 = vld [vmem:[%s248_s1 + $0x20] sm:$0xff]   ;;  %v190_v6 = vld [vmem:[%s248_s1 + $0x28] sm:$0xff]  }
   0x3   :  { %165 = vmatprep.subr.bf16.mxu0 %v193_v0  ;;  %v191_v7 = vld [vmem:[%s248_s1 + $0x30] sm:$0xff]   ;;  %v192_v8 = vld [vmem:[%s248_s1 + $0x38] sm:$0xff]   ;;  %v21_v9 = vld [vmem:[%s249_s0] sm:$0xf] }
   0x4   :  { %v153_v10 = vld [vmem:[%s250_s2] ss:$0 sm:$0xff] }
   0x6   :  { %166 = vmatpush3.bf16.msra.mxu0 %v186_v2 }
   0x7   :  { %167 = vmatprep.subr.bf16.mxu0 %v193_v0 }
   0xa   :  { %168 = vmatpush3.bf16.msra.mxu0 %v187_v3 }
   0xb   :  { %169 = vmatprep.subr.bf16.mxu0 %v193_v0 }
   0xe   :  { %170 = vmatpush3.bf16.msra.mxu0 %v188_v4 }
   0xf   :  { %171 = vmatprep.subr.bf16.mxu0 %v193_v0 }
  0x12   :  { %172 = vmatpush3.bf16.msra.mxu0 %v189_v5 }
  0x13   :  { %173 = vmatprep.subr.bf16.mxu0 %v193_v0 }
  0x16   :  { %174 = vmatpush3.bf16.msra.mxu0 %v190_v6 }
  0x17   :  { %175 = vmatprep.subr.bf16.mxu0 %v193_v0 }
  0x1a   :  { %176 = vmatpush3.bf16.msra.mxu0 %v191_v7 }
  0x1b   :  { %177 = vmatprep.subr.bf16.mxu0 %v193_v0 }
  0x1e   :  { %178 = vmatpush3.bf16.msra.mxu0 %v192_v8 }
  0x21   :  { %180 = vmatmul.mubr.bf16.vlgmr.msra.gmra.mrb[0].mxu0 %v21_v9 }
  0xf4   :  { %v120_v11 = vpop.f32.mrb[0].mxu0 }
  0xf5   :  { %v139_v12 = vadd.f32 %v153_v10, %v120_v11  ;;  %v181_v13 = vpop.f32.mrb[1].mxu0 }
  0xf6   :  { %v123_v14 = vpop.f32.mrb[2].mxu0 }
  0xf7   :  { %140 = vst [vmem:[%s251_s3] sm:$0xff] %v139_v12  ;;  %v182_v15 = vpop.f32.mrb[3].mxu0 }

</bundles_post_ra>
